<compile_context>
chip_gen: v7x
topology: tpu7x:2x2x1
jax: 0.10.0
libtpu: 0.0.40
codegen_flags: <defaults>
</compile_context>

<pallas_src>
import math

import jax
import jax.numpy as jnp
from jax.experimental import pallas as pl
from jax.experimental.pallas import tpu as pltpu

# ------------------------------ scaled-down config ------------------------------
B           = 2                 # batch
P           = 30                # num_patches (hard-coded 30 in the reference)
IMG         = 70                # img_size (224 in reference; CNN ends at 1x1 spatial here)
C1, C3      = 8, 24             # CNNnet2 conv channels (64, 128 in reference)
SE_RED      = 4                 # SE reduction (16 in reference)
FRAME_D     = C3 * 1 * 1        # per-frame flattened CNN feature (1152 in reference)
OV          = FRAME_D // 6      # token_overlap slice width (192 in reference)
TOK_D       = FRAME_D + 2 * OV  # PatchEmbed lin input (1536 in reference)
E           = 64                # embed_dim (1152 in a consistent reference config)
HEADS       = 4                 # num_heads (16 in reference)
DIM_HEAD    = E // HEADS
DEPTH       = 2                 # depth (12 in reference)
MLP_HIDDEN  = int(E * 4.0)
NG          = 12                # GCN nodes (510 in reference)
GCN_NH, GCN_NC = 4, 8
GLIN        = 16                # gcnlin output (100 in reference)
NUM_CLASSES = 10                # 1000 in reference
BN_EPS      = 1e-5
LN_EPS      = 1e-6
TM_MAX      = 128
NEG_MASK    = -987654321.0      # LSA diagonal mask value from the reference


def _round_up(v, m):
    return ((v + m - 1) // m) * m


# --------------------------- in-kernel math helpers ---------------------------

def _gelu(x):
    # tanh-form GELU: one EUP tanh instead of an erf polynomial (~10 VALU ops);
    # deviates from nn.GELU()'s exact erf form by ~1e-3 (fine for inference).
    c = math.sqrt(2.0 / math.pi)
    return 0.5 * x * (1.0 + jnp.tanh(c * (x + 0.044715 * x * x * x)))


def _ln(x, g, b, eps=LN_EPS):
    mu = jnp.mean(x, axis=-1, keepdims=True)
    xc = x - mu
    var = jnp.mean(xc * xc, axis=-1, keepdims=True)   # biased var (torch LayerNorm)
    return xc * jax.lax.rsqrt(var + eps) * g + b


# --------------------------------- Pallas kernels --------------------------------

def _convT_kernel(w_ref, x_ref, shift_ref, o_ref):
    # out[c, m] = relu((W_scaled @ X^T)[c, m] + shift[c]); lane axis = spatial m.
    # BN scale is pre-folded into the weight rows in the wrapper.
    acc = jnp.dot(w_ref[...], x_ref[...], preferred_element_type=jnp.float32)
    o_ref[...] = jnp.maximum(acc + shift_ref[...], 0.0).astype(o_ref.dtype)


def _se_gate_kernel(x_ref, w1_ref, w2_ref, o_ref):
    # sigmoid(relu(x @ w1) @ w2)  — both SE Linears have no bias.
    x = x_ref[...]
    y = jnp.maximum(jnp.dot(x, w1_ref[...], preferred_element_type=jnp.float32), 0.0)
    y = jnp.dot(y, w2_ref[...], preferred_element_type=jnp.float32)
    o_ref[...] = 1.0 / (1.0 + jnp.exp(-y))


def _linear_kernel(x_ref, w_ref, b_ref, o_ref):
    acc = jnp.dot(x_ref[...], w_ref[...], preferred_element_type=jnp.float32)
    o_ref[...] = acc + b_ref[...]


def _block_kernel(x_ref, lscale_ref, wqkv_ref, wo_ref, bo_ref,
                  ln1g_ref, ln1b_ref, ln2g_ref, ln2b_ref,
                  w1_ref, b1_ref, w2_ref, b2_ref, o_ref):
    """One full transformer Block for one batch element (grid=(B,), 'parallel')."""
    x = x_ref[0]                                            # (N, E) f32
    n = x.shape[0]
    # ---- attention branch: LN1 -> fused QKV -> per-head LSA attention -> proj ----
    h = _ln(x, ln1g_ref[...], ln1b_ref[...])
    qkv = jnp.dot(h.astype(jnp.bfloat16), wqkv_ref[...],
                  preferred_element_type=jnp.float32)       # (N, 3E), one MXU pass
    # Learned LSA temperature pre-folded into q via a per-lane scale vector.
    q = (qkv[:, :E] * lscale_ref[...]).astype(jnp.bfloat16)
    k = qkv[:, E:2 * E].astype(jnp.bfloat16)
    v = qkv[:, 2 * E:].astype(jnp.bfloat16)
    wo = wo_ref[...]
    diag = (jax.lax.broadcasted_iota(jnp.int32, (n, n), 0) ==
            jax.lax.broadcasted_iota(jnp.int32, (n, n), 1))
    proj = jnp.zeros((n, E), jnp.float32)
    for hh in range(HEADS):         # static unroll; each head contracts over Dh only
        sl = slice(hh * DIM_HEAD, (hh + 1) * DIM_HEAD)
        dots = jax.lax.dot_general(q[:, sl], k[:, sl], (((1,), (1,)), ((), ())),
                                   preferred_element_type=jnp.float32)   # (N, N)
        dots = jnp.where(diag, NEG_MASK, dots)              # LSA diagonal mask
        dots = dots - jnp.max(dots, axis=-1, keepdims=True)
        e = jnp.exp(dots)
        attn = (e * pl.reciprocal(jnp.sum(e, axis=-1, keepdims=True),
                                  approx=True)).astype(jnp.bfloat16)
        oh = jnp.dot(attn, v[:, sl], preferred_element_type=jnp.float32)  # (N, Dh)
        # out-projection accumulated per head (== concat(heads) @ W_o)
        proj = proj + jnp.dot(oh.astype(jnp.bfloat16), wo[sl, :],
                              preferred_element_type=jnp.float32)
    x1 = x + proj + bo_ref[...]                             # drop_path 0 -> identity
    # ---- MLP branch: LN2 -> fc1 -> GELU -> fc2 ----
    h2 = _ln(x1, ln2g_ref[...], ln2b_ref[...])
    mid = jnp.dot(h2.astype(jnp.bfloat16), w1_ref[...],
                  preferred_element_type=jnp.float32) + b1_ref[...]
    mid = _gelu(mid)
    out = jnp.dot(mid.astype(jnp.bfloat16), w2_ref[...],
                  preferred_element_type=jnp.float32) + b2_ref[...]
    o_ref[0] = x1 + out


def _tail_kernel(tcls_ref, ng_ref, nb_ref, g_ref,
                 glw_ref, glb_ref, mwf_ref, mwg_ref, mb_ref, hw_ref, hb_ref, o_ref):
    """Final LN (cls token) + gcnlin + mergelin + head, fused."""
    # norm(x)[:, 0] == norm(x[:, 0]) since LayerNorm is per-token.
    feat = _ln(tcls_ref[...], ng_ref[...], nb_ref[...])                     # (B, E)
    z = jnp.dot(g_ref[...], glw_ref[...],
                preferred_element_type=jnp.float32) + glb_ref[...]          # (B, GLIN)
    # mergelin on concat(feat, z) expressed as a split matmul (no in-kernel concat)
    merged = (jnp.dot(feat, mwf_ref[...], preferred_element_type=jnp.float32)
              + jnp.dot(z, mwg_ref[...], preferred_element_type=jnp.float32)
              + mb_ref[...])
    o_ref[...] = jnp.dot(merged, hw_ref[...],
                         preferred_element_type=jnp.float32) + hb_ref[...]


# ------------------------------ kernel wrappers ------------------------------

def _im2col(x_nhwc, kh, kw, s, p):
    # TODO(synk): im2col / maxpool / token_overlap / pad+transpose are cheap layout
    #             glue kept in XLA; the heavy matmuls run in Pallas.
    Bn, H, W, C = x_nhwc.shape
    xp = jnp.pad(x_nhwc, ((0, 0), (p, p), (p, p), (0, 0)))
    Ho = (H + 2 * p - kh) // s + 1
    Wo = (W + 2 * p - kw) // s + 1
    ih = (jnp.arange(Ho) * s)[:, None] + jnp.arange(kh)[None, :]
    iw = (jnp.arange(Wo) * s)[:, None] + jnp.arange(kw)[None, :]
    patches = xp[:, ih]                            # (B, Ho, kh, Wp, C)
    patches = patches[:, :, :, iw]                 # (B, Ho, kh, Wo, kw, C)
    patches = patches.transpose(0, 1, 3, 5, 2, 4)  # (B, Ho, Wo, C, kh, kw) == torch weight order
    return patches.reshape(Bn, Ho, Wo, C * kh * kw)


def conv_bn_relu(x_nhwc, w_oihw, conv_b, bn, stride, padding):
    """Conv2d + eval-mode BatchNorm + ReLU as one lane-dense transposed Pallas matmul.

    BN scale is folded into the bf16 weight rows; output is emitted in bf16 to halve
    the writeback + downstream XLA layout traffic (v5e HBM relief)."""
    Cout, Cin, kh, kw = w_oihw.shape
    cols = _im2col(x_nhwc, kh, kw, stride, padding)           # (Bn, Ho, Wo, K)
    Bn, Ho, Wo, K = cols.shape
    M = Bn * Ho * Wo
    xT = cols.reshape(M, K).T.astype(jnp.bfloat16)            # (K, M), lane axis = spatial
    tn = min(1024, _round_up(M, 128))
    Mp = _round_up(M, tn)
    xT = jnp.pad(xT, ((0, 0), (0, Mp - M)))
    gamma, beta, rmean, rvar = bn
    inv = (gamma / jnp.sqrt(rvar + BN_EPS)).astype(jnp.float32)
    wmat = (w_oihw.reshape(Cout, Cin * kh * kw).astype(jnp.float32)
            * inv[:, None]).astype(jnp.bfloat16)              # BN scale folded in
    shift = (beta + (conv_b - rmean) * inv).reshape(Cout, 1).astype(jnp.float32)
    out = pl.pallas_call(
        _convT_kernel,
        grid=(Mp // tn,),
        in_specs=[
            pl.BlockSpec((Cout, K), lambda j: (0, 0)),
            pl.BlockSpec((K, tn), lambda j: (0, j)),
            pl.BlockSpec((Cout, 1), lambda j: (0, 0)),
        ],
        out_specs=pl.BlockSpec((Cout, tn), lambda j: (0, j)),
        out_shape=jax.ShapeDtypeStruct((Cout, Mp), jnp.bfloat16),
        compiler_params=pltpu.CompilerParams(dimension_semantics=("parallel",)),
    )(wmat, xT, shift)
    return out[:, :M].T.reshape(Bn, Ho, Wo, Cout)


def maxpool2x2(x_nhwc):
    Bn, H, W, C = x_nhwc.shape
    x = x_nhwc[:, :(H // 2) * 2, :(W // 2) * 2, :]
    return jnp.max(x.reshape(Bn, H // 2, 2, W // 2, 2, C), axis=(2, 4))


def se_block(x_nhwc, w1, w2):
    Bn, H, W, C = x_nhwc.shape
    pooled = jnp.mean(x_nhwc.astype(jnp.float32), axis=(1, 2))   # AdaptiveAvgPool2d(1)
    Mp = _round_up(Bn, 8)
    xp = jnp.pad(pooled, ((0, Mp - Bn), (0, 0)))
    gates = pl.pallas_call(
        _se_gate_kernel,
        grid=(1,),
        in_specs=[pl.BlockSpec((Mp, C), lambda i: (0, 0)),
                  pl.BlockSpec(w1.shape, lambda i: (0, 0)),
                  pl.BlockSpec(w2.shape, lambda i: (0, 0))],
        out_specs=pl.BlockSpec((Mp, C), lambda i: (0, 0)),
        out_shape=jax.ShapeDtypeStruct((Mp, C), jnp.float32),
    )(xp, w1.astype(jnp.float32), w2.astype(jnp.float32))
    return x_nhwc * gates[:Bn].astype(x_nhwc.dtype)[:, None, None, :]


def pallas_linear(x, w, bias):
    """(x @ w) + bias, bf16 operands / f32 accumulation, adaptive row tile."""
    *lead, K = x.shape
    N = w.shape[1]
    x2 = x.reshape(-1, K)
    M = x2.shape[0]
    tm = min(TM_MAX, _round_up(M, 8))
    Mp = _round_up(M, tm)
    x2 = jnp.pad(x2.astype(jnp.bfloat16), ((0, Mp - M), (0, 0)))
    out = pl.pallas_call(
        _linear_kernel,
        grid=(Mp // tm,),
        in_specs=[pl.BlockSpec((tm, K), lambda i: (i, 0)),
                  pl.BlockSpec((K, N), lambda i: (0, 0)),
                  pl.BlockSpec((1, N), lambda i: (0, 0))],
        out_specs=pl.BlockSpec((tm, N), lambda i: (i, 0)),
        out_shape=jax.ShapeDtypeStruct((Mp, N), jnp.float32),
        compiler_params=pltpu.CompilerParams(dimension_semantics=("parallel",)),
    )(x2, w.astype(jnp.bfloat16), bias.reshape(1, N).astype(jnp.float32))
    return out[:M].reshape(*lead, N)


def block_forward(x, p):
    Bn, N, _ = x.shape
    bf = lambda a: a.astype(jnp.bfloat16)
    row = lambda a: a.reshape(1, -1).astype(jnp.float32)
    # per-lane LSA temperature: scale[h] repeated over that head's Dh lanes
    lane_scale = jnp.repeat(p["attn_scale"].astype(jnp.float32), DIM_HEAD).reshape(1, E)
    args = (x.astype(jnp.float32), lane_scale,
            bf(p["qkv_w"]), bf(p["out_w"]), row(p["out_b"]),
            row(p["ln1_g"]), row(p["ln1_b"]), row(p["ln2_g"]), row(p["ln2_b"]),
            bf(p["fc1_w"]), row(p["fc1_b"]), bf(p["fc2_w"]), row(p["fc2_b"]))
    in_specs = [pl.BlockSpec((1, N, E), lambda b: (b, 0, 0))]
    # constant index_map -> weights are DMA'd once and stay resident across grid steps
    in_specs += [pl.BlockSpec(a.shape, lambda b: (0, 0)) for a in args[1:]]
    # TODO(synk): at reference scale, add a K/N-tiled reduction grid axis with
    #             pl.Buffered(1) stationary weights and fold B into the row dim.
    return pl.pallas_call(
        _block_kernel,
        grid=(Bn,),
        in_specs=in_specs,
        out_specs=pl.BlockSpec((1, N, E), lambda b: (b, 0, 0)),
        out_shape=jax.ShapeDtypeStruct((Bn, N, E), jnp.float32),
        compiler_params=pltpu.CompilerParams(
            dimension_semantics=("parallel",),
            vmem_limit_bytes=32 * 1024 * 1024),   # >= v5e's 16 MiB default scoped limit
    )(*args)


def au_gcn(y, params):
    """AU-GCN: adj @ (Y w1), adj @ (H w2) as tiny dense matmuls.

    Kept in XLA (review-sanctioned): operands are <= (NG, 8) so this stage is
    negligible, and the Kronecker-lifted form would need ~66 MB operands at
    reference NG=510 (larger than v7x's entire VMEM)."""
    adj = jnp.round(jax.nn.sigmoid(params["gcn_A"] * params["gcn_mask"]))
    s1 = jnp.einsum('bnf,fh->bnh', y, params["gc1_w"])
    h1 = jax.nn.relu(jnp.einsum('nm,bmh->bnh', adj, s1) + params["gc1_b"])
    s2 = jnp.einsum('bnh,hc->bnc', h1, params["gc2_w"])
    g = jnp.einsum('nm,bmc->bnc', adj, s2) + params["gc2_b"]
    return g.reshape(g.shape[0], -1)                           # node-major flatten


def tail_forward(t_cls, g_flat, params):
    """Final LN + gcnlin + mergelin + head in one pallas_call."""
    Bn = t_cls.shape[0]
    args = (t_cls.astype(jnp.float32),
            params["norm_g"].reshape(1, E), params["norm_b"].reshape(1, E),
            g_flat.astype(jnp.float32),
            params["gcnlin_w"], params["gcnlin_b"].reshape(1, -1),
            params["mergelin_w"][:E], params["mergelin_w"][E:],
            params["mergelin_b"].reshape(1, E),
            params["head_w"], params["head_b"].reshape(1, -1))
    in_specs = [pl.BlockSpec(a.shape, lambda i: (0, 0)) for a in args]
    return pl.pallas_call(
        _tail_kernel,
        grid=(1,),
        in_specs=in_specs,
        out_specs=pl.BlockSpec((Bn, NUM_CLASSES), lambda i: (0, 0)),
        out_shape=jax.ShapeDtypeStruct((Bn, NUM_CLASSES), jnp.float32),
    )(*args)


# ------------------------------ model forward ------------------------------

def token_overlap(x):
    x_head = x[:, :1, :]
    x_tail = x[:, -1:, :]
    x_body = x[:, 1:-1, :]
    x_1 = jnp.concatenate([x_body, x_tail, x_tail], axis=1)[:, :, :OV]
    x_3 = jnp.concatenate([x_head, x_head, x_body], axis=1)[:, :, :OV]
    return jnp.concatenate([x_1, x, x_3], axis=2)


def patch_embed(x, p):
    Bn, Pn, C, H, W = x.shape
    frames = x.reshape(Bn * Pn, C, H, W).transpose(0, 2, 3, 1)        # NCHW -> NHWC
    h = conv_bn_relu(frames, p["conv1_w"], p["conv1_b"], p["bn1"], stride=7, padding=1)
    h = maxpool2x2(h)
    h = conv_bn_relu(h, p["conv3_w"], p["conv3_b"], p["bn3"], stride=2, padding=1)
    h = maxpool2x2(h)
    h = se_block(h, p["se_w1"], p["se_w2"])
    feat = h.transpose(0, 3, 1, 2).reshape(Bn, Pn, -1)                # NCHW flatten order
    feat = token_overlap(feat)
    # norm_layer is None in the reference constructor call -> nn.Identity()
    return pallas_linear(feat, p["lin_w"], p["lin_b"])


def vit_forward(x, y, params):
    tokens = patch_embed(x, params["patch_embed"])                    # (B, P, E) f32
    Bn = tokens.shape[0]
    cls = jnp.broadcast_to(params["cls_token"], (Bn, 1, E))
    t = jnp.concatenate([cls, tokens], axis=1) + params["pos_embed"]  # pos_drop p=0
    for bp in params["blocks"]:
        t = block_forward(t, bp)
    g_flat = au_gcn(y, params)
    return tail_forward(t[:, 0], g_flat, params)                      # final norm fused into tail


# ------------------------------ deterministic init ------------------------------

def init_params(key):
    ks = iter(jax.random.split(key, 64))
    nk = lambda: next(ks)

    def kaiming_conv(k, cout, cin, kh, kw):
        std = math.sqrt(2.0 / (cout * kh * kw))        # kaiming_normal_, mode='fan_out'
        return std * jax.random.normal(k, (cout, cin, kh, kw), jnp.float32)

    def lin_w(k, fin, fout, std=0.01):                 # trunc_normal_(std=0.01)
        return std * jax.random.truncated_normal(k, -2.0, 2.0, (fin, fout), jnp.float32)

    bn_id = lambda c: (jnp.ones((c,), jnp.float32), jnp.zeros((c,), jnp.float32),
                       jnp.zeros((c,), jnp.float32), jnp.ones((c,), jnp.float32))

    patch = dict(
        conv1_w=kaiming_conv(nk(), C1, 1, 7, 7), conv1_b=jnp.zeros((C1,), jnp.float32), bn1=bn_id(C1),
        conv3_w=kaiming_conv(nk(), C3, C1, 5, 5), conv3_b=jnp.zeros((C3,), jnp.float32), bn3=bn_id(C3),
        se_w1=lin_w(nk(), C3, C3 // SE_RED), se_w2=lin_w(nk(), C3 // SE_RED, C3),
        lin_w=lin_w(nk(), TOK_D, E), lin_b=jnp.zeros((E,), jnp.float32),
    )

    blocks = []
    for _ in range(DEPTH):
        blocks.append(dict(
            ln1_g=jnp.ones((E,), jnp.float32), ln1_b=jnp.zeros((E,), jnp.float32),
            qkv_w=lin_w(nk(), E, 3 * HEADS * DIM_HEAD),               # to_qkv (bias=False)
            attn_scale=(DIM_HEAD ** -0.5) * jnp.ones((HEADS,), jnp.float32),
            out_w=lin_w(nk(), HEADS * DIM_HEAD, E), out_b=jnp.zeros((E,), jnp.float32),
            ln2_g=jnp.ones((E,), jnp.float32), ln2_b=jnp.zeros((E,), jnp.float32),
            fc1_w=lin_w(nk(), E, MLP_HIDDEN), fc1_b=jnp.zeros((MLP_HIDDEN,), jnp.float32),
            fc2_w=lin_w(nk(), MLP_HIDDEN, E), fc2_b=jnp.zeros((E,), jnp.float32),
        ))

    s1, s2 = 1.0 / math.sqrt(GCN_NH), 1.0 / math.sqrt(GCN_NC)
    return dict(
        patch_embed=patch,
        cls_token=0.02 * jax.random.truncated_normal(nk(), -2.0, 2.0, (1, 1, E), jnp.float32),
        pos_embed=0.02 * jax.random.truncated_normal(nk(), -2.0, 2.0, (1, P + 1, E), jnp.float32),
        blocks=blocks,
        norm_g=jnp.ones((E,), jnp.float32), norm_b=jnp.zeros((E,), jnp.float32),
        gcn_A=jax.random.normal(nk(), (NG, NG), jnp.float32),
        gcn_mask=(jax.random.uniform(nk(), (NG, NG)) > 0.3).astype(jnp.float32),
        gc1_w=jax.random.uniform(nk(), (1, GCN_NH), jnp.float32, -s1, s1),
        gc1_b=jax.random.uniform(nk(), (GCN_NH,), jnp.float32, -s1, s1),
        gc2_w=jax.random.uniform(nk(), (GCN_NH, GCN_NC), jnp.float32, -s2, s2),
        gc2_b=jax.random.uniform(nk(), (GCN_NC,), jnp.float32, -s2, s2),
        gcnlin_w=lin_w(nk(), NG * GCN_NC, GLIN), gcnlin_b=jnp.zeros((GLIN,), jnp.float32),
        mergelin_w=lin_w(nk(), E + GLIN, E), mergelin_b=jnp.zeros((E,), jnp.float32),
        head_w=lin_w(nk(), E, NUM_CLASSES), head_b=jnp.zeros((NUM_CLASSES,), jnp.float32),
    )


if __name__ == "__main__":
    key = jax.random.PRNGKey(0)
    kp, kx, ky = jax.random.split(key, 3)
    params = init_params(kp)
    x = jax.random.normal(kx, (B, P, 1, IMG, IMG), jnp.float32)   # clip of P frames, NCHW each
    y = jax.random.normal(ky, (B, NG, 1), jnp.float32)            # AU-GCN node features
    out = jax.jit(vit_forward)(x, y, params)
    out = jax.block_until_ready(out)
    assert out.shape == (B, NUM_CLASSES), out.shape
    assert bool(jnp.all(jnp.isfinite(out)))
    print("KERNEL_OK")
</pallas_src>

<mosaic_0001>
module attributes {stable_mosaic.version = 11 : i64} {
  func.func @_convT_kernel(%arg0: i32, %arg1: memref<8x49xbf16, #tpu.memory_space<vmem>>, %arg2: memref<49x1024xbf16, #tpu.memory_space<vmem>>, %arg3: memref<8x1xf32, #tpu.memory_space<vmem>>, %arg4: memref<8x1024xbf16, #tpu.memory_space<vmem>>) attributes {dimension_semantics = [#tpu.dimension_semantics<parallel>], iteration_bounds = array<i64: 6>, scalar_prefetch = 0 : i64, scratch_operands = 0 : i64, tpu.core_type = #tpu.core_type<tc>, window_params = [{pipeline_mode = #tpu.pipeline_mode<synchronous>, transform_indices = @transform_0, window_bounds = array<i64: 8, 49>}, {transform_indices = @transform_1, window_bounds = array<i64: 49, 1024>}, {pipeline_mode = #tpu.pipeline_mode<synchronous>, transform_indices = @transform_2, window_bounds = array<i64: 8, 1>}, {transform_indices = @transform_3, window_bounds = array<i64: 8, 1024>}]} {
    %c0 = arith.constant 0 : index
    %c0_0 = arith.constant 0 : index
    %0 = vector.load %arg1[%c0, %c0_0] : memref<8x49xbf16, #tpu.memory_space<vmem>>, vector<8x49xbf16>
    %c0_1 = arith.constant 0 : index
    %c0_2 = arith.constant 0 : index
    %1 = vector.load %arg2[%c0_1, %c0_2] : memref<49x1024xbf16, #tpu.memory_space<vmem>>, vector<49x1024xbf16>
    %cst = arith.constant dense<0.000000e+00> : vector<8x1024xf32>
    %2 = tpu.matmul %0, %1, %cst {dimension_numbers = #tpu.dot_dimension_numbers<[1], [0], [0], [1], [0, 0, 1, 1], [], []>} : vector<8x49xbf16>, vector<49x1024xbf16>, vector<8x1024xf32> -> vector<8x1024xf32>
    %c0_3 = arith.constant 0 : index
    %c0_4 = arith.constant 0 : index
    %3 = vector.load %arg3[%c0_3, %c0_4] : memref<8x1xf32, #tpu.memory_space<vmem>>, vector<8x1xf32>
    %4 = vector.broadcast %3 : vector<8x1xf32> to vector<8x1024xf32>
    %5 = arith.addf %2, %4 : vector<8x1024xf32>
    %cst_5 = arith.constant 0.000000e+00 : f32
    %6 = vector.broadcast %cst_5 : f32 to vector<8x1024xf32>
    %7 = arith.maximumf %5, %6 : vector<8x1024xf32>
    %8 = arith.truncf %7 : vector<8x1024xf32> to vector<8x1024xbf16>
    %c0_6 = arith.constant 0 : index
    %c0_7 = arith.constant 0 : index
    %9 = vector.load %arg4[%c0_6, %c0_7] : memref<8x1024xbf16, #tpu.memory_space<vmem>>, vector<8x1024xbf16>
    tpu.vector_store %arg4[%c0_6, %c0_7], %8 {strides = array<i32>} : memref<8x1024xbf16, #tpu.memory_space<vmem>>, vector<8x1024xbf16>,
    return
  }
  func.func @transform_0(%arg0: i32) -> (i32, i32) {
    %c0_i32 = arith.constant 0 : i32
    %c0_i32_0 = arith.constant 0 : i32
    %c0_i32_1 = arith.constant 0 : i32
    return %c0_i32, %c0_i32_0 : i32, i32
  }
  func.func @transform_1(%arg0: i32) -> (i32, i32) {
    %c0_i32 = arith.constant 0 : i32
    %c0_i32_0 = arith.constant 0 : i32
    return %c0_i32, %arg0 : i32, i32
  }
  func.func @transform_2(%arg0: i32) -> (i32, i32) {
    %c0_i32 = arith.constant 0 : i32
    %c0_i32_0 = arith.constant 0 : i32
    %c0_i32_1 = arith.constant 0 : i32
    return %c0_i32, %c0_i32_0 : i32, i32
  }
  func.func @transform_3(%arg0: i32) -> (i32, i32) {
    %c0_i32 = arith.constant 0 : i32
    %c0_i32_0 = arith.constant 0 : i32
    return %c0_i32, %arg0 : i32, i32
  }
}

module attributes {stable_mosaic.version = 11 : i64} {
  func.func @_convT_kernel(%arg0: i32, %arg1: memref<24x200xbf16, #tpu.memory_space<vmem>>, %arg2: memref<200x256xbf16, #tpu.memory_space<vmem>>, %arg3: memref<24x1xf32, #tpu.memory_space<vmem>>, %arg4: memref<24x256xbf16, #tpu.memory_space<vmem>>) attributes {dimension_semantics = [#tpu.dimension_semantics<parallel>], iteration_bounds = array<i64: 1>, scalar_prefetch = 0 : i64, scratch_operands = 0 : i64, tpu.core_type = #tpu.core_type<tc>, window_params = [{pipeline_mode = #tpu.pipeline_mode<synchronous>, transform_indices = @transform_0, window_bounds = array<i64: 24, 200>}, {transform_indices = @transform_1, window_bounds = array<i64: 200, 256>}, {pipeline_mode = #tpu.pipeline_mode<synchronous>, transform_indices = @transform_2, window_bounds = array<i64: 24, 1>}, {transform_indices = @transform_3, window_bounds = array<i64: 24, 256>}]} {
    %c0 = arith.constant 0 : index
    %c0_0 = arith.constant 0 : index
    %0 = vector.load %arg1[%c0, %c0_0] : memref<24x200xbf16, #tpu.memory_space<vmem>>, vector<24x200xbf16>
    %c0_1 = arith.constant 0 : index
    %c0_2 = arith.constant 0 : index
    %1 = vector.load %arg2[%c0_1, %c0_2] : memref<200x256xbf16, #tpu.memory_space<vmem>>, vector<200x256xbf16>
    %cst = arith.constant dense<0.000000e+00> : vector<24x256xf32>
    %2 = tpu.matmul %0, %1, %cst {dimension_numbers = #tpu.dot_dimension_numbers<[1], [0], [0], [1], [0, 0, 1, 1], [], []>} : vector<24x200xbf16>, vector<200x256xbf16>, vector<24x256xf32> -> vector<24x256xf32>
    %c0_3 = arith.constant 0 : index
    %c0_4 = arith.constant 0 : index
    %3 = vector.load %arg3[%c0_3, %c0_4] : memref<24x1xf32, #tpu.memory_space<vmem>>, vector<24x1xf32>
    %4 = vector.broadcast %3 : vector<24x1xf32> to vector<24x256xf32>
    %5 = arith.addf %2, %4 : vector<24x256xf32>
    %cst_5 = arith.constant 0.000000e+00 : f32
    %6 = vector.broadcast %cst_5 : f32 to vector<24x256xf32>
    %7 = arith.maximumf %5, %6 : vector<24x256xf32>
    %8 = arith.truncf %7 : vector<24x256xf32> to vector<24x256xbf16>
    %c0_6 = arith.constant 0 : index
    %c0_7 = arith.constant 0 : index
    %9 = vector.load %arg4[%c0_6, %c0_7] : memref<24x256xbf16, #tpu.memory_space<vmem>>, vector<24x256xbf16>
    tpu.vector_store %arg4[%c0_6, %c0_7], %8 {strides = array<i32>} : memref<24x256xbf16, #tpu.memory_space<vmem>>, vector<24x256xbf16>,
    return
  }
  func.func @transform_0(%arg0: i32) -> (i32, i32) {
    %c0_i32 = arith.constant 0 : i32
    %c0_i32_0 = arith.constant 0 : i32
    %c0_i32_1 = arith.constant 0 : i32
    return %c0_i32, %c0_i32_0 : i32, i32
  }
  func.func @transform_1(%arg0: i32) -> (i32, i32) {
    %c0_i32 = arith.constant 0 : i32
    %c0_i32_0 = arith.constant 0 : i32
    return %c0_i32, %arg0 : i32, i32
  }
  func.func @transform_2(%arg0: i32) -> (i32, i32) {
    %c0_i32 = arith.constant 0 : i32
    %c0_i32_0 = arith.constant 0 : i32
    %c0_i32_1 = arith.constant 0 : i32
    return %c0_i32, %c0_i32_0 : i32, i32
  }
  func.func @transform_3(%arg0: i32) -> (i32, i32) {
    %c0_i32 = arith.constant 0 : i32
    %c0_i32_0 = arith.constant 0 : i32
    return %c0_i32, %arg0 : i32, i32
  }
}

module attributes {stable_mosaic.version = 11 : i64} {
  func.func @_se_gate_kernel(%arg0: i32, %arg1: memref<64x24xf32, #tpu.memory_space<vmem>>, %arg2: memref<24x6xf32, #tpu.memory_space<vmem>>, %arg3: memref<6x24xf32, #tpu.memory_space<vmem>>, %arg4: memref<64x24xf32, #tpu.memory_space<vmem>>) attributes {dimension_semantics = [#tpu.dimension_semantics<arbitrary>], iteration_bounds = array<i64: 1>, scalar_prefetch = 0 : i64, scratch_operands = 0 : i64, tpu.core_type = #tpu.core_type<tc>, window_params = [{pipeline_mode = #tpu.pipeline_mode<synchronous>, transform_indices = @transform_0, window_bounds = array<i64: 64, 24>}, {pipeline_mode = #tpu.pipeline_mode<synchronous>, transform_indices = @transform_1, window_bounds = array<i64: 24, 6>}, {pipeline_mode = #tpu.pipeline_mode<synchronous>, transform_indices = @transform_2, window_bounds = array<i64: 6, 24>}, {pipeline_mode = #tpu.pipeline_mode<synchronous>, transform_indices = @transform_3, window_bounds = array<i64: 64, 24>}]} {
    %c0 = arith.constant 0 : index
    %c0_0 = arith.constant 0 : index
    %0 = vector.load %arg1[%c0, %c0_0] : memref<64x24xf32, #tpu.memory_space<vmem>>, vector<64x24xf32>
    %c0_1 = arith.constant 0 : index
    %c0_2 = arith.constant 0 : index
    %1 = vector.load %arg2[%c0_1, %c0_2] : memref<24x6xf32, #tpu.memory_space<vmem>>, vector<24x6xf32>
    %cst = arith.constant dense<0.000000e+00> : vector<64x6xf32>
    %2 = tpu.matmul %0, %1, %cst {dimension_numbers = #tpu.dot_dimension_numbers<[1], [0], [0], [1], [0, 0, 1, 1], [], []>} : vector<64x24xf32>, vector<24x6xf32>, vector<64x6xf32> -> vector<64x6xf32>
    %cst_3 = arith.constant 0.000000e+00 : f32
    %3 = vector.broadcast %cst_3 : f32 to vector<64x6xf32>
    %4 = arith.maximumf %2, %3 : vector<64x6xf32>
    %c0_4 = arith.constant 0 : index
    %c0_5 = arith.constant 0 : index
    %5 = vector.load %arg3[%c0_4, %c0_5] : memref<6x24xf32, #tpu.memory_space<vmem>>, vector<6x24xf32>
    %cst_6 = arith.constant dense<0.000000e+00> : vector<64x24xf32>
    %6 = tpu.matmul %4, %5, %cst_6 {dimension_numbers = #tpu.dot_dimension_numbers<[1], [0], [0], [1], [0, 0, 1, 1], [], []>} : vector<64x6xf32>, vector<6x24xf32>, vector<64x24xf32> -> vector<64x24xf32>
    %cst_7 = arith.constant 0.000000e+00 : f32
    %7 = vector.broadcast %cst_7 : f32 to vector<64x24xf32>
    %8 = arith.subf %7, %6 : vector<64x24xf32>
    %9 = math.exp %8 : vector<64x24xf32>
    %cst_8 = arith.constant 1.000000e+00 : f32
    %10 = vector.broadcast %cst_8 : f32 to vector<64x24xf32>
    %11 = arith.addf %10, %9 : vector<64x24xf32>
    %cst_9 = arith.constant 1.000000e+00 : f32
    %12 = vector.broadcast %cst_9 : f32 to vector<64x24xf32>
    %13 = arith.divf %12, %11 : vector<64x24xf32>
    %c0_10 = arith.constant 0 : index
    %c0_11 = arith.constant 0 : index
    %14 = vector.load %arg4[%c0_10, %c0_11] : memref<64x24xf32, #tpu.memory_space<vmem>>, vector<64x24xf32>
    tpu.vector_store %arg4[%c0_10, %c0_11], %13 {strides = array<i32>} : memref<64x24xf32, #tpu.memory_space<vmem>>, vector<64x24xf32>,
    return
  }
  func.func @transform_0(%arg0: i32) -> (i32, i32) {
    %c0_i32 = arith.constant 0 : i32
    %c0_i32_0 = arith.constant 0 : i32
    %c0_i32_1 = arith.constant 0 : i32
    return %c0_i32, %c0_i32_0 : i32, i32
  }
  func.func @transform_1(%arg0: i32) -> (i32, i32) {
    %c0_i32 = arith.constant 0 : i32
    %c0_i32_0 = arith.constant 0 : i32
    %c0_i32_1 = arith.constant 0 : i32
    return %c0_i32, %c0_i32_0 : i32, i32
  }
  func.func @transform_2(%arg0: i32) -> (i32, i32) {
    %c0_i32 = arith.constant 0 : i32
    %c0_i32_0 = arith.constant 0 : i32
    %c0_i32_1 = arith.constant 0 : i32
    return %c0_i32, %c0_i32_0 : i32, i32
  }
  func.func @transform_3(%arg0: i32) -> (i32, i32) {
    %c0_i32 = arith.constant 0 : i32
    %c0_i32_0 = arith.constant 0 : i32
    %c0_i32_1 = arith.constant 0 : i32
    return %c0_i32, %c0_i32_0 : i32, i32
  }
}

module attributes {stable_mosaic.version = 11 : i64} {
  func.func @_linear_kernel(%arg0: i32, %arg1: memref<64x32xbf16, #tpu.memory_space<vmem>>, %arg2: memref<32x64xbf16, #tpu.memory_space<vmem>>, %arg3: memref<1x64xf32, #tpu.memory_space<vmem>>, %arg4: memref<64x64xf32, #tpu.memory_space<vmem>>) attributes {dimension_semantics = [#tpu.dimension_semantics<parallel>], iteration_bounds = array<i64: 1>, scalar_prefetch = 0 : i64, scratch_operands = 0 : i64, tpu.core_type = #tpu.core_type<tc>, window_params = [{transform_indices = @transform_0, window_bounds = array<i64: 64, 32>}, {pipeline_mode = #tpu.pipeline_mode<synchronous>, transform_indices = @transform_1, window_bounds = array<i64: 32, 64>}, {pipeline_mode = #tpu.pipeline_mode<synchronous>, transform_indices = @transform_2, window_bounds = array<i64: 1, 64>}, {transform_indices = @transform_3, window_bounds = array<i64: 64, 64>}]} {
    %c0 = arith.constant 0 : index
    %c0_0 = arith.constant 0 : index
    %0 = vector.load %arg1[%c0, %c0_0] : memref<64x32xbf16, #tpu.memory_space<vmem>>, vector<64x32xbf16>
    %c0_1 = arith.constant 0 : index
    %c0_2 = arith.constant 0 : index
    %1 = vector.load %arg2[%c0_1, %c0_2] : memref<32x64xbf16, #tpu.memory_space<vmem>>, vector<32x64xbf16>
    %cst = arith.constant dense<0.000000e+00> : vector<64x64xf32>
    %2 = tpu.matmul %0, %1, %cst {dimension_numbers = #tpu.dot_dimension_numbers<[1], [0], [0], [1], [0, 0, 1, 1], [], []>} : vector<64x32xbf16>, vector<32x64xbf16>, vector<64x64xf32> -> vector<64x64xf32>
    %c0_3 = arith.constant 0 : index
    %c0_4 = arith.constant 0 : index
    %3 = vector.load %arg3[%c0_3, %c0_4] : memref<1x64xf32, #tpu.memory_space<vmem>>, vector<1x64xf32>
    %4 = vector.broadcast %3 : vector<1x64xf32> to vector<64x64xf32>
    %5 = arith.addf %2, %4 : vector<64x64xf32>
    %c0_5 = arith.constant 0 : index
    %c0_6 = arith.constant 0 : index
    %6 = vector.load %arg4[%c0_5, %c0_6] : memref<64x64xf32, #tpu.memory_space<vmem>>, vector<64x64xf32>
    tpu.vector_store %arg4[%c0_5, %c0_6], %5 {strides = array<i32>} : memref<64x64xf32, #tpu.memory_space<vmem>>, vector<64x64xf32>,
    return
  }
  func.func @transform_0(%arg0: i32) -> (i32, i32) {
    %c0_i32 = arith.constant 0 : i32
    %c0_i32_0 = arith.constant 0 : i32
    return %arg0, %c0_i32 : i32, i32
  }
  func.func @transform_1(%arg0: i32) -> (i32, i32) {
    %c0_i32 = arith.constant 0 : i32
    %c0_i32_0 = arith.constant 0 : i32
    %c0_i32_1 = arith.constant 0 : i32
    return %c0_i32, %c0_i32_0 : i32, i32
  }
  func.func @transform_2(%arg0: i32) -> (i32, i32) {
    %c0_i32 = arith.constant 0 : i32
    %c0_i32_0 = arith.constant 0 : i32
    %c0_i32_1 = arith.constant 0 : i32
    return %c0_i32, %c0_i32_0 : i32, i32
  }
  func.func @transform_3(%arg0: i32) -> (i32, i32) {
    %c0_i32 = arith.constant 0 : i32
    %c0_i32_0 = arith.constant 0 : i32
    return %arg0, %c0_i32 : i32, i32
  }
}

module attributes {stable_mosaic.version = 11 : i64} {
  func.func @_block_kernel(%arg0: i32, %arg1: memref<1x31x64xf32, #tpu.memory_space<vmem>>, %arg2: memref<1x64xf32, #tpu.memory_space<vmem>>, %arg3: memref<64x192xbf16, #tpu.memory_space<vmem>>, %arg4: memref<64x64xbf16, #tpu.memory_space<vmem>>, %arg5: memref<1x64xf32, #tpu.memory_space<vmem>>, %arg6: memref<1x64xf32, #tpu.memory_space<vmem>>, %arg7: memref<1x64xf32, #tpu.memory_space<vmem>>, %arg8: memref<1x64xf32, #tpu.memory_space<vmem>>, %arg9: memref<1x64xf32, #tpu.memory_space<vmem>>, %arg10: memref<64x256xbf16, #tpu.memory_space<vmem>>, %arg11: memref<1x256xf32, #tpu.memory_space<vmem>>, %arg12: memref<256x64xbf16, #tpu.memory_space<vmem>>, %arg13: memref<1x64xf32, #tpu.memory_space<vmem>>, %arg14: memref<1x31x64xf32, #tpu.memory_space<vmem>>) attributes {dimension_semantics = [#tpu.dimension_semantics<parallel>], iteration_bounds = array<i64: 2>, scalar_prefetch = 0 : i64, scratch_operands = 0 : i64, tpu.core_type = #tpu.core_type<tc>, window_params = [{transform_indices = @transform_0, window_bounds = array<i64: 1, 31, 64>}, {pipeline_mode = #tpu.pipeline_mode<synchronous>, transform_indices = @transform_1, window_bounds = array<i64: 1, 64>}, {pipeline_mode = #tpu.pipeline_mode<synchronous>, transform_indices = @transform_2, window_bounds = array<i64: 64, 192>}, {pipeline_mode = #tpu.pipeline_mode<synchronous>, transform_indices = @transform_3, window_bounds = array<i64: 64, 64>}, {pipeline_mode = #tpu.pipeline_mode<synchronous>, transform_indices = @transform_4, window_bounds = array<i64: 1, 64>}, {pipeline_mode = #tpu.pipeline_mode<synchronous>, transform_indices = @transform_5, window_bounds = array<i64: 1, 64>}, {pipeline_mode = #tpu.pipeline_mode<synchronous>, transform_indices = @transform_6, window_bounds = array<i64: 1, 64>}, {pipeline_mode = #tpu.pipeline_mode<synchronous>, transform_indices = @transform_7, window_bounds = array<i64: 1, 64>}, {pipeline_mode = #tpu.pipeline_mode<synchronous>, transform_indices = @transform_8, window_bounds = array<i64: 1, 64>}, {pipeline_mode = #tpu.pipeline_mode<synchronous>, transform_indices = @transform_9, window_bounds = array<i64: 64, 256>}, {pipeline_mode = #tpu.pipeline_mode<synchronous>, transform_indices = @transform_10, window_bounds = array<i64: 1, 256>}, {pipeline_mode = #tpu.pipeline_mode<synchronous>, transform_indices = @transform_11, window_bounds = array<i64: 256, 64>}, {pipeline_mode = #tpu.pipeline_mode<synchronous>, transform_indices = @transform_12, window_bounds = array<i64: 1, 64>}, {transform_indices = @transform_13, window_bounds = array<i64: 1, 31, 64>}]} {
    %c0 = arith.constant 0 : index
    %c0_0 = arith.constant 0 : index
    %c0_1 = arith.constant 0 : index
    %0 = vector.load %arg1[%c0, %c0_0, %c0_1] : memref<1x31x64xf32, #tpu.memory_space<vmem>>, vector<1x31x64xf32>
    %1 = vector.shape_cast %0 : vector<1x31x64xf32> to vector<31x64xf32>
    %c0_2 = arith.constant 0 : index
    %c0_3 = arith.constant 0 : index
    %2 = vector.load %arg6[%c0_2, %c0_3] : memref<1x64xf32, #tpu.memory_space<vmem>>, vector<1x64xf32>
    %c0_4 = arith.constant 0 : index
    %c0_5 = arith.constant 0 : index
    %3 = vector.load %arg7[%c0_4, %c0_5] : memref<1x64xf32, #tpu.memory_space<vmem>>, vector<1x64xf32>
    %cst = arith.constant dense<0.000000e+00> : vector<31xf32>
    %4 = vector.multi_reduction <add>, %1, %cst [1] : vector<31x64xf32> to vector<31xf32>
    %5 = vector.shape_cast %4 : vector<31xf32> to vector<31x1xf32>
    %cst_6 = arith.constant 6.400000e+01 : f32
    %6 = vector.broadcast %cst_6 : f32 to vector<31x1xf32>
    %7 = arith.divf %5, %6 : vector<31x1xf32>
    %8 = vector.broadcast %7 : vector<31x1xf32> to vector<31x64xf32>
    %9 = arith.subf %1, %8 : vector<31x64xf32>
    %10 = arith.mulf %9, %9 : vector<31x64xf32>
    %cst_7 = arith.constant dense<0.000000e+00> : vector<31xf32>
    %11 = vector.multi_reduction <add>, %10, %cst_7 [1] : vector<31x64xf32> to vector<31xf32>
    %12 = vector.shape_cast %11 : vector<31xf32> to vector<31x1xf32>
    %cst_8 = arith.constant 6.400000e+01 : f32
    %13 = vector.broadcast %cst_8 : f32 to vector<31x1xf32>
    %14 = arith.divf %12, %13 : vector<31x1xf32>
    %cst_9 = arith.constant 9.99999997E-7 : f32
    %15 = vector.broadcast %cst_9 : f32 to vector<31x1xf32>
    %16 = arith.addf %14, %15 : vector<31x1xf32>
    %17 = math.rsqrt %16 : vector<31x1xf32>
    %18 = vector.broadcast %17 : vector<31x1xf32> to vector<31x64xf32>
    %19 = arith.mulf %9, %18 : vector<31x64xf32>
    %20 = vector.broadcast %2 : vector<1x64xf32> to vector<31x64xf32>
    %21 = arith.mulf %19, %20 : vector<31x64xf32>
    %22 = vector.broadcast %3 : vector<1x64xf32> to vector<31x64xf32>
    %23 = arith.addf %21, %22 : vector<31x64xf32>
    %24 = arith.truncf %23 : vector<31x64xf32> to vector<31x64xbf16>
    %c0_10 = arith.constant 0 : index
    %c0_11 = arith.constant 0 : index
    %25 = vector.load %arg3[%c0_10, %c0_11] : memref<64x192xbf16, #tpu.memory_space<vmem>>, vector<64x192xbf16>
    %cst_12 = arith.constant dense<0.000000e+00> : vector<31x192xf32>
    %26 = tpu.matmul %24, %25, %cst_12 {dimension_numbers = #tpu.dot_dimension_numbers<[1], [0], [0], [1], [0, 0, 1, 1], [], []>} : vector<31x64xbf16>, vector<64x192xbf16>, vector<31x192xf32> -> vector<31x192xf32>
    %27 = vector.extract_strided_slice %26 {offsets = [0, 0], sizes = [31, 64], strides = [1, 1]} : vector<31x192xf32> to vector<31x64xf32>
    %c0_13 = arith.constant 0 : index
    %c0_14 = arith.constant 0 : index
    %28 = vector.load %arg2[%c0_13, %c0_14] : memref<1x64xf32, #tpu.memory_space<vmem>>, vector<1x64xf32>
    %29 = vector.broadcast %28 : vector<1x64xf32> to vector<31x64xf32>
    %30 = arith.mulf %27, %29 : vector<31x64xf32>
    %31 = arith.truncf %30 : vector<31x64xf32> to vector<31x64xbf16>
    %32 = vector.extract_strided_slice %26 {offsets = [0, 64], sizes = [31, 64], strides = [1, 1]} : vector<31x192xf32> to vector<31x64xf32>
    %33 = arith.truncf %32 : vector<31x64xf32> to vector<31x64xbf16>
    %34 = vector.extract_strided_slice %26 {offsets = [0, 128], sizes = [31, 64], strides = [1, 1]} : vector<31x192xf32> to vector<31x64xf32>
    %35 = arith.truncf %34 : vector<31x64xf32> to vector<31x64xbf16>
    %c0_15 = arith.constant 0 : index
    %c0_16 = arith.constant 0 : index
    %36 = vector.load %arg4[%c0_15, %c0_16] : memref<64x64xbf16, #tpu.memory_space<vmem>>, vector<64x64xbf16>
    %37 = tpu.iota {dimensions = array<i32: 0>} : vector<31x31xi32>
    %38 = tpu.iota {dimensions = array<i32: 1>} : vector<31x31xi32>
    %39 = arith.cmpi eq, %37, %38 : vector<31x31xi32>
    %cst_17 = arith.constant 0.000000e+00 : f32
    %40 = vector.broadcast %cst_17 : f32 to vector<31x64xf32>
    %41 = vector.extract_strided_slice %31 {offsets = [0, 0], sizes = [31, 16], strides = [1, 1]} : vector<31x64xbf16> to vector<31x16xbf16>
    %42 = vector.extract_strided_slice %33 {offsets = [0, 0], sizes = [31, 16], strides = [1, 1]} : vector<31x64xbf16> to vector<31x16xbf16>
    %cst_18 = arith.constant dense<0.000000e+00> : vector<31x31xf32>
    %43 = tpu.matmul %41, %42, %cst_18 {dimension_numbers = #tpu.dot_dimension_numbers<[1], [1], [0], [0], [0, 0, 1, 0], [], []>} : vector<31x16xbf16>, vector<31x16xbf16>, vector<31x31xf32> -> vector<31x31xf32>
    %cst_19 = arith.constant 0xCE6B79A3 : f32
    %44 = vector.broadcast %cst_19 : f32 to vector<31x31xf32>
    %45 = arith.select %39, %44, %43 : vector<31x31xi1>, vector<31x31xf32>
    %cst_20 = arith.constant dense<0xFF800000> : vector<31xf32>
    %46 = vector.multi_reduction <maximumf>, %45, %cst_20 [1] : vector<31x31xf32> to vector<31xf32>
    %47 = vector.shape_cast %46 : vector<31xf32> to vector<31x1xf32>
    %48 = vector.broadcast %47 : vector<31x1xf32> to vector<31x31xf32>
    %49 = arith.subf %45, %48 : vector<31x31xf32>
    %50 = math.exp %49 : vector<31x31xf32>
    %cst_21 = arith.constant dense<0.000000e+00> : vector<31xf32>
    %51 = vector.multi_reduction <add>, %50, %cst_21 [1] : vector<31x31xf32> to vector<31xf32>
    %52 = vector.shape_cast %51 : vector<31xf32> to vector<31x1xf32>
    %53 = tpu.reciprocal %52 {approx = true} : vector<31x1xf32> -> vector<31x1xf32>
    %54 = vector.broadcast %53 : vector<31x1xf32> to vector<31x31xf32>
    %55 = arith.mulf %50, %54 : vector<31x31xf32>
    %56 = arith.truncf %55 : vector<31x31xf32> to vector<31x31xbf16>
    %57 = vector.extract_strided_slice %35 {offsets = [0, 0], sizes = [31, 16], strides = [1, 1]} : vector<31x64xbf16> to vector<31x16xbf16>
    %cst_22 = arith.constant dense<0.000000e+00> : vector<31x16xf32>
    %58 = tpu.matmul %56, %57, %cst_22 {dimension_numbers = #tpu.dot_dimension_numbers<[1], [0], [0], [1], [0, 0, 1, 1], [], []>} : vector<31x31xbf16>, vector<31x16xbf16>, vector<31x16xf32> -> vector<31x16xf32>
    %59 = arith.truncf %58 : vector<31x16xf32> to vector<31x16xbf16>
    %60 = vector.extract_strided_slice %36 {offsets = [0, 0], sizes = [16, 64], strides = [1, 1]} : vector<64x64xbf16> to vector<16x64xbf16>
    %cst_23 = arith.constant dense<0.000000e+00> : vector<31x64xf32>
    %61 = tpu.matmul %59, %60, %cst_23 {dimension_numbers = #tpu.dot_dimension_numbers<[1], [0], [0], [1], [0, 0, 1, 1], [], []>} : vector<31x16xbf16>, vector<16x64xbf16>, vector<31x64xf32> -> vector<31x64xf32>
    %62 = arith.addf %40, %61 : vector<31x64xf32>
    %63 = vector.extract_strided_slice %31 {offsets = [0, 16], sizes = [31, 16], strides = [1, 1]} : vector<31x64xbf16> to vector<31x16xbf16>
    %64 = vector.extract_strided_slice %33 {offsets = [0, 16], sizes = [31, 16], strides = [1, 1]} : vector<31x64xbf16> to vector<31x16xbf16>
    %cst_24 = arith.constant dense<0.000000e+00> : vector<31x31xf32>
    %65 = tpu.matmul %63, %64, %cst_24 {dimension_numbers = #tpu.dot_dimension_numbers<[1], [1], [0], [0], [0, 0, 1, 0], [], []>} : vector<31x16xbf16>, vector<31x16xbf16>, vector<31x31xf32> -> vector<31x31xf32>
    %cst_25 = arith.constant 0xCE6B79A3 : f32
    %66 = vector.broadcast %cst_25 : f32 to vector<31x31xf32>
    %67 = arith.select %39, %66, %65 : vector<31x31xi1>, vector<31x31xf32>
    %cst_26 = arith.constant dense<0xFF800000> : vector<31xf32>
    %68 = vector.multi_reduction <maximumf>, %67, %cst_26 [1] : vector<31x31xf32> to vector<31xf32>
    %69 = vector.shape_cast %68 : vector<31xf32> to vector<31x1xf32>
    %70 = vector.broadcast %69 : vector<31x1xf32> to vector<31x31xf32>
    %71 = arith.subf %67, %70 : vector<31x31xf32>
    %72 = math.exp %71 : vector<31x31xf32>
    %cst_27 = arith.constant dense<0.000000e+00> : vector<31xf32>
    %73 = vector.multi_reduction <add>, %72, %cst_27 [1] : vector<31x31xf32> to vector<31xf32>
    %74 = vector.shape_cast %73 : vector<31xf32> to vector<31x1xf32>
    %75 = tpu.reciprocal %74 {approx = true} : vector<31x1xf32> -> vector<31x1xf32>
    %76 = vector.broadcast %75 : vector<31x1xf32> to vector<31x31xf32>
    %77 = arith.mulf %72, %76 : vector<31x31xf32>
    %78 = arith.truncf %77 : vector<31x31xf32> to vector<31x31xbf16>
    %79 = vector.extract_strided_slice %35 {offsets = [0, 16], sizes = [31, 16], strides = [1, 1]} : vector<31x64xbf16> to vector<31x16xbf16>
    %cst_28 = arith.constant dense<0.000000e+00> : vector<31x16xf32>
    %80 = tpu.matmul %78, %79, %cst_28 {dimension_numbers = #tpu.dot_dimension_numbers<[1], [0], [0], [1], [0, 0, 1, 1], [], []>} : vector<31x31xbf16>, vector<31x16xbf16>, vector<31x16xf32> -> vector<31x16xf32>
    %81 = arith.truncf %80 : vector<31x16xf32> to vector<31x16xbf16>
    %82 = vector.extract_strided_slice %36 {offsets = [16, 0], sizes = [16, 64], strides = [1, 1]} : vector<64x64xbf16> to vector<16x64xbf16>
    %cst_29 = arith.constant dense<0.000000e+00> : vector<31x64xf32>
    %83 = tpu.matmul %81, %82, %cst_29 {dimension_numbers = #tpu.dot_dimension_numbers<[1], [0], [0], [1], [0, 0, 1, 1], [], []>} : vector<31x16xbf16>, vector<16x64xbf16>, vector<31x64xf32> -> vector<31x64xf32>
    %84 = arith.addf %62, %83 : vector<31x64xf32>
    %85 = vector.extract_strided_slice %31 {offsets = [0, 32], sizes = [31, 16], strides = [1, 1]} : vector<31x64xbf16> to vector<31x16xbf16>
    %86 = vector.extract_strided_slice %33 {offsets = [0, 32], sizes = [31, 16], strides = [1, 1]} : vector<31x64xbf16> to vector<31x16xbf16>
    %cst_30 = arith.constant dense<0.000000e+00> : vector<31x31xf32>
    %87 = tpu.matmul %85, %86, %cst_30 {dimension_numbers = #tpu.dot_dimension_numbers<[1], [1], [0], [0], [0, 0, 1, 0], [], []>} : vector<31x16xbf16>, vector<31x16xbf16>, vector<31x31xf32> -> vector<31x31xf32>
    %cst_31 = arith.constant 0xCE6B79A3 : f32
    %88 = vector.broadcast %cst_31 : f32 to vector<31x31xf32>
    %89 = arith.select %39, %88, %87 : vector<31x31xi1>, vector<31x31xf32>
    %cst_32 = arith.constant dense<0xFF800000> : vector<31xf32>
    %90 = vector.multi_reduction <maximumf>, %89, %cst_32 [1] : vector<31x31xf32> to vector<31xf32>
    %91 = vector.shape_cast %90 : vector<31xf32> to vector<31x1xf32>
    %92 = vector.broadcast %91 : vector<31x1xf32> to vector<31x31xf32>
    %93 = arith.subf %89, %92 : vector<31x31xf32>
    %94 = math.exp %93 : vector<31x31xf32>
    %cst_33 = arith.constant dense<0.000000e+00> : vector<31xf32>
    %95 = vector.multi_reduction <add>, %94, %cst_33 [1] : vector<31x31xf32> to vector<31xf32>
    %96 = vector.shape_cast %95 : vector<31xf32> to vector<31x1xf32>
    %97 = tpu.reciprocal %96 {approx = true} : vector<31x1xf32> -> vector<31x1xf32>
    %98 = vector.broadcast %97 : vector<31x1xf32> to vector<31x31xf32>
    %99 = arith.mulf %94, %98 : vector<31x31xf32>
    %100 = arith.truncf %99 : vector<31x31xf32> to vector<31x31xbf16>
    %101 = vector.extract_strided_slice %35 {offsets = [0, 32], sizes = [31, 16], strides = [1, 1]} : vector<31x64xbf16> to vector<31x16xbf16>
    %cst_34 = arith.constant dense<0.000000e+00> : vector<31x16xf32>
    %102 = tpu.matmul %100, %101, %cst_34 {dimension_numbers = #tpu.dot_dimension_numbers<[1], [0], [0], [1], [0, 0, 1, 1], [], []>} : vector<31x31xbf16>, vector<31x16xbf16>, vector<31x16xf32> -> vector<31x16xf32>
    %103 = arith.truncf %102 : vector<31x16xf32> to vector<31x16xbf16>
    %104 = vector.extract_strided_slice %36 {offsets = [32, 0], sizes = [16, 64], strides = [1, 1]} : vector<64x64xbf16> to vector<16x64xbf16>
    %cst_35 = arith.constant dense<0.000000e+00> : vector<31x64xf32>
    %105 = tpu.matmul %103, %104, %cst_35 {dimension_numbers = #tpu.dot_dimension_numbers<[1], [0], [0], [1], [0, 0, 1, 1], [], []>} : vector<31x16xbf16>, vector<16x64xbf16>, vector<31x64xf32> -> vector<31x64xf32>
    %106 = arith.addf %84, %105 : vector<31x64xf32>
    %107 = vector.extract_strided_slice %31 {offsets = [0, 48], sizes = [31, 16], strides = [1, 1]} : vector<31x64xbf16> to vector<31x16xbf16>
    %108 = vector.extract_strided_slice %33 {offsets = [0, 48], sizes = [31, 16], strides = [1, 1]} : vector<31x64xbf16> to vector<31x16xbf16>
    %cst_36 = arith.constant dense<0.000000e+00> : vector<31x31xf32>
    %109 = tpu.matmul %107, %108, %cst_36 {dimension_numbers = #tpu.dot_dimension_numbers<[1], [1], [0], [0], [0, 0, 1, 0], [], []>} : vector<31x16xbf16>, vector<31x16xbf16>, vector<31x31xf32> -> vector<31x31xf32>
    %cst_37 = arith.constant 0xCE6B79A3 : f32
    %110 = vector.broadcast %cst_37 : f32 to vector<31x31xf32>
    %111 = arith.select %39, %110, %109 : vector<31x31xi1>, vector<31x31xf32>
    %cst_38 = arith.constant dense<0xFF800000> : vector<31xf32>
    %112 = vector.multi_reduction <maximumf>, %111, %cst_38 [1] : vector<31x31xf32> to vector<31xf32>
    %113 = vector.shape_cast %112 : vector<31xf32> to vector<31x1xf32>
    %114 = vector.broadcast %113 : vector<31x1xf32> to vector<31x31xf32>
    %115 = arith.subf %111, %114 : vector<31x31xf32>
    %116 = math.exp %115 : vector<31x31xf32>
    %cst_39 = arith.constant dense<0.000000e+00> : vector<31xf32>
    %117 = vector.multi_reduction <add>, %116, %cst_39 [1] : vector<31x31xf32> to vector<31xf32>
    %118 = vector.shape_cast %117 : vector<31xf32> to vector<31x1xf32>
    %119 = tpu.reciprocal %118 {approx = true} : vector<31x1xf32> -> vector<31x1xf32>
    %120 = vector.broadcast %119 : vector<31x1xf32> to vector<31x31xf32>
    %121 = arith.mulf %116, %120 : vector<31x31xf32>
    %122 = arith.truncf %121 : vector<31x31xf32> to vector<31x31xbf16>
    %123 = vector.extract_strided_slice %35 {offsets = [0, 48], sizes = [31, 16], strides = [1, 1]} : vector<31x64xbf16> to vector<31x16xbf16>
    %cst_40 = arith.constant dense<0.000000e+00> : vector<31x16xf32>
    %124 = tpu.matmul %122, %123, %cst_40 {dimension_numbers = #tpu.dot_dimension_numbers<[1], [0], [0], [1], [0, 0, 1, 1], [], []>} : vector<31x31xbf16>, vector<31x16xbf16>, vector<31x16xf32> -> vector<31x16xf32>
    %125 = arith.truncf %124 : vector<31x16xf32> to vector<31x16xbf16>
    %126 = vector.extract_strided_slice %36 {offsets = [48, 0], sizes = [16, 64], strides = [1, 1]} : vector<64x64xbf16> to vector<16x64xbf16>
    %cst_41 = arith.constant dense<0.000000e+00> : vector<31x64xf32>
    %127 = tpu.matmul %125, %126, %cst_41 {dimension_numbers = #tpu.dot_dimension_numbers<[1], [0], [0], [1], [0, 0, 1, 1], [], []>} : vector<31x16xbf16>, vector<16x64xbf16>, vector<31x64xf32> -> vector<31x64xf32>
    %128 = arith.addf %106, %127 : vector<31x64xf32>
    %129 = arith.addf %1, %128 : vector<31x64xf32>
    %c0_42 = arith.constant 0 : index
    %c0_43 = arith.constant 0 : index
    %130 = vector.load %arg5[%c0_42, %c0_43] : memref<1x64xf32, #tpu.memory_space<vmem>>, vector<1x64xf32>
    %131 = vector.broadcast %130 : vector<1x64xf32> to vector<31x64xf32>
    %132 = arith.addf %129, %131 : vector<31x64xf32>
    %c0_44 = arith.constant 0 : index
    %c0_45 = arith.constant 0 : index
    %133 = vector.load %arg8[%c0_44, %c0_45] : memref<1x64xf32, #tpu.memory_space<vmem>>, vector<1x64xf32>
    %c0_46 = arith.constant 0 : index
    %c0_47 = arith.constant 0 : index
    %134 = vector.load %arg9[%c0_46, %c0_47] : memref<1x64xf32, #tpu.memory_space<vmem>>, vector<1x64xf32>
    %cst_48 = arith.constant dense<0.000000e+00> : vector<31xf32>
    %135 = vector.multi_reduction <add>, %132, %cst_48 [1] : vector<31x64xf32> to vector<31xf32>
    %136 = vector.shape_cast %135 : vector<31xf32> to vector<31x1xf32>
    %cst_49 = arith.constant 6.400000e+01 : f32
    %137 = vector.broadcast %cst_49 : f32 to vector<31x1xf32>
    %138 = arith.divf %136, %137 : vector<31x1xf32>
    %139 = vector.broadcast %138 : vector<31x1xf32> to vector<31x64xf32>
    %140 = arith.subf %132, %139 : vector<31x64xf32>
    %141 = arith.mulf %140, %140 : vector<31x64xf32>
    %cst_50 = arith.constant dense<0.000000e+00> : vector<31xf32>
    %142 = vector.multi_reduction <add>, %141, %cst_50 [1] : vector<31x64xf32> to vector<31xf32>
    %143 = vector.shape_cast %142 : vector<31xf32> to vector<31x1xf32>
    %cst_51 = arith.constant 6.400000e+01 : f32
    %144 = vector.broadcast %cst_51 : f32 to vector<31x1xf32>
    %145 = arith.divf %143, %144 : vector<31x1xf32>
    %cst_52 = arith.constant 9.99999997E-7 : f32
    %146 = vector.broadcast %cst_52 : f32 to vector<31x1xf32>
    %147 = arith.addf %145, %146 : vector<31x1xf32>
    %148 = math.rsqrt %147 : vector<31x1xf32>
    %149 = vector.broadcast %148 : vector<31x1xf32> to vector<31x64xf32>
    %150 = arith.mulf %140, %149 : vector<31x64xf32>
    %151 = vector.broadcast %133 : vector<1x64xf32> to vector<31x64xf32>
    %152 = arith.mulf %150, %151 : vector<31x64xf32>
    %153 = vector.broadcast %134 : vector<1x64xf32> to vector<31x64xf32>
    %154 = arith.addf %152, %153 : vector<31x64xf32>
    %155 = arith.truncf %154 : vector<31x64xf32> to vector<31x64xbf16>
    %c0_53 = arith.constant 0 : index
    %c0_54 = arith.constant 0 : index
    %156 = vector.load %arg10[%c0_53, %c0_54] : memref<64x256xbf16, #tpu.memory_space<vmem>>, vector<64x256xbf16>
    %cst_55 = arith.constant dense<0.000000e+00> : vector<31x256xf32>
    %157 = tpu.matmul %155, %156, %cst_55 {dimension_numbers = #tpu.dot_dimension_numbers<[1], [0], [0], [1], [0, 0, 1, 1], [], []>} : vector<31x64xbf16>, vector<64x256xbf16>, vector<31x256xf32> -> vector<31x256xf32>
    %c0_56 = arith.constant 0 : index
    %c0_57 = arith.constant 0 : index
    %158 = vector.load %arg11[%c0_56, %c0_57] : memref<1x256xf32, #tpu.memory_space<vmem>>, vector<1x256xf32>
    %159 = vector.broadcast %158 : vector<1x256xf32> to vector<31x256xf32>
    %160 = arith.addf %157, %159 : vector<31x256xf32>
    %cst_58 = arith.constant 5.000000e-01 : f32
    %161 = vector.broadcast %cst_58 : f32 to vector<31x256xf32>
    %162 = arith.mulf %161, %160 : vector<31x256xf32>
    %cst_59 = arith.constant 4.471500e-02 : f32
    %163 = vector.broadcast %cst_59 : f32 to vector<31x256xf32>
    %164 = arith.mulf %163, %160 : vector<31x256xf32>
    %165 = arith.mulf %164, %160 : vector<31x256xf32>
    %166 = arith.mulf %165, %160 : vector<31x256xf32>
    %167 = arith.addf %160, %166 : vector<31x256xf32>
    %cst_60 = arith.constant 0.797884583 : f32
    %168 = vector.broadcast %cst_60 : f32 to vector<31x256xf32>
    %169 = arith.mulf %168, %167 : vector<31x256xf32>
    %170 = math.tanh %169 : vector<31x256xf32>
    %cst_61 = arith.constant 1.000000e+00 : f32
    %171 = vector.broadcast %cst_61 : f32 to vector<31x256xf32>
    %172 = arith.addf %171, %170 : vector<31x256xf32>
    %173 = arith.mulf %162, %172 : vector<31x256xf32>
    %174 = arith.truncf %173 : vector<31x256xf32> to vector<31x256xbf16>
    %c0_62 = arith.constant 0 : index
    %c0_63 = arith.constant 0 : index
    %175 = vector.load %arg12[%c0_62, %c0_63] : memref<256x64xbf16, #tpu.memory_space<vmem>>, vector<256x64xbf16>
    %cst_64 = arith.constant dense<0.000000e+00> : vector<31x64xf32>
    %176 = tpu.matmul %174, %175, %cst_64 {dimension_numbers = #tpu.dot_dimension_numbers<[1], [0], [0], [1], [0, 0, 1, 1], [], []>} : vector<31x256xbf16>, vector<256x64xbf16>, vector<31x64xf32> -> vector<31x64xf32>
    %c0_65 = arith.constant 0 : index
    %c0_66 = arith.constant 0 : index
    %177 = vector.load %arg13[%c0_65, %c0_66] : memref<1x64xf32, #tpu.memory_space<vmem>>, vector<1x64xf32>
    %178 = vector.broadcast %177 : vector<1x64xf32> to vector<31x64xf32>
    %179 = arith.addf %176, %178 : vector<31x64xf32>
    %180 = arith.addf %132, %179 : vector<31x64xf32>
    %c0_67 = arith.constant 0 : index
    %c0_68 = arith.constant 0 : index
    %c0_69 = arith.constant 0 : index
    %181 = vector.load %arg14[%c0_67, %c0_68, %c0_69] : memref<1x31x64xf32, #tpu.memory_space<vmem>>, vector<1x31x64xf32>
    %182 = vector.shape_cast %181 : vector<1x31x64xf32> to vector<31x64xf32>
    %183 = vector.shape_cast %180 : vector<31x64xf32> to vector<1x31x64xf32>
    tpu.vector_store %arg14[%c0_67, %c0_68, %c0_69], %183 {strides = array<i32>} : memref<1x31x64xf32, #tpu.memory_space<vmem>>, vector<1x31x64xf32>,
    return
  }
  func.func @transform_0(%arg0: i32) -> (i32, i32, i32) {
    %c0_i32 = arith.constant 0 : i32
    %c0_i32_0 = arith.constant 0 : i32
    %c0_i32_1 = arith.constant 0 : i32
    return %arg0, %c0_i32, %c0_i32_0 : i32, i32, i32
  }
  func.func @transform_1(%arg0: i32) -> (i32, i32) {
    %c0_i32 = arith.constant 0 : i32
    %c0_i32_0 = arith.constant 0 : i32
    %c0_i32_1 = arith.constant 0 : i32
    return %c0_i32, %c0_i32_0 : i32, i32
  }
  func.func @transform_2(%arg0: i32) -> (i32, i32) {
    %c0_i32 = arith.constant 0 : i32
    %c0_i32_0 = arith.constant 0 : i32
    %c0_i32_1 = arith.constant 0 : i32
    return %c0_i32, %c0_i32_0 : i32, i32
  }
  func.func @transform_3(%arg0: i32) -> (i32, i32) {
    %c0_i32 = arith.constant 0 : i32
    %c0_i32_0 = arith.constant 0 : i32
    %c0_i32_1 = arith.constant 0 : i32
    return %c0_i32, %c0_i32_0 : i32, i32
  }
  func.func @transform_4(%arg0: i32) -> (i32, i32) {
    %c0_i32 = arith.constant 0 : i32
    %c0_i32_0 = arith.constant 0 : i32
    %c0_i32_1 = arith.constant 0 : i32
    return %c0_i32, %c0_i32_0 : i32, i32
  }
  func.func @transform_5(%arg0: i32) -> (i32, i32) {
    %c0_i32 = arith.constant 0 : i32
    %c0_i32_0 = arith.constant 0 : i32
    %c0_i32_1 = arith.constant 0 : i32
    return %c0_i32, %c0_i32_0 : i32, i32
  }
  func.func @transform_6(%arg0: i32) -> (i32, i32) {
    %c0_i32 = arith.constant 0 : i32
    %c0_i32_0 = arith.constant 0 : i32
    %c0_i32_1 = arith.constant 0 : i32
    return %c0_i32, %c0_i32_0 : i32, i32
  }
  func.func @transform_7(%arg0: i32) -> (i32, i32) {
    %c0_i32 = arith.constant 0 : i32
    %c0_i32_0 = arith.constant 0 : i32
    %c0_i32_1 = arith.constant 0 : i32
    return %c0_i32, %c0_i32_0 : i32, i32
  }
  func.func @transform_8(%arg0: i32) -> (i32, i32) {
    %c0_i32 = arith.constant 0 : i32
    %c0_i32_0 = arith.constant 0 : i32
    %c0_i32_1 = arith.constant 0 : i32
    return %c0_i32, %c0_i32_0 : i32, i32
  }
  func.func @transform_9(%arg0: i32) -> (i32, i32) {
    %c0_i32 = arith.constant 0 : i32
    %c0_i32_0 = arith.constant 0 : i32
    %c0_i32_1 = arith.constant 0 : i32
    return %c0_i32, %c0_i32_0 : i32, i32
  }
  func.func @transform_10(%arg0: i32) -> (i32, i32) {
    %c0_i32 = arith.constant 0 : i32
    %c0_i32_0 = arith.constant 0 : i32
    %c0_i32_1 = arith.constant 0 : i32
    return %c0_i32, %c0_i32_0 : i32, i32
  }
  func.func @transform_11(%arg0: i32) -> (i32, i32) {
    %c0_i32 = arith.constant 0 : i32
    %c0_i32_0 = arith.constant 0 : i32
    %c0_i32_1 = arith.constant 0 : i32
    return %c0_i32, %c0_i32_0 : i32, i32
  }
  func.func @transform_12(%arg0: i32) -> (i32, i32) {
    %c0_i32 = arith.constant 0 : i32
    %c0_i32_0 = arith.constant 0 : i32
    %c0_i32_1 = arith.constant 0 : i32
    return %c0_i32, %c0_i32_0 : i32, i32
  }
  func.func @transform_13(%arg0: i32) -> (i32, i32, i32) {
    %c0_i32 = arith.constant 0 : i32
    %c0_i32_0 = arith.constant 0 : i32
    %c0_i32_1 = arith.constant 0 : i32
    return %arg0, %c0_i32, %c0_i32_0 : i32, i32, i32
  }
}

module attributes {stable_mosaic.version = 11 : i64} {
  func.func @_tail_kernel(%arg0: i32, %arg1: memref<2x64xf32, #tpu.memory_space<vmem>>, %arg2: memref<1x64xf32, #tpu.memory_space<vmem>>, %arg3: memref<1x64xf32, #tpu.memory_space<vmem>>, %arg4: memref<2x96xf32, #tpu.memory_space<vmem>>, %arg5: memref<96x16xf32, #tpu.memory_space<vmem>>, %arg6: memref<1x16xf32, #tpu.memory_space<vmem>>, %arg7: memref<64x64xf32, #tpu.memory_space<vmem>>, %arg8: memref<16x64xf32, #tpu.memory_space<vmem>>, %arg9: memref<1x64xf32, #tpu.memory_space<vmem>>, %arg10: memref<64x10xf32, #tpu.memory_space<vmem>>, %arg11: memref<1x10xf32, #tpu.memory_space<vmem>>, %arg12: memref<2x10xf32, #tpu.memory_space<vmem>>) attributes {dimension_semantics = [#tpu.dimension_semantics<arbitrary>], iteration_bounds = array<i64: 1>, scalar_prefetch = 0 : i64, scratch_operands = 0 : i64, tpu.core_type = #tpu.core_type<tc>, window_params = [{pipeline_mode = #tpu.pipeline_mode<synchronous>, transform_indices = @transform_0, window_bounds = array<i64: 2, 64>}, {pipeline_mode = #tpu.pipeline_mode<synchronous>, transform_indices = @transform_1, window_bounds = array<i64: 1, 64>}, {pipeline_mode = #tpu.pipeline_mode<synchronous>, transform_indices = @transform_2, window_bounds = array<i64: 1, 64>}, {pipeline_mode = #tpu.pipeline_mode<synchronous>, transform_indices = @transform_3, window_bounds = array<i64: 2, 96>}, {pipeline_mode = #tpu.pipeline_mode<synchronous>, transform_indices = @transform_4, window_bounds = array<i64: 96, 16>}, {pipeline_mode = #tpu.pipeline_mode<synchronous>, transform_indices = @transform_5, window_bounds = array<i64: 1, 16>}, {pipeline_mode = #tpu.pipeline_mode<synchronous>, transform_indices = @transform_6, window_bounds = array<i64: 64, 64>}, {pipeline_mode = #tpu.pipeline_mode<synchronous>, transform_indices = @transform_7, window_bounds = array<i64: 16, 64>}, {pipeline_mode = #tpu.pipeline_mode<synchronous>, transform_indices = @transform_8, window_bounds = array<i64: 1, 64>}, {pipeline_mode = #tpu.pipeline_mode<synchronous>, transform_indices = @transform_9, window_bounds = array<i64: 64, 10>}, {pipeline_mode = #tpu.pipeline_mode<synchronous>, transform_indices = @transform_10, window_bounds = array<i64: 1, 10>}, {pipeline_mode = #tpu.pipeline_mode<synchronous>, transform_indices = @transform_11, window_bounds = array<i64: 2, 10>}]} {
    %c0 = arith.constant 0 : index
    %c0_0 = arith.constant 0 : index
    %0 = vector.load %arg1[%c0, %c0_0] : memref<2x64xf32, #tpu.memory_space<vmem>>, vector<2x64xf32>
    %c0_1 = arith.constant 0 : index
    %c0_2 = arith.constant 0 : index
    %1 = vector.load %arg2[%c0_1, %c0_2] : memref<1x64xf32, #tpu.memory_space<vmem>>, vector<1x64xf32>
    %c0_3 = arith.constant 0 : index
    %c0_4 = arith.constant 0 : index
    %2 = vector.load %arg3[%c0_3, %c0_4] : memref<1x64xf32, #tpu.memory_space<vmem>>, vector<1x64xf32>
    %cst = arith.constant dense<0.000000e+00> : vector<2xf32>
    %3 = vector.multi_reduction <add>, %0, %cst [1] : vector<2x64xf32> to vector<2xf32>
    %4 = vector.shape_cast %3 : vector<2xf32> to vector<2x1xf32>
    %cst_5 = arith.constant 6.400000e+01 : f32
    %5 = vector.broadcast %cst_5 : f32 to vector<2x1xf32>
    %6 = arith.divf %4, %5 : vector<2x1xf32>
    %7 = vector.broadcast %6 : vector<2x1xf32> to vector<2x64xf32>
    %8 = arith.subf %0, %7 : vector<2x64xf32>
    %9 = arith.mulf %8, %8 : vector<2x64xf32>
    %cst_6 = arith.constant dense<0.000000e+00> : vector<2xf32>
    %10 = vector.multi_reduction <add>, %9, %cst_6 [1] : vector<2x64xf32> to vector<2xf32>
    %11 = vector.shape_cast %10 : vector<2xf32> to vector<2x1xf32>
    %cst_7 = arith.constant 6.400000e+01 : f32
    %12 = vector.broadcast %cst_7 : f32 to vector<2x1xf32>
    %13 = arith.divf %11, %12 : vector<2x1xf32>
    %cst_8 = arith.constant 9.99999997E-7 : f32
    %14 = vector.broadcast %cst_8 : f32 to vector<2x1xf32>
    %15 = arith.addf %13, %14 : vector<2x1xf32>
    %16 = math.rsqrt %15 : vector<2x1xf32>
    %17 = vector.broadcast %16 : vector<2x1xf32> to vector<2x64xf32>
    %18 = arith.mulf %8, %17 : vector<2x64xf32>
    %19 = vector.broadcast %1 : vector<1x64xf32> to vector<2x64xf32>
    %20 = arith.mulf %18, %19 : vector<2x64xf32>
    %21 = vector.broadcast %2 : vector<1x64xf32> to vector<2x64xf32>
    %22 = arith.addf %20, %21 : vector<2x64xf32>
    %c0_9 = arith.constant 0 : index
    %c0_10 = arith.constant 0 : index
    %23 = vector.load %arg4[%c0_9, %c0_10] : memref<2x96xf32, #tpu.memory_space<vmem>>, vector<2x96xf32>
    %c0_11 = arith.constant 0 : index
    %c0_12 = arith.constant 0 : index
    %24 = vector.load %arg5[%c0_11, %c0_12] : memref<96x16xf32, #tpu.memory_space<vmem>>, vector<96x16xf32>
    %cst_13 = arith.constant dense<0.000000e+00> : vector<2x16xf32>
    %25 = tpu.matmul %23, %24, %cst_13 {dimension_numbers = #tpu.dot_dimension_numbers<[1], [0], [0], [1], [0, 0, 1, 1], [], []>} : vector<2x96xf32>, vector<96x16xf32>, vector<2x16xf32> -> vector<2x16xf32>
    %c0_14 = arith.constant 0 : index
    %c0_15 = arith.constant 0 : index
    %26 = vector.load %arg6[%c0_14, %c0_15] : memref<1x16xf32, #tpu.memory_space<vmem>>, vector<1x16xf32>
    %27 = vector.broadcast %26 : vector<1x16xf32> to vector<2x16xf32>
    %28 = arith.addf %25, %27 : vector<2x16xf32>
    %c0_16 = arith.constant 0 : index
    %c0_17 = arith.constant 0 : index
    %29 = vector.load %arg7[%c0_16, %c0_17] : memref<64x64xf32, #tpu.memory_space<vmem>>, vector<64x64xf32>
    %cst_18 = arith.constant dense<0.000000e+00> : vector<2x64xf32>
    %30 = tpu.matmul %22, %29, %cst_18 {dimension_numbers = #tpu.dot_dimension_numbers<[1], [0], [0], [1], [0, 0, 1, 1], [], []>} : vector<2x64xf32>, vector<64x64xf32>, vector<2x64xf32> -> vector<2x64xf32>
    %c0_19 = arith.constant 0 : index
    %c0_20 = arith.constant 0 : index
    %31 = vector.load %arg8[%c0_19, %c0_20] : memref<16x64xf32, #tpu.memory_space<vmem>>, vector<16x64xf32>
    %cst_21 = arith.constant dense<0.000000e+00> : vector<2x64xf32>
    %32 = tpu.matmul %28, %31, %cst_21 {dimension_numbers = #tpu.dot_dimension_numbers<[1], [0], [0], [1], [0, 0, 1, 1], [], []>} : vector<2x16xf32>, vector<16x64xf32>, vector<2x64xf32> -> vector<2x64xf32>
    %33 = arith.addf %30, %32 : vector<2x64xf32>
    %c0_22 = arith.constant 0 : index
    %c0_23 = arith.constant 0 : index
    %34 = vector.load %arg9[%c0_22, %c0_23] : memref<1x64xf32, #tpu.memory_space<vmem>>, vector<1x64xf32>
    %35 = vector.broadcast %34 : vector<1x64xf32> to vector<2x64xf32>
    %36 = arith.addf %33, %35 : vector<2x64xf32>
    %c0_24 = arith.constant 0 : index
    %c0_25 = arith.constant 0 : index
    %37 = vector.load %arg10[%c0_24, %c0_25] : memref<64x10xf32, #tpu.memory_space<vmem>>, vector<64x10xf32>
    %cst_26 = arith.constant dense<0.000000e+00> : vector<2x10xf32>
    %38 = tpu.matmul %36, %37, %cst_26 {dimension_numbers = #tpu.dot_dimension_numbers<[1], [0], [0], [1], [0, 0, 1, 1], [], []>} : vector<2x64xf32>, vector<64x10xf32>, vector<2x10xf32> -> vector<2x10xf32>
    %c0_27 = arith.constant 0 : index
    %c0_28 = arith.constant 0 : index
    %39 = vector.load %arg11[%c0_27, %c0_28] : memref<1x10xf32, #tpu.memory_space<vmem>>, vector<1x10xf32>
    %40 = vector.broadcast %39 : vector<1x10xf32> to vector<2x10xf32>
    %41 = arith.addf %38, %40 : vector<2x10xf32>
    %c0_29 = arith.constant 0 : index
    %c0_30 = arith.constant 0 : index
    %42 = vector.load %arg12[%c0_29, %c0_30] : memref<2x10xf32, #tpu.memory_space<vmem>>, vector<2x10xf32>
    tpu.vector_store %arg12[%c0_29, %c0_30], %41 {strides = array<i32>} : memref<2x10xf32, #tpu.memory_space<vmem>>, vector<2x10xf32>,
    return
  }
  func.func @transform_0(%arg0: i32) -> (i32, i32) {
    %c0_i32 = arith.constant 0 : i32
    %c0_i32_0 = arith.constant 0 : i32
    %c0_i32_1 = arith.constant 0 : i32
    return %c0_i32, %c0_i32_0 : i32, i32
  }
  func.func @transform_1(%arg0: i32) -> (i32, i32) {
    %c0_i32 = arith.constant 0 : i32
    %c0_i32_0 = arith.constant 0 : i32
    %c0_i32_1 = arith.constant 0 : i32
    return %c0_i32, %c0_i32_0 : i32, i32
  }
  func.func @transform_2(%arg0: i32) -> (i32, i32) {
    %c0_i32 = arith.constant 0 : i32
    %c0_i32_0 = arith.constant 0 : i32
    %c0_i32_1 = arith.constant 0 : i32
    return %c0_i32, %c0_i32_0 : i32, i32
  }
  func.func @transform_3(%arg0: i32) -> (i32, i32) {
    %c0_i32 = arith.constant 0 : i32
    %c0_i32_0 = arith.constant 0 : i32
    %c0_i32_1 = arith.constant 0 : i32
    return %c0_i32, %c0_i32_0 : i32, i32
  }
  func.func @transform_4(%arg0: i32) -> (i32, i32) {
    %c0_i32 = arith.constant 0 : i32
    %c0_i32_0 = arith.constant 0 : i32
    %c0_i32_1 = arith.constant 0 : i32
    return %c0_i32, %c0_i32_0 : i32, i32
  }
  func.func @transform_5(%arg0: i32) -> (i32, i32) {
    %c0_i32 = arith.constant 0 : i32
    %c0_i32_0 = arith.constant 0 : i32
    %c0_i32_1 = arith.constant 0 : i32
    return %c0_i32, %c0_i32_0 : i32, i32
  }
  func.func @transform_6(%arg0: i32) -> (i32, i32) {
    %c0_i32 = arith.constant 0 : i32
    %c0_i32_0 = arith.constant 0 : i32
    %c0_i32_1 = arith.constant 0 : i32
    return %c0_i32, %c0_i32_0 : i32, i32
  }
  func.func @transform_7(%arg0: i32) -> (i32, i32) {
    %c0_i32 = arith.constant 0 : i32
    %c0_i32_0 = arith.constant 0 : i32
    %c0_i32_1 = arith.constant 0 : i32
    return %c0_i32, %c0_i32_0 : i32, i32
  }
  func.func @transform_8(%arg0: i32) -> (i32, i32) {
    %c0_i32 = arith.constant 0 : i32
    %c0_i32_0 = arith.constant 0 : i32
    %c0_i32_1 = arith.constant 0 : i32
    return %c0_i32, %c0_i32_0 : i32, i32
  }
  func.func @transform_9(%arg0: i32) -> (i32, i32) {
    %c0_i32 = arith.constant 0 : i32
    %c0_i32_0 = arith.constant 0 : i32
    %c0_i32_1 = arith.constant 0 : i32
    return %c0_i32, %c0_i32_0 : i32, i32
  }
  func.func @transform_10(%arg0: i32) -> (i32, i32) {
    %c0_i32 = arith.constant 0 : i32
    %c0_i32_0 = arith.constant 0 : i32
    %c0_i32_1 = arith.constant 0 : i32
    return %c0_i32, %c0_i32_0 : i32, i32
  }
  func.func @transform_11(%arg0: i32) -> (i32, i32) {
    %c0_i32 = arith.constant 0 : i32
    %c0_i32_0 = arith.constant 0 : i32
    %c0_i32_1 = arith.constant 0 : i32
    return %c0_i32, %c0_i32_0 : i32, i32
  }
}

</mosaic_0001>

<bundles_post_ra>
// kernel: vit_forward.7
= control target key start
LH: loop header
LB: loop body
LE: loop exit
PB: predicated region body
PF: predicated region fallthrough
CT: control target
= control target key end

     0   :  { %s861_s12 = smov 0   ;;  %s863_s13 = smov 0   ;;  %s1029_s0 = inlined_call_operand.vmem [shape: bf16[8,49], index: 0, kind: input, shape index: {}]   ;;  %s1030_s1 = inlined_call_operand.vmem [shape: bf16[49,6144], index: 1, kind: input, shape index: {}]   ;;  %s1031_s2 = inlined_call_operand.vmem [shape: f32[8,1], index: 2, kind: input, shape index: {}]   ;;  %s1032_s3 = inlined_call_operand.vmem [shape: bf16[8,6144], index: 3, kind: output, shape index: {}]  }
   0x1   :  { %s865_s14 = smov 0  }
   0x2 LB: > { %s724_s15 = sadd.s32 4294967295, %s838_s14   ;;  %s878_s16 = sadd.s32 1, %s838_s14   ;;  %s838_s14 = sphi %s865_s14, %s1035_s14   ;;  %s834_s13 = sphi %s863_s13, %s1034_s13   ;;  %s830_s12 = sphi %s861_s12, %s1033_s12  }
   0x3   : > { %s38_s17 = ssub.s32 %s838_s14, %s878_s16  ;;  %s41_s18 = sadd.s32 1, %s834_s13 }
   0x4   : > { %p39_p0 = scmp.eq.s32.totalorder %s38_s17, 0  ;;  %p48_p1 = scmp.ne.s32.totalorder %s834_s13, %s830_s12 }
   0x5   : > { %p49_p2 = scmp.eq.s32.totalorder %s838_s14, 0  ;;  %p727_p4 = scmp.ge.s32.totalorder %s838_s14, 6 }
   0x6   : > { %s887_s19 = scalar_select %p39_p0, %s834_s13, %s41_s18  }
   0x7   : > { %p50_p3 = por %p49_p2, %p48_p1  ;;  %127 = sbr.rel (%p727_p4) target bundleno = 33 (0x21), region = 24 }
   0xe   : > { %130 = sbr.rel (!%p50_p3) target bundleno = 33 (0x21), region = 28  ;;  %s132_s20 = sand.u32 (%p50_p3), 1, %s834_s13  }
   0xf   : > { %s775_s21 = sshll.u32 (%p50_p3), %s838_s14, 5  ;;  %s780_s22 = smul.u32 (%p50_p3), 224, %s132_s20 }
  0x10   : > { %s895_s25 = scalar_lea.vmem (%p50_p3), %s1030_s1, %s775_s21 }
  0x11   : > { %v150_v0 = vld [vmem:[%s895_s25] sm:$0xff] (%p50_p3)  ;;  %v152_v1 = vld [vmem:[%s895_s25 + $0x8] sm:$0xff] (%p50_p3)  ;;  %v154_v2 = vld [vmem:[%s895_s25 + $0x10] sm:$0xff] (%p50_p3)  ;;  %s903_s26 = scalar_lea.vmem (%p50_p3), [#allocation2], %s780_s22 }
  0x12   : > { %v156_v3 = vld [vmem:[%s895_s25 + $0x18] sm:$0xff] (%p50_p3)  ;;  %v158_v4 = vld [vmem:[%s895_s25 + $0xc0] sm:$0xff] (%p50_p3)  ;;  %v160_v5 = vld [vmem:[%s895_s25 + $0xc8] sm:$0xff] (%p50_p3)  ;;  %151 = vst [vmem:[%s903_s26] sm:$0xff] (%p50_p3), %v150_v0 }
  0x13   : > { %153 = vst [vmem:[%s903_s26 + $0x8] sm:$0xff] (%p50_p3), %v152_v1  ;;  %155 = vst [vmem:[%s903_s26 + $0x10] sm:$0xff] (%p50_p3), %v154_v2  ;;  %v162_v6 = vld [vmem:[%s895_s25 + $0xd0] sm:$0xff] (%p50_p3)  ;;  %v164_v7 = vld [vmem:[%s895_s25 + $0xd8] sm:$0xff] (%p50_p3) }
  0x14   : > { %157 = vst [vmem:[%s903_s26 + $0x18] sm:$0xff] (%p50_p3), %v156_v3  ;;  %159 = vst [vmem:[%s903_s26 + $0x20] sm:$0xff] (%p50_p3), %v158_v4  ;;  %v166_v8 = vld [vmem:[%s895_s25 + $0x180] sm:$0xff] (%p50_p3)  ;;  %v168_v9 = vld [vmem:[%s895_s25 + $0x188] sm:$0xff] (%p50_p3) }
  0x15   : > { %161 = vst [vmem:[%s903_s26 + $0x28] sm:$0xff] %v160_v5  ;;  %163 = vst [vmem:[%s903_s26 + $0x30] sm:$0xff] %v162_v6  ;;  %v170_v10 = vld [vmem:[%s895_s25 + $0x190] sm:$0xff]  ;;  %v172_v11 = vld [vmem:[%s895_s25 + $0x198] sm:$0xff] }
  0x16   : > { %165 = vst [vmem:[%s903_s26 + $0x38] sm:$0xff] %v164_v7  ;;  %167 = vst [vmem:[%s903_s26 + $0x40] sm:$0xff] %v166_v8  ;;  %v174_v12 = vld [vmem:[%s895_s25 + $0x240] sm:$0xff]  ;;  %v176_v13 = vld [vmem:[%s895_s25 + $0x248] sm:$0xff] }
  0x17   : > { %169 = vst [vmem:[%s903_s26 + $0x48] sm:$0xff] %v168_v9  ;;  %171 = vst [vmem:[%s903_s26 + $0x50] sm:$0xff] %v170_v10  ;;  %v178_v14 = vld [vmem:[%s895_s25 + $0x250] sm:$0xff]  ;;  %v180_v15 = vld [vmem:[%s895_s25 + $0x258] sm:$0xff] }
  0x18   : > { %173 = vst [vmem:[%s903_s26 + $0x58] sm:$0xff] %v172_v11  ;;  %175 = vst [vmem:[%s903_s26 + $0x60] sm:$0xff] %v174_v12  ;;  %v182_v16 = vld [vmem:[%s895_s25 + $0x300] sm:$0xff]  ;;  %v184_v17 = vld [vmem:[%s895_s25 + $0x308] sm:$0xff] }
  0x19   : > { %177 = vst [vmem:[%s903_s26 + $0x68] sm:$0xff] %v176_v13  ;;  %179 = vst [vmem:[%s903_s26 + $0x70] sm:$0xff] %v178_v14  ;;  %v186_v18 = vld [vmem:[%s895_s25 + $0x310] sm:$0xff]  ;;  %v188_v19 = vld [vmem:[%s895_s25 + $0x318] sm:$0xff] }
  0x1a   : > { %181 = vst [vmem:[%s903_s26 + $0x78] sm:$0xff] %v180_v15  ;;  %183 = vst [vmem:[%s903_s26 + $0x80] sm:$0xff] %v182_v16  ;;  %v190_v20 = vld [vmem:[%s895_s25 + $0x3c0] sm:$0xff]  ;;  %v192_v21 = vld [vmem:[%s895_s25 + $0x3c8] sm:$0xff] }
  0x1b   : > { %185 = vst [vmem:[%s903_s26 + $0x88] sm:$0xff] %v184_v17  ;;  %187 = vst [vmem:[%s903_s26 + $0x90] sm:$0xff] %v186_v18  ;;  %v194_v22 = vld [vmem:[%s895_s25 + $0x3d0] sm:$0xff]  ;;  %v196_v23 = vld [vmem:[%s895_s25 + $0x3d8] sm:$0xff] }
  0x1c   : > { %189 = vst [vmem:[%s903_s26 + $0x98] sm:$0xff] %v188_v19  ;;  %191 = vst [vmem:[%s903_s26 + $0xa0] sm:$0xff] %v190_v20  ;;  %v198_v24 = vld [vmem:[%s895_s25 + $0x480] sm:$0xff]  ;;  %v200_v25 = vld [vmem:[%s895_s25 + $0x488] sm:$0xff] }
  0x1d   : > { %193 = vst [vmem:[%s903_s26 + $0xa8] sm:$0xff] %v192_v21  ;;  %195 = vst [vmem:[%s903_s26 + $0xb0] sm:$0xff] %v194_v22  ;;  %v202_v26 = vld [vmem:[%s895_s25 + $0x490] sm:$0xff]  ;;  %v204_v27 = vld [vmem:[%s895_s25 + $0x498] sm:$0xff] }
  0x1e   : > { %197 = vst [vmem:[%s903_s26 + $0xb8] sm:$0xff] %v196_v23  ;;  %199 = vst [vmem:[%s903_s26 + $0xc0] sm:$0xff] %v198_v24 }
  0x1f   : > { %201 = vst [vmem:[%s903_s26 + $0xc8] sm:$0xff] %v200_v25  ;;  %203 = vst [vmem:[%s903_s26 + $0xd0] sm:$0xff] %v202_v26 }
  0x20   : > { %205 = vst [vmem:[%s903_s26 + $0xd8] sm:$0xff] %v204_v27 }
  0x21 PF: > { %p730_p5 = scmp.ge.s32.totalorder %s838_s14, 1  ;;  %p210_p6 = scmp.lt.s32.totalorder %s838_s14, 7 }
  0x23   : > { %p211_p7 = pnand %p730_p5, %p210_p6 }
  0x24   : > { %s217_s27 = sand.u32 (!%p211_p7), 1, %s830_s12   ;;  %v840_v28 = vmov (!%p211_p7), 0   ;;  %v277_v29 = vld [vmem:[%s1031_s2] sm:$0xff] (!%p211_p7)  ;;  %vm427_vm0 = vcmask (!%p211_p7), 1040384   ;;  %vm423_vm1 = vcmask (!%p211_p7), 400384   ;;  %s731_s7 = sshll.u32 (!%p211_p7), %s724_s15, 3 }
  0x25   : > { %214 = sbr.rel (%p211_p7) target bundleno = 297 (0x129), region = 51  ;;  %486 = vmatprep.mubr.bf16.mxu0 (!%p211_p7), %v840_v28  ;;  %527 = vmatprep.mubr.bf16.mxu1 (!%p211_p7), %v840_v28  ;;  %v981_v55 = vsel (!%p211_p7), %vm427_vm0, 65535, %v840_v28  ;;  %v248_v11 = vld [vmem:[%s1029_s0] sm:$0xf] (!%p211_p7)  ;;  %p242_p8 = scmp.lt.s32.totalorder (!%p211_p7), %s731_s7, 47 }
  0x26   : > { %s781_s28 = smul.u32 (!%p211_p7), 224, %s217_s27  ;;  %807 = vset.pattern.permute.xlu0 (!%p211_p7), %v840_v28 }
  0x27   : > { %280 = vperm.xlu0 (!%p211_p7), %807, %v277_v29  }
  0x28   : > { %s964_s4 = scalar_lea.vmem (!%p211_p7), [#allocation2], %s781_s28 }
  0x29   : > { %v249_v30 = vld [vmem:[%s964_s4] sm:$0xff] (!%p211_p7)  ;;  %v250_v32 = vld [vmem:[%s964_s4 + $0x8] sm:$0xff] (!%p211_p7)  ;;  %v251_v63 = vld [vmem:[%s964_s4 + $0x10] sm:$0xff] (!%p211_p7) }
  0x2a   : > { %v253_v31 = vld [vmem:[%s964_s4 + $0x20] sm:$0xff] (!%p211_p7)  ;;  %v254_v34 = vld [vmem:[%s964_s4 + $0x28] sm:$0xff] (!%p211_p7)  ;;  %v255_v0 = vld [vmem:[%s964_s4 + $0x30] sm:$0xff] (!%p211_p7) }
  0x2b   : > { %v734_v33 = vcombine.high (!%p211_p7), %v249_v30, %v253_v31  ;;  %v733_v35 = vcombine.low (!%p211_p7), %v249_v30, %v253_v31  ;;  %v257_v36 = vld [vmem:[%s964_s4 + $0x40] sm:$0xff] (!%p211_p7)  ;;  %v736_v38 = vcombine.high (!%p211_p7), %v250_v32, %v254_v34  ;;  %v735_v39 = vcombine.low (!%p211_p7), %v250_v32, %v254_v34  ;;  %v258_v41 = vld [vmem:[%s964_s4 + $0x48] sm:$0xff] (!%p211_p7)  ;;  %v252_v1 = vld [vmem:[%s964_s4 + $0x18] sm:$0xff] (!%p211_p7) }
  0x2c   : > { %v261_v37 = vld [vmem:[%s964_s4 + $0x60] sm:$0xff]  ;;  %v262_v42 = vld [vmem:[%s964_s4 + $0x68] sm:$0xff]  ;;  %v256_v2 = vld [vmem:[%s964_s4 + $0x38] sm:$0xff]  ;;  %v738_v5 = vcombine.high %v251_v63, %v255_v0  ;;  %v737_v12 = vcombine.low %v251_v63, %v255_v0  ;;  %s1037_s7 = smov (!%p242_p8, %s731_s7), 47 }
  0x2d   : > { %v742_v40 = vcombine.high %v257_v36, %v261_v37  ;;  %v265_v43 = vld [vmem:[%s964_s4 + $0x80] sm:$0xff]  ;;  %454 = vmatprep.subr.bf16.mxu0 %v734_v33  ;;  %v744_v44 = vcombine.high %v258_v41, %v262_v42  ;;  %v266_v46 = vld [vmem:[%s964_s4 + $0x88] sm:$0xff]  ;;  %495 = vmatprep.subr.bf16.mxu1 %v736_v38  ;;  %v741_v48 = vcombine.low %v257_v36, %v261_v37  ;;  %v259_v7 = vld [vmem:[%s964_s4 + $0x50] sm:$0xff]  ;;  %s732_s8 = sshll.u32 %s1037_s7, 2 }
  0x2e   : > { %v269_v45 = vld [vmem:[%s964_s4 + $0xa0] sm:$0xff]  ;;  %v270_v47 = vld [vmem:[%s964_s4 + $0xa8] sm:$0xff]  ;;  %455 = vmatpush1.bf16.msra.mxu0 %v733_v35  ;;  %496 = vmatpush1.bf16.msra.mxu1 %v735_v39  ;;  %v743_v51 = vcombine.low %v258_v41, %v262_v42  ;;  %v740_v6 = vcombine.high %v252_v1, %v256_v2  ;;  %v263_v8 = vld [vmem:[%s964_s4 + $0x70] sm:$0xff]  ;;  %v739_v13 = vcombine.low %v252_v1, %v256_v2  ;;  %s245_s11 = scalar_lea.vmem %s1032_s3, %s732_s8 }
  0x2f   : > { %v273_v49 = vld [vmem:[%s964_s4 + $0xc0] sm:$0x11]  ;;  %v274_v50 = vld [vmem:[%s964_s4 + $0xc8] sm:$0x11]  ;;  %456 = vmatprep.subr.bf16.mxu0 %v742_v40  ;;  %v750_v52 = vcombine.high %v265_v43, %v269_v45  ;;  %497 = vmatprep.subr.bf16.mxu1 %v744_v44  ;;  %v752_v54 = vcombine.high %v266_v46, %v270_v47  ;;  %v749_v57 = vcombine.low %v265_v43, %v269_v45  ;;  %v260_v9 = vld [vmem:[%s964_s4 + $0x58] sm:$0xff] }
  0x30   : > { %v758_v53 = vcombine.high %v273_v49, %v273_v49  ;;  %v760_v56 = vcombine.high %v274_v50, %v274_v50  ;;  %v757_v58 = vcombine.low %v273_v49, %v273_v49  ;;  %v751_v59 = vcombine.low %v266_v46, %v270_v47  ;;  %v264_v10 = vld [vmem:[%s964_s4 + $0x78] sm:$0xff]  ;;  %v267_v16 = vld [vmem:[%s964_s4 + $0x90] sm:$0xff] }
  0x31   : > { %v759_v61 = vcombine.low %v274_v50, %v274_v50  ;;  %v746_v14 = vcombine.high %v259_v7, %v263_v8  ;;  %v748_v15 = vcombine.high %v260_v9, %v264_v10  ;;  %v271_v17 = vld [vmem:[%s964_s4 + $0xb0] sm:$0xff]  ;;  %v268_v19 = vld [vmem:[%s964_s4 + $0x98] sm:$0xff]  ;;  %v745_v22 = vcombine.low %v259_v7, %v263_v8 }
  0x32   : > { %457 = vmatpush1.bf16.msra.mxu0 %v741_v48  ;;  %498 = vmatpush1.bf16.msra.mxu1 %v743_v51  ;;  %v434_v60 = vand.u32 %v758_v53, %v981_v55  ;;  %v440_v62 = vand.u32 %v760_v56, %v981_v55  ;;  %v431_v3 = vand.u32 %v757_v58, %v981_v55  ;;  %v275_v18 = vld [vmem:[%s964_s4 + $0xd0] sm:$0x11]  ;;  %v272_v20 = vld [vmem:[%s964_s4 + $0xb8] sm:$0xff] }
  0x33   : > { %458 = vmatprep.subr.bf16.mxu0 %v750_v52  ;;  %499 = vmatprep.subr.bf16.mxu1 %v752_v54  ;;  %v437_v4 = vand.u32 %v759_v61, %v981_v55  ;;  %v276_v21 = vld [vmem:[%s964_s4 + $0xd8] sm:$0x11]  ;;  %v747_v23 = vcombine.low %v260_v9, %v264_v10  ;;  %v754_v24 = vcombine.high %v267_v16, %v271_v17 }
  0x34   : > { %v762_v25 = vcombine.high %v275_v18, %v275_v18  ;;  %v756_v26 = vcombine.high %v268_v19, %v272_v20  ;;  %v764_v27 = vcombine.high %v276_v21, %v276_v21  ;;  %v753_v29 = vcombine.low %v267_v16, %v271_v17 }
  0x35   : > { %v761_v30 = vcombine.low %v275_v18, %v275_v18  ;;  %v755_v31 = vcombine.low %v268_v19, %v272_v20  ;;  %v763_v33 = vcombine.low %v276_v21, %v276_v21 }
  0x36   : > { %459 = vmatpush1.bf16.msra.mxu0 %v749_v57  ;;  %500 = vmatpush1.bf16.msra.mxu1 %v751_v59  ;;  %v446_v32 = vand.u32 %v762_v25, %v981_v55  ;;  %v452_v34 = vand.u32 %v764_v27, %v981_v55 }
  0x37   : > { %460 = vmatprep.subr.bf16.mxu0 %v434_v60  ;;  %501 = vmatprep.subr.bf16.mxu1 %v440_v62  ;;  %v443_v35 = vand.u32 %v761_v30, %v981_v55 }
  0x3a   : > { %461 = vmatpush1.bf16.msra.mxu0 %v431_v3  ;;  %502 = vmatpush1.bf16.msra.mxu1 %v437_v4 }
  0x3b   : > { %536 = vmatprep.subr.bf16.mxu0 %v738_v5  ;;  %577 = vmatprep.subr.bf16.mxu1 %v740_v6 }
  0x3d   : > { %765 = vmatmul.mubr.msk.bf16.vlgmr.msra.gmra.mrb[0].mxu0 %vm423_vm1, %v248_v11  ;;  %766 = vmatmul.mubr.msk.bf16.vlgmr.msra.gmra.mrb[0].mxu1 %vm423_vm1, %v248_v11 }
  0x3e   : > { %537 = vmatpush1.bf16.msra.mxu0 %v737_v12  ;;  %578 = vmatpush1.bf16.msra.mxu1 %v739_v13 }
  0x3f   : > { %538 = vmatprep.subr.bf16.mxu0 %v746_v14  ;;  %579 = vmatprep.subr.bf16.mxu1 %v748_v15 }
  0x40   : > { %568 = vmatprep.mubr.bf16.mxu0 %v840_v28  ;;  %609 = vmatprep.mubr.bf16.mxu1 %v840_v28  ;;  %v449_v28 = vand.u32 %v763_v33, %v981_v55 }
  0x42   : > { %539 = vmatpush1.bf16.msra.mxu0 %v745_v22  ;;  %580 = vmatpush1.bf16.msra.mxu1 %v747_v23 }
  0x43   : > { %540 = vmatprep.subr.bf16.mxu0 %v754_v24  ;;  %581 = vmatprep.subr.bf16.mxu1 %v756_v26 }
  0x46   : > { %541 = vmatpush1.bf16.msra.mxu0 %v753_v29  ;;  %582 = vmatpush1.bf16.msra.mxu1 %v755_v31 }
  0x47   : > { %542 = vmatprep.subr.bf16.mxu0 %v446_v32  ;;  %583 = vmatprep.subr.bf16.mxu1 %v452_v34 }
  0x4a   : > { %543 = vmatpush1.bf16.msra.mxu0 %v443_v35  ;;  %584 = vmatpush1.bf16.msra.mxu1 %v449_v28 }
  0x4d   : > { %767 = vmatmul.mubr.msk.bf16.vlgmr.msra.gmra.mrb[4].mxu0 %vm423_vm1, %v248_v11  ;;  %768 = vmatmul.mubr.msk.bf16.vlgmr.msra.gmra.mrb[4].mxu1 %vm423_vm1, %v248_v11 }
  0xa6   : > { %v281_v36 = vpop.permute.xlu0 %280 }
 0x110   : > { %v488_v37 = vpop.f32.mrb[0].mxu0  ;;  %v529_v38 = vpop.f32.mrb[0].mxu1 }
 0x111   : > { %v489_v39 = vadd.f32 %v488_v37, %v281_v36  ;;  %v490_v40 = vpop.f32.mrb[1].mxu0  ;;  %v530_v42 = vadd.f32 %v529_v38, %v281_v36  ;;  %v531_v43 = vpop.f32.mrb[1].mxu1 }
 0x112   : > { %v491_v41 = vadd.f32 %v490_v40, %v281_v36  ;;  %v492_v44 = vpop.f32.mrb[2].mxu0  ;;  %v532_v46 = vadd.f32 %v531_v43, %v281_v36  ;;  %v533_v47 = vpop.f32.mrb[2].mxu1 }
 0x113   : > { %v618_v45 = vmax.f32 %v489_v39, 0.0  ;;  %v493_v48 = vpop.f32.mrb[3].mxu0  ;;  %v620_v50 = vmax.f32 %v530_v42, 0.0  ;;  %v534_v51 = vpop.f32.mrb[3].mxu1 }
 0x114   : > { %v619_v49 = vmax.f32 %v491_v41, 0.0  ;;  %v621_v52 = vmax.f32 %v532_v46, 0.0 }
 0x116   : > { %v776_v53 = vpack.c.bf16 %v619_v49, %v618_v45  ;;  %v777_v54 = vpack.c.bf16 %v621_v52, %v620_v50 }
 0x118   : > { %658 = vst [vmem:[%s245_s11] sm:$0xff] %v776_v53  ;;  %659 = vst [vmem:[%s245_s11 + $0x8] sm:$0xff] %v777_v54 }
 0x120   : > { %v570_v55 = vpop.f32.mrb[4].mxu0  ;;  %v611_v57 = vpop.f32.mrb[4].mxu1 }
 0x121   : > { %v571_v56 = vadd.f32 %v570_v55, %v281_v36  ;;  %v572_v58 = vpop.f32.mrb[5].mxu0  ;;  %v612_v59 = vadd.f32 %v611_v57, %v281_v36  ;;  %v613_v61 = vpop.f32.mrb[5].mxu1 }
 0x122   : > { %v573_v60 = vadd.f32 %v572_v58, %v281_v36  ;;  %v574_v62 = vpop.f32.mrb[6].mxu0  ;;  %v614_v0 = vadd.f32 %v613_v61, %v281_v36  ;;  %v615_v1 = vpop.f32.mrb[6].mxu1 }
 0x123   : > { %v622_v63 = vmax.f32 %v571_v56, 0.0  ;;  %v575_v2 = vpop.f32.mrb[7].mxu0  ;;  %v624_v3 = vmax.f32 %v612_v59, 0.0  ;;  %v616_v5 = vpop.f32.mrb[7].mxu1 }
 0x124   : > { %v623_v4 = vmax.f32 %v573_v60, 0.0  ;;  %v625_v6 = vmax.f32 %v614_v0, 0.0 }
 0x126   : > { %v778_v7 = vpack.c.bf16 %v623_v4, %v622_v63  ;;  %v779_v8 = vpack.c.bf16 %v625_v6, %v624_v3 }
 0x128   : > { %660 = vst [vmem:[%s245_s11 + $0x10] sm:$0xff] %v778_v7  ;;  %661 = vst [vmem:[%s245_s11 + $0x18] sm:$0xff] %v779_v8 }
 0x129 PF: > { %p10_p9 = scmp.ge.s32.totalorder %s878_s16, 8   ;;  %s1033_s12 = smov %s834_s13 }
 0x12a   : > { %s1034_s13 = smov %s887_s19  ;;  %s1035_s14 = smov %s878_s16 }
 0x12b   :  { %12 = sbr.rel (!%p10_p9) target bundleno = 2 (0x2), region = 90 }

// kernel: vit_forward.8
= control target key start
LH: loop header
LB: loop body
LE: loop exit
PB: predicated region body
PF: predicated region fallthrough
CT: control target
= control target key end

     0   :  { %v410_v1 = vmov 0   ;;  %vm201_vm0 = vcmask 588800   ;;  %vm208_vm1 = vcmask 1043456   ;;  %s539_s1 = inlined_call_operand.vmem [shape: bf16[200,256], index: 1, kind: input, shape index: {}]   ;;  %s540_s0 = inlined_call_operand.vmem [shape: bf16[24,200], index: 0, kind: input, shape index: {}]   ;;  %s541_s2 = inlined_call_operand.vmem [shape: f32[24,1], index: 2, kind: input, shape index: {}]   ;;  %s542_s3 = inlined_call_operand.vmem [shape: bf16[24,256], index: 3, kind: output, shape index: {}]  }
   0x1   :  { %v367_v0 = vld [vmem:[%s539_s1 + $0x4] ss:$8 sps:$4 sm:$0xff]   ;;  %365 = vset.pattern.permute.xlu0 %v410_v1  ;;  %366 = vset.pattern.permute.xlu1 %v410_v1  ;;  %v369_v2 = vld [vmem:[%s539_s1] ss:$8 sps:$4 sm:$0xff]   ;;  %v370_v3 = vld [vmem:[%s539_s1 + $0x14] ss:$8 sps:$4 sm:$0xff]  }
   0x2   :  { %215 = vmatprep.subr.bf16.mxu0 %v367_v0  ;;  %338 = vmatprep.subr.bf16.mxu1 %v367_v0  ;;  %v372_v4 = vld [vmem:[%s539_s1 + $0x10] ss:$8 sps:$4 sm:$0xff]   ;;  %v373_v5 = vld [vmem:[%s539_s1 + $0x24] ss:$8 sps:$4 sm:$0xff]   ;;  %v375_v6 = vld [vmem:[%s539_s1 + $0x20] ss:$8 sps:$4 sm:$0xff]  }
   0x3   :  { %216 = vmatpush1.bf16.msra.mxu0 %v369_v2  ;;  %351 = vmatpush1.bf16.msra.mxu1 %v369_v2  ;;  %v376_v7 = vld [vmem:[%s539_s1 + $0x34] ss:$8 sps:$4 sm:$0xff]   ;;  %v378_v8 = vld [vmem:[%s539_s1 + $0x30] ss:$8 sps:$4 sm:$0xff]   ;;  %v379_v9 = vld [vmem:[%s539_s1 + $0x44] ss:$8 sps:$4 sm:$0xff]  }
   0x4   :  { %217 = vmatprep.subr.bf16.mxu0 %v370_v3  ;;  %339 = vmatprep.subr.bf16.mxu1 %v370_v3  ;;  %v381_v10 = vld [vmem:[%s539_s1 + $0x40] ss:$8 sps:$4 sm:$0xff]   ;;  %v382_v11 = vld [vmem:[%s539_s1 + $0x54] ss:$8 sps:$4 sm:$0xff]   ;;  %v407_v12 = vld [vmem:[%s540_s0 + $0x4] ss:$8 sps:$4 sm:$0xff]  }
   0x5   :  { %v470_v13 = vld [vmem:[%s540_s0 + $0x10] sm:$0xff]  ;;  %v43_v16 = vld [vmem:[%s541_s2] sm:$0xff]  ;;  %330 = vmatprep.mubr.msk.bf16.mxu0 %vm201_vm0, %v407_v12  ;;  %v44_v20 = vld [vmem:[%s541_s2 + $0x8] sm:$0xff] }
   0x6   :  { %v302_v14 = vcombine.high %v470_v13, %v470_v13  ;;  %v384_v15 = vld [vmem:[%s539_s1 + $0x50] ss:$8 sps:$4 sm:$0xff]   ;;  %v385_v18 = vld [vmem:[%s539_s1 + $0x64] ss:$8 sps:$4 sm:$0xff]   ;;  %48 = vperm.xlu0 %365, %v43_v16   ;;  %v387_v19 = vld [vmem:[%s539_s1 + $0x60] ss:$8 sps:$4 sm:$0xff]   ;;  %v301_v36 = vcombine.low %v470_v13, %v470_v13 }
   0x7   :  { %218 = vmatpush1.bf16.msra.mxu0 %v372_v4  ;;  %352 = vmatpush1.bf16.msra.mxu1 %v372_v4  ;;  %v45_v17 = vld [vmem:[%s541_s2 + $0x10] sm:$0xff]  ;;  %v391_v23 = vld [vmem:[%s539_s1 + $0x84] ss:$8 sps:$4 sm:$0xff]   ;;  %v393_v24 = vld [vmem:[%s539_s1 + $0x80] ss:$8 sps:$4 sm:$0xff]  }
   0x8   :  { %219 = vmatprep.subr.bf16.mxu0 %v373_v5  ;;  %340 = vmatprep.subr.bf16.mxu1 %v373_v5  ;;  %v388_v21 = vld [vmem:[%s539_s1 + $0x74] ss:$8 sps:$4 sm:$0xff]   ;;  %v390_v22 = vld [vmem:[%s539_s1 + $0x70] ss:$8 sps:$4 sm:$0xff]   ;;  %v397_v27 = vld [vmem:[%s539_s1 + $0xa4] ss:$8 sps:$4 sm:$0xff]  }
   0x9   :  { %331 = vmatprep.mubr.msk.bf16.mxu1 %vm201_vm0, %v302_v14  ;;  %58 = vperm.xlu1 %366, %v45_v17   ;;  %v394_v25 = vld [vmem:[%s539_s1 + $0x94] ss:$8 sps:$4 sm:$0xff]   ;;  %v396_v26 = vld [vmem:[%s539_s1 + $0x90] ss:$8 sps:$4 sm:$0xff]   ;;  %v399_v28 = vld [vmem:[%s539_s1 + $0xa0] ss:$8 sps:$4 sm:$0xff]  }
   0xa   :  { %53 = vperm.xlu0 %365, %v44_v20   ;;  %v400_v29 = vld [vmem:[%s539_s1 + $0xb4] ss:$8 sps:$4 sm:$0xff]   ;;  %v42_v30 = vld [vmem:[%s539_s1 + $0xc0] sm:$0xff]  ;;  %v402_v31 = vld [vmem:[%s539_s1 + $0xb0] ss:$8 sps:$4 sm:$0xff]  }
   0xb   :  { %220 = vmatpush1.bf16.msra.mxu0 %v375_v6  ;;  %353 = vmatpush1.bf16.msra.mxu1 %v375_v6  ;;  %v328_v32 = vcombine.high %v42_v30, %v42_v30  ;;  %v327_v33 = vcombine.low %v42_v30, %v42_v30  ;;  %v405_v35 = vld [vmem:[%s540_s0] ss:$8 sps:$4 sm:$0xff]  }
   0xc   :  { %221 = vmatprep.subr.bf16.mxu0 %v376_v7  ;;  %341 = vmatprep.subr.bf16.mxu1 %v376_v7 }
   0xd   :  { %v210_v34 = vsel %vm208_vm1, %v327_v33, 0 }
   0xf   :  { %222 = vmatpush1.bf16.msra.mxu0 %v378_v8  ;;  %354 = vmatpush1.bf16.msra.mxu1 %v378_v8 }
  0x10   :  { %223 = vmatprep.subr.bf16.mxu0 %v379_v9  ;;  %342 = vmatprep.subr.bf16.mxu1 %v379_v9 }
  0x13   :  { %224 = vmatpush1.bf16.msra.mxu0 %v381_v10  ;;  %355 = vmatpush1.bf16.msra.mxu1 %v381_v10 }
  0x14   :  { %225 = vmatprep.subr.bf16.mxu0 %v382_v11  ;;  %343 = vmatprep.subr.bf16.mxu1 %v382_v11 }
  0x17   :  { %226 = vmatpush1.bf16.msra.mxu0 %v384_v15  ;;  %356 = vmatpush1.bf16.msra.mxu1 %v384_v15 }
  0x18   :  { %227 = vmatprep.subr.bf16.mxu0 %v385_v18  ;;  %344 = vmatprep.subr.bf16.mxu1 %v385_v18 }
  0x1b   :  { %228 = vmatpush1.bf16.msra.mxu0 %v387_v19  ;;  %357 = vmatpush1.bf16.msra.mxu1 %v387_v19 }
  0x1c   :  { %229 = vmatprep.subr.bf16.mxu0 %v388_v21  ;;  %345 = vmatprep.subr.bf16.mxu1 %v388_v21 }
  0x1f   :  { %230 = vmatpush1.bf16.msra.mxu0 %v390_v22  ;;  %358 = vmatpush1.bf16.msra.mxu1 %v390_v22 }
  0x20   :  { %231 = vmatprep.subr.bf16.mxu0 %v391_v23  ;;  %346 = vmatprep.subr.bf16.mxu1 %v391_v23 }
  0x23   :  { %232 = vmatpush1.bf16.msra.mxu0 %v393_v24  ;;  %359 = vmatpush1.bf16.msra.mxu1 %v393_v24 }
  0x24   :  { %233 = vmatprep.subr.bf16.mxu0 %v394_v25  ;;  %347 = vmatprep.subr.bf16.mxu1 %v394_v25 }
  0x27   :  { %234 = vmatpush1.bf16.msra.mxu0 %v396_v26  ;;  %360 = vmatpush1.bf16.msra.mxu1 %v396_v26 }
  0x28   :  { %235 = vmatprep.subr.bf16.mxu0 %v397_v27  ;;  %348 = vmatprep.subr.bf16.mxu1 %v397_v27 }
  0x2b   :  { %236 = vmatpush1.bf16.msra.mxu0 %v399_v28  ;;  %361 = vmatpush1.bf16.msra.mxu1 %v399_v28 }
  0x2c   :  { %237 = vmatprep.subr.bf16.mxu0 %v400_v29  ;;  %349 = vmatprep.subr.bf16.mxu1 %v400_v29 }
  0x2f   :  { %238 = vmatpush1.bf16.msra.mxu0 %v402_v31  ;;  %362 = vmatpush1.bf16.msra.mxu1 %v402_v31 }
  0x30   :  { %329 = vmatprep.subr.msk.bf16.mxu0 %vm208_vm1, %v328_v32  ;;  %350 = vmatprep.subr.msk.bf16.mxu1 %vm208_vm1, %v328_v32 }
  0x33   :  { %240 = vmatpush1.bf16.msra.mxu0 %v210_v34  ;;  %363 = vmatpush1.bf16.msra.mxu1 %v210_v34 }
  0x36   :  { %248 = vmatmul.mubr.bf16.vlgmr.msra.gmra.mrb[0].mxu0 %v405_v35  ;;  %258 = vmatmul.mubr.bf16.vlgmr.msra.gmra.mrb[0].mxu1 %v301_v36 }
  0x85   :  { %v49_v37 = vpop.permute.xlu0 %48 }
  0x88   :  { %v59_v38 = vpop.permute.xlu1 %58 }
  0x89   :  { %v54_v39 = vpop.permute.xlu0 %53 }
 0x109   :  { %v249_v40 = vpop.f32.mrb[0].mxu0  ;;  %v259_v41 = vpop.f32.mrb[0].mxu1 }
 0x10a   :  { %v250_v42 = vadd.f32 %v249_v40, %v49_v37  ;;  %v251_v43 = vpop.f32.mrb[1].mxu0  ;;  %v261_v44 = vpop.f32.mrb[1].mxu1  ;;  %v260_v45 = vadd.f32 %v259_v41, %v59_v38 }
 0x10b   :  { %v252_v46 = vadd.f32 %v251_v43, %v49_v37  ;;  %v262_v47 = vadd.f32 %v261_v44, %v59_v38  ;;  %v253_v48 = vpop.f32.mrb[2].mxu0  ;;  %v263_v49 = vpop.f32.mrb[2].mxu1 }
 0x10c   :  { %v266_v50 = vmax.f32 %v250_v42, 0.0  ;;  %v270_v51 = vmax.f32 %v260_v45, 0.0  ;;  %v254_v52 = vadd.f32 %v253_v48, %v54_v39  ;;  %v255_v53 = vpop.f32.mrb[3].mxu0  ;;  %v264_v54 = vpop.f32.mrb[3].mxu1 }
 0x10d   :  { %v267_v55 = vmax.f32 %v252_v46, 0.0  ;;  %v271_v56 = vmax.f32 %v262_v47, 0.0  ;;  %v256_v57 = vadd.f32 %v255_v53, %v54_v39 }
 0x10e   :  { %v268_v58 = vmax.f32 %v254_v52, 0.0 }
 0x10f   :  { %v335_v59 = vpack.c.bf16 %v267_v55, %v266_v50  ;;  %v337_v60 = vpack.c.bf16 %v271_v56, %v270_v51  ;;  %v269_v61 = vmax.f32 %v256_v57, 0.0 }
 0x111   :  { %292 = vst [vmem:[%s542_s3] sm:$0xff] %v335_v59  ;;  %294 = vst [vmem:[%s542_s3 + $0x10] sm:$0xff] %v337_v60  ;;  %v336_v62 = vpack.c.bf16 %v269_v61, %v268_v58 }
 0x113   :  { %293 = vst [vmem:[%s542_s3 + $0x8] sm:$0xff] %v336_v62 }

// kernel: vit_forward.9
= control target key start
LH: loop header
LB: loop body
LE: loop exit
PB: predicated region body
PF: predicated region fallthrough
CT: control target
= control target key end

     0   :  { %vm25_vm0 = vcmask 195584   ;;  %vm189_vm1 = vcmask 1045504   ;;  %vm164_vm2 = vcmask 48128   ;;  %s567_s1 = inlined_call_operand.vmem [shape: f32[24,6], index: 1, kind: input, shape index: {}]   ;;  %s568_s0 = inlined_call_operand.vmem [shape: f32[64,24], index: 0, kind: input, shape index: {}]   ;;  %s569_s2 = inlined_call_operand.vmem [shape: f32[6,24], index: 2, kind: input, shape index: {}]   ;;  %s570_s3 = inlined_call_operand.vmem [shape: f32[64,24], index: 3, kind: output, shape index: {}]  }
   0x1   :  { %v22_v0 = vld [vmem:[%s567_s1] sm:$0xff]  ;;  %v23_v1 = vld [vmem:[%s567_s1 + $0x8] sm:$0xff]  ;;  %v24_v4 = vld [vmem:[%s567_s1 + $0x10] sm:$0xff] }
   0x2   :  { %v427_v2 = vpack.c.bf16 %v23_v1, %v22_v0  ;;  %v14_v3 = vld [vmem:[%s568_s0] sm:$0xff]  ;;  %v15_v5 = vld [vmem:[%s568_s0 + $0x8] sm:$0xff]  ;;  %v16_v6 = vld [vmem:[%s568_s0 + $0x10] sm:$0xff] }
   0x3   :  { %401 = vmatprep.mubr.msk.f32.mxu0 %vm25_vm0, %v14_v3  ;;  %v17_v7 = vld [vmem:[%s568_s0 + $0x18] sm:$0xff]  ;;  %v18_v8 = vld [vmem:[%s568_s0 + $0x20] sm:$0xff]  ;;  %v19_v9 = vld [vmem:[%s568_s0 + $0x28] sm:$0xff] }
   0x4   :  { %428 = vmatprep.subr.bf16.mxu0 %v427_v2  ;;  %v20_v10 = vld [vmem:[%s568_s0 + $0x30] sm:$0xff]  ;;  %v21_v11 = vld [vmem:[%s568_s0 + $0x38] sm:$0xff]  ;;  %v163_v12 = vld [vmem:[%s569_s2] sm:$0x3f] }
   0x5   :  { %430 = vmatpush3.bf16.msra.mxu0 %v427_v2  ;;  %413 = vmatprep.subr.msk.mxu1 %vm189_vm1, %v163_v12 }
   0x6   :  { %399 = vmatprep.subr.mxu0 %v24_v4  ;;  %414 = vmatpush3.msk.msra.mxu1 %vm189_vm1, %v163_v12 }
   0x9   :  { %400 = vmatpush3.msra.mxu0 %v24_v4 }
   0xa   :  { %402 = vmatmul.mubr.msk.f32.vlgmr.msra.gmra.mrb[0].mxu0 %vm25_vm0, %v15_v5 }
   0xb   :  { %404 = vmatprep.mubr.msk.f32.mxu0 %vm25_vm0, %v16_v6 }
   0xe   :  { %405 = vmatmul.mubr.msk.f32.gmra.mrb[2].mxu0 %vm25_vm0, %v17_v7 }
   0xf   :  { %407 = vmatprep.mubr.msk.f32.mxu0 %vm25_vm0, %v18_v8 }
  0x12   :  { %408 = vmatmul.mubr.msk.f32.gmra.mrb[4].mxu0 %vm25_vm0, %v19_v9 }
  0x13   :  { %410 = vmatprep.mubr.msk.f32.mxu0 %vm25_vm0, %v20_v10 }
  0x16   :  { %411 = vmatmul.mubr.msk.f32.gmra.mrb[6].mxu0 %vm25_vm0, %v21_v11 }
  0xdd   :  { %v403_v13 = vpop.f32.mrb[0].mxu0 }
  0xde   :  { %v116_v14 = vpop.f32.mrb[1].mxu0  ;;  %v156_v16 = vmax.f32 %v403_v13, 0.0 }
  0xdf   :  { %v155_v15 = vmax.f32 %v116_v14, 0.0 }
  0xe1   :  { %v406_v17 = vpop.f32.mrb[2].mxu0  ;;  %415 = vmatprep.mubr.msk.f32.mxu1 %vm164_vm2, %v155_v15 }
  0xe2   :  { %v126_v18 = vpop.f32.mrb[3].mxu0  ;;  %416 = vmatmul.mubr.msk.f32.vlgmr.msra.gmra.mrb[0].mxu1 %vm164_vm2, %v156_v16  ;;  %v158_v20 = vmax.f32 %v406_v17, 0.0 }
  0xe3   :  { %v157_v19 = vmax.f32 %v126_v18, 0.0 }
  0xe5   :  { %v409_v21 = vpop.f32.mrb[4].mxu0  ;;  %418 = vmatprep.mubr.msk.f32.mxu1 %vm164_vm2, %v157_v19 }
  0xe6   :  { %v136_v22 = vpop.f32.mrb[5].mxu0  ;;  %419 = vmatmul.mubr.msk.f32.gmra.mrb[2].mxu1 %vm164_vm2, %v158_v20  ;;  %v160_v24 = vmax.f32 %v409_v21, 0.0 }
  0xe7   :  { %v159_v23 = vmax.f32 %v136_v22, 0.0 }
  0xe9   :  { %v412_v25 = vpop.f32.mrb[6].mxu0  ;;  %421 = vmatprep.mubr.msk.f32.mxu1 %vm164_vm2, %v159_v23 }
  0xea   :  { %v146_v26 = vpop.f32.mrb[7].mxu0  ;;  %422 = vmatmul.mubr.msk.f32.gmra.mrb[4].mxu1 %vm164_vm2, %v160_v24  ;;  %v162_v28 = vmax.f32 %v412_v25, 0.0 }
  0xeb   :  { %v161_v27 = vmax.f32 %v146_v26, 0.0 }
  0xed   :  { %424 = vmatprep.mubr.msk.f32.mxu1 %vm164_vm2, %v161_v27 }
  0xee   :  { %425 = vmatmul.mubr.msk.f32.gmra.mrb[6].mxu1 %vm164_vm2, %v162_v28 }
 0x1b5   :  { %v417_v29 = vpop.f32.mrb[0].mxu1 }
 0x1b6   :  { %v299_v30 = vsub.f32 0.0, %v417_v29  ;;  %v259_v31 = vpop.f32.mrb[1].mxu1 }
 0x1b7   :  { %v298_v32 = vsub.f32 0.0, %v259_v31 }
 0x1b8   :  { %v308_v33 = vmul.f32 1.442695, %v299_v30 }
 0x1b9   :  { %v306_v34 = vmul.f32 1.442695, %v298_v32  ;;  %v420_v35 = vpop.f32.mrb[2].mxu1 }
 0x1ba   :  { %431 = vpow2.f32 %v308_v33  ;;  %v301_v36 = vsub.f32 0.0, %v420_v35  ;;  %v269_v37 = vpop.f32.mrb[3].mxu1 }
 0x1bb   :  { %433 = vpow2.f32 %v306_v34  ;;  %v300_v38 = vsub.f32 0.0, %v269_v37 }
 0x1bc   :  { %v312_v39 = vmul.f32 1.442695, %v301_v36 }
 0x1bd   :  { %v310_v40 = vmul.f32 1.442695, %v300_v38  ;;  %v423_v41 = vpop.f32.mrb[4].mxu1 }
 0x1be   :  { %435 = vpow2.f32 %v312_v39  ;;  %v303_v42 = vsub.f32 0.0, %v423_v41  ;;  %v279_v43 = vpop.f32.mrb[5].mxu1 }
 0x1bf   :  { %437 = vpow2.f32 %v310_v40  ;;  %v302_v44 = vsub.f32 0.0, %v279_v43 }
 0x1c0   :  { %v316_v45 = vmul.f32 1.442695, %v303_v42 }
 0x1c1   :  { %v314_v46 = vmul.f32 1.442695, %v302_v44  ;;  %v426_v47 = vpop.f32.mrb[6].mxu1 }
 0x1c2   :  { %439 = vpow2.f32 %v316_v45  ;;  %v305_v48 = vsub.f32 0.0, %v426_v47  ;;  %v289_v49 = vpop.f32.mrb[7].mxu1 }
 0x1c3   :  { %441 = vpow2.f32 %v314_v46  ;;  %v304_v50 = vsub.f32 0.0, %v289_v49 }
 0x1c4   :  { %v432_v51 = vpop.eup %431  ;;  %v320_v52 = vmul.f32 1.442695, %v305_v48 }
 0x1c5   :  { %v434_v53 = vpop.eup %433  ;;  %v323_v54 = vadd.f32 1.0, %v432_v51  ;;  %v318_v55 = vmul.f32 1.442695, %v304_v50 }
 0x1c6   :  { %v322_v56 = vadd.f32 1.0, %v434_v53  ;;  %443 = vpow2.f32 %v320_v52 }
 0x1c7   :  { %445 = vrcp.f32 %v323_v54 }
 0x1c8   :  { %v436_v57 = vpop.eup %435  ;;  %447 = vrcp.f32 %v322_v56 }
 0x1c9   :  { %v438_v58 = vpop.eup %437  ;;  %v325_v59 = vadd.f32 1.0, %v436_v57  ;;  %449 = vpow2.f32 %v318_v55 }
 0x1ca   :  { %v324_v60 = vadd.f32 1.0, %v438_v58 }
 0x1cb   :  { %451 = vrcp.f32 %v325_v59 }
 0x1cc   :  { %v440_v61 = vpop.eup %439  ;;  %453 = vrcp.f32 %v324_v60 }
 0x1cd   :  { %v442_v62 = vpop.eup %441  ;;  %v327_v63 = vadd.f32 1.0, %v440_v61 }
 0x1ce   :  { %v326_v0 = vadd.f32 1.0, %v442_v62 }
 0x1cf   :  { %455 = vrcp.f32 %v327_v63 }
 0x1d0   :  { %v444_v1 = vpop.eup %443  ;;  %457 = vrcp.f32 %v326_v0 }
 0x1d1   :  { %v446_v2 = vpop.eup %445  ;;  %v329_v3 = vadd.f32 1.0, %v444_v1 }
 0x1d2   :  { %v448_v4 = vpop.eup %447  ;;  %347 = vst.msk [vmem:[%s570_s3 + $0x8] sm:$0xff] %vm25_vm0, %v446_v2 }
 0x1d3   :  { %v450_v5 = vpop.eup %449  ;;  %346 = vst.msk [vmem:[%s570_s3] sm:$0xff] %vm25_vm0, %v448_v4  ;;  %459 = vrcp.f32 %v329_v3 }
 0x1d4   :  { %v328_v6 = vadd.f32 1.0, %v450_v5 }
 0x1d5   :  { %v452_v7 = vpop.eup %451 }
 0x1d6   :  { %v454_v8 = vpop.eup %453  ;;  %349 = vst.msk [vmem:[%s570_s3 + $0x18] sm:$0xff] %vm25_vm0, %v452_v7  ;;  %461 = vrcp.f32 %v328_v6 }
 0x1d7   :  { %348 = vst.msk [vmem:[%s570_s3 + $0x10] sm:$0xff] %vm25_vm0, %v454_v8 }
 0x1d9   :  { %v456_v9 = vpop.eup %455 }
 0x1da   :  { %v458_v10 = vpop.eup %457  ;;  %351 = vst.msk [vmem:[%s570_s3 + $0x28] sm:$0xff] %vm25_vm0, %v456_v9 }
 0x1db   :  { %350 = vst.msk [vmem:[%s570_s3 + $0x20] sm:$0xff] %vm25_vm0, %v458_v10 }
 0x1dd   :  { %v460_v11 = vpop.eup %459 }
 0x1de   :  { %353 = vst.msk [vmem:[%s570_s3 + $0x38] sm:$0xff] %vm25_vm0, %v460_v11 }
 0x1e0   :  { %v462_v12 = vpop.eup %461 }
 0x1e1   :  { %352 = vst.msk [vmem:[%s570_s3 + $0x30] sm:$0xff] %vm25_vm0, %v462_v12 }

// kernel: vit_forward.10
= control target key start
LH: loop header
LB: loop body
LE: loop exit
PB: predicated region body
PF: predicated region fallthrough
CT: control target
= control target key end

     0   :  { %vm66_vm0 = vcmask 261120   ;;  %vm144_vm1 = vcmask 523264   ;;  %s269_s1 = inlined_call_operand.vmem [shape: bf16[32,64], index: 1, kind: input, shape index: {}]   ;;  %s270_s0 = inlined_call_operand.vmem [shape: bf16[64,32], index: 0, kind: input, shape index: {}]   ;;  %s271_s2 = inlined_call_operand.vmem [shape: f32[1,64], index: 2, kind: input, shape index: {}]   ;;  %s272_s3 = inlined_call_operand.vmem [shape: f32[64,64], index: 3, kind: output, shape index: {}]  }
   0x1   :  { %v190_v0 = vld [vmem:[%s269_s1] sm:$0xff]   ;;  %v191_v1 = vld [vmem:[%s269_s1 + $0x8] sm:$0xff]   ;;  %v193_v3 = vld [vmem:[%s270_s0 + $0x10] sm:$0xff]  }
   0x2   :  { %174 = vmatprep.subr.bf16.mxu0 %v190_v0  ;;  %186 = vmatprep.subr.bf16.mxu1 %v190_v0  ;;  %v192_v2 = vld [vmem:[%s270_s0] sm:$0xff]   ;;  %v194_v4 = vld [vmem:[%s270_s0 + $0x8] sm:$0xff]   ;;  %v195_v5 = vld [vmem:[%s270_s0 + $0x18] sm:$0xff]  }
   0x3   :  { %175 = vmatpush3.bf16.msra.mxu0 %v190_v0  ;;  %188 = vmatpush3.bf16.msra.mxu1 %v190_v0  ;;  %v157_v6 = vld [vmem:[%s271_s2] ss:$0 sm:$0xff] }
   0x4   :  { %176 = vmatprep.subr.bf16.mxu0 %v191_v1  ;;  %187 = vmatprep.subr.bf16.mxu1 %v191_v1 }
   0x5   :  { %178 = vmatprep.mubr.msk.bf16.mxu0 %vm66_vm0, %v192_v2  ;;  %182 = vmatprep.mubr.msk.bf16.mxu1 %vm66_vm0, %v193_v3 }
   0x7   :  { %177 = vmatpush3.bf16.msra.mxu0 %v191_v1  ;;  %189 = vmatpush3.bf16.msra.mxu1 %v191_v1 }
   0xa   :  { %179 = vmatmul.mubr.msk.bf16.vlgmr.msra.gmra.mrb[0].mxu0 %vm66_vm0, %v194_v4  ;;  %183 = vmatmul.mubr.msk.bf16.vlgmr.msra.gmra.mrb[0].mxu1 %vm66_vm0, %v195_v5 }
  0xdd   :  { %v180_v7 = vpop.f32.mrb[0].mxu0  ;;  %v184_v8 = vpop.f32.mrb[0].mxu1 }
  0xde   :  { %v122_v9 = vadd.f32 %v180_v7, %v157_v6  ;;  %v138_v10 = vadd.f32 %v184_v8, %v157_v6  ;;  %v113_v11 = vpop.f32.mrb[1].mxu0  ;;  %v129_v12 = vpop.f32.mrb[1].mxu1 }
  0xdf   :  { %v114_v13 = vadd.f32 %v157_v6, %v113_v11  ;;  %v130_v14 = vadd.f32 %v157_v6, %v129_v12  ;;  %v181_v15 = vpop.f32.mrb[2].mxu0  ;;  %v185_v16 = vpop.f32.mrb[2].mxu1 }
  0xe0   :  { %147 = vst.msk [vmem:[%s272_s3 + $0x10] sm:$0xff] %vm144_vm1, %v122_v9  ;;  %151 = vst.msk [vmem:[%s272_s3 + $0x30] sm:$0xff] %vm144_vm1, %v138_v10  ;;  %v125_v17 = vadd.f32 %v181_v15, %v157_v6  ;;  %v141_v18 = vadd.f32 %v185_v16, %v157_v6  ;;  %v116_v19 = vpop.f32.mrb[3].mxu0  ;;  %v132_v20 = vpop.f32.mrb[3].mxu1 }
  0xe1   :  { %145 = vst.msk [vmem:[%s272_s3] sm:$0xff] %vm144_vm1, %v114_v13  ;;  %149 = vst.msk [vmem:[%s272_s3 + $0x20] sm:$0xff] %vm144_vm1, %v130_v14  ;;  %v117_v21 = vadd.f32 %v157_v6, %v116_v19  ;;  %v133_v22 = vadd.f32 %v157_v6, %v132_v20 }
  0xe2   :  { %148 = vst.msk [vmem:[%s272_s3 + $0x18] sm:$0xff] %vm144_vm1, %v125_v17  ;;  %152 = vst.msk [vmem:[%s272_s3 + $0x38] sm:$0xff] %vm144_vm1, %v141_v18 }
  0xe3   :  { %146 = vst.msk [vmem:[%s272_s3 + $0x8] sm:$0xff] %vm144_vm1, %v117_v21  ;;  %150 = vst.msk [vmem:[%s272_s3 + $0x28] sm:$0xff] %vm144_vm1, %v133_v22 }

// kernel: vit_forward.11
= control target key start
LH: loop header
LB: loop body
LE: loop exit
PB: predicated region body
PF: predicated region fallthrough
CT: control target
= control target key end

     0   :  { %s2705_s25 = smov 0   ;;  %s3184_s0 = inlined_call_operand.vmem [shape: f32[2,31,64], index: 0, kind: input, shape index: {}]   ;;  %s3185_s1 = inlined_call_operand.vmem [shape: f32[1,64], index: 1, kind: input, shape index: {}]   ;;  %s3186_s2 = inlined_call_operand.vmem [shape: bf16[64,192], index: 2, kind: input, shape index: {}]   ;;  %s3187_s3 = inlined_call_operand.vmem [shape: bf16[64,64], index: 3, kind: input, shape index: {}]   ;;  %s3188_s4 = inlined_call_operand.vmem [shape: f32[1,64], index: 4, kind: input, shape index: {}]   ;;  %s3189_s5 = inlined_call_operand.vmem [shape: f32[1,64], index: 5, kind: input, shape index: {}]   ;;  %s3190_s6 = inlined_call_operand.vmem [shape: f32[1,64], index: 6, kind: input, shape index: {}]   ;;  %s3191_s7 = inlined_call_operand.vmem [shape: f32[1,64], index: 7, kind: input, shape index: {}]   ;;  %s3192_s8 = inlined_call_operand.vmem [shape: f32[1,64], index: 8, kind: input, shape index: {}]   ;;  %s3193_s9 = inlined_call_operand.vmem [shape: bf16[64,256], index: 9, kind: input, shape index: {}]   ;;  %s3194_s10 = inlined_call_operand.vmem [shape: f32[1,256], index: 10, kind: input, shape index: {}]   ;;  %s3195_s11 = inlined_call_operand.vmem [shape: bf16[256,64], index: 11, kind: input, shape index: {}]   ;;  %s3196_s12 = inlined_call_operand.vmem [shape: f32[1,64], index: 12, kind: input, shape index: {}]   ;;  %s3197_s13 = inlined_call_operand.vmem [shape: f32[2,31,64], index: 13, kind: output, shape index: {}]  }
   0x1 LB: > { %s2193_s26 = sadd.s32 4294967295, %s2624_s25   ;;  %p2197_p0 = scmp.ge.s32.totalorder %s2624_s25, 1  ;;  %s2624_s25 = sphi %s2705_s25, %s23_s25  }
   0x2   : > { %p387_p1 = scmp.lt.s32.totalorder %s2624_s25, 3 }
   0x4   : > { %p388_p2 = pnand %p2197_p0, %p387_p1 }
   0x5   : > { %p431_p3 = scmp.lt.s32.totalorder (!%p388_p2), %s2193_s26, 1  ;;  %vm448_vm0 = vcmask (!%p388_p2), 523264   ;;  %vm458_vm1 = vcmask (!%p388_p2), 522240   ;;  %v2474_v28 = vld [vmem:[%s3186_s2 + $0x4] ss:$8 sps:$4 sm:$0xff] (!%p388_p2)   ;;  %v2626_v36 = vmov (!%p388_p2), 0  }
   0x6   : > { %391 = sbr.rel (%p388_p2) target bundleno = 3301 (0xce5), region = 72  ;;  %v2476_v29 = vld [vmem:[%s3186_s2] ss:$8 sps:$4 sm:$0xff] (!%p388_p2)   ;;  %579 = vmatprep.subr.bf16.mxu1 (!%p388_p2), %v2474_v28  ;;  %v2477_v30 = vld [vmem:[%s3186_s2 + $0x14] ss:$8 sps:$4 sm:$0xff] (!%p388_p2)   ;;  %611 = vmatprep.mubr.bf16.mxu1 (!%p388_p2), %v2626_v36  ;;  %vm674_vm2 = vcmask (!%p388_p2), 130048  }
   0x7   : > { %580 = vmatpush1.bf16.msra.mxu1 (!%p388_p2), %v2476_v29  ;;  %v2479_v31 = vld [vmem:[%s3186_s2 + $0x10] ss:$8 sps:$4 sm:$0xff] (!%p388_p2)   ;;  %v2480_v32 = vld [vmem:[%s3186_s2 + $0x24] ss:$8 sps:$4 sm:$0xff] (!%p388_p2)   ;;  %v2482_v33 = vld [vmem:[%s3186_s2 + $0x20] ss:$8 sps:$4 sm:$0xff] (!%p388_p2)  }
   0x8   : > { %581 = vmatprep.subr.bf16.mxu1 (!%p388_p2), %v2477_v30  ;;  %v2483_v34 = vld [vmem:[%s3186_s2 + $0x34] ss:$8 sps:$4 sm:$0xff] (!%p388_p2)   ;;  %v2485_v35 = vld [vmem:[%s3186_s2 + $0x30] ss:$8 sps:$4 sm:$0xff] (!%p388_p2)   ;;  %v2202_v51 = vld [vmem:[%s3189_s5] ss:$0 sm:$0xff] (!%p388_p2) }
   0x9   : > { %v2203_v56 = vld [vmem:[%s3190_s6] ss:$0 sm:$0xff] (!%p388_p2)  ;;  %s2627_s23 = smov (!%p388_p2), 64   ;;  %s2628_s24 = smov (!%p388_p2), 112   ;;  %vm794_vm3 = vcmask (!%p388_p2), 1046528   ;;  %vm795_vm4 = vcmask (!%p388_p2), 1047552  }
   0xa   : > { %s2629_s28 = smov (!%p388_p2), 48   ;;  %v2630_v29 = vmov (!%p388_p2), 65535   ;;  %vm740_vm6 = vcmask (!%p388_p2), 252928   ;;  %vm750_vm10 = vcmask (!%p388_p2), 251904   ;;  %s2631_s29 = smov (!%p388_p2), 96  }
   0xb   : > { %582 = vmatpush1.bf16.msra.mxu1 (!%p388_p2), %v2479_v31  ;;  %v796_v30 = vsel (!%p388_p2), %vm794_vm3, 4294967295, %v2630_v29  ;;  %s2632_s14 = smov (!%p388_p2), 16   ;;  %s2633_s15 = smov (!%p388_p2), 80  }
   0xc   : > { %583 = vmatprep.subr.bf16.mxu1 (!%p388_p2), %v2480_v32  ;;  %s2634_s16 = smov (!%p388_p2), 32  }
   0xd   : > { %s3199_s26 = smov (!%p431_p3, %s2193_s26), 1 }
   0xe   : > { %s2275_s27 = sshll.u32 %s3199_s26, 5 }
   0xf   : > { %s2721_s30 = scalar_lea.vmem %s3184_s0, %s2275_s27  ;;  %584 = vmatpush1.bf16.msra.mxu1 %v2482_v33  ;;  %v2807_v33 = vsel %vm795_vm4, %v796_v30, 0 }
  0x10   : > { %v442_v0 = vld [vmem:[%s2721_s30] sm:$0xff]  ;;  %v444_v1 = vld [vmem:[%s2721_s30 + $0x10] sm:$0xff]  ;;  %v443_v2 = vld [vmem:[%s2721_s30 + $0x8] sm:$0xff]  ;;  %585 = vmatprep.subr.bf16.mxu1 %v2483_v34 }
  0x11   : > { %v449_v3 = vsel %vm448_vm0, %v442_v0, 0.0  ;;  %v455_v4 = vsel %vm448_vm0, %v444_v1, 0.0  ;;  %v445_v5 = vld [vmem:[%s2721_s30 + $0x18] sm:$0x7f]  ;;  %v452_v6 = vsel %vm448_vm0, %v443_v2, 0.0 }
  0x12   : > { %450 = vadd.xlane.f32.xlu0 %v449_v3  ;;  %456 = vadd.xlane.f32.xlu1 %v455_v4  ;;  %v459_v7 = vsel %vm458_vm1, %v445_v5, 0.0 }
  0x13   : > { %586 = vmatpush1.bf16.msra.mxu1 %v2485_v35 }
  0x16   : > { %453 = vadd.xlane.f32.xlu0 %v452_v6  ;;  %460 = vadd.xlane.f32.xlu1 %v459_v7  ;;  %v2214_v6 = vld [vmem:[%s3185_s1] ss:$0 sm:$0xff] }
  0x9f   : > { %v451_v8 = vpop.xlane.xlu0 %450  ;;  %v457_v9 = vpop.xlane.xlu1 %456 }
  0xa0   : > { %v463_v10 = vmul.f32 0.015625, %v451_v8  ;;  %v465_v11 = vmul.f32 0.015625, %v457_v9 }
  0xa2   : > { %v467_v12 = vsub.f32 %v442_v0, %v463_v10  ;;  %v2731_v13 = vsub.f32 %v444_v1, %v465_v11 }
  0xa3   : > { %v454_v14 = vpop.xlane.xlu0 %453  ;;  %v461_v15 = vpop.xlane.xlu1 %460 }
  0xa4   : > { %v464_v16 = vmul.f32 0.015625, %v454_v14  ;;  %v466_v17 = vmul.f32 0.015625, %v461_v15  ;;  %v471_v18 = vmul.f32 %v467_v12, %v467_v12  ;;  %v473_v19 = vmul.f32 %v2731_v13, %v2731_v13 }
  0xa6   : > { %v468_v20 = vsub.f32 %v443_v2, %v464_v16  ;;  %v470_v21 = vsub.f32 %v445_v5, %v466_v17  ;;  %v475_v22 = vsel %vm448_vm0, %v471_v18, 0.0  ;;  %v481_v23 = vsel %vm448_vm0, %v473_v19, 0.0 }
  0xa7   : > { %476 = vadd.xlane.f32.xlu0 %v475_v22 }
  0xa8   : > { %v472_v24 = vmul.f32 %v468_v20, %v468_v20  ;;  %v474_v25 = vmul.f32 %v470_v21, %v470_v21 }
  0xaa   : > { %v478_v26 = vsel %vm448_vm0, %v472_v24, 0.0  ;;  %v484_v27 = vsel %vm458_vm1, %v474_v25, 0.0 }
  0xab   : > { %482 = vadd.xlane.f32.xlu0 %v481_v23  ;;  %479 = vadd.xlane.f32.xlu1 %v478_v26 }
  0xaf   : > { %485 = vadd.xlane.f32.xlu1 %v484_v27 }
 0x134   : > { %v477_v37 = vpop.xlane.xlu0 %476 }
 0x135   : > { %v487_v38 = vmul.f32 0.015625, %v477_v37 }
 0x137   : > { %v491_v39 = vadd.f32 1e-06, %v487_v38 }
 0x138   : > { %v480_v40 = vpop.xlane.xlu1 %479  ;;  %v483_v41 = vpop.xlane.xlu0 %482 }
 0x139   : > { %2518 = vrsqrt.f32 %v491_v39  ;;  %v488_v42 = vmul.f32 0.015625, %v480_v40  ;;  %v489_v43 = vmul.f32 0.015625, %v483_v41  ;;  %v657_v39 = vlaneseq }
 0x13b   : > { %v492_v44 = vadd.f32 1e-06, %v488_v42  ;;  %v493_v45 = vadd.f32 1e-06, %v489_v43  ;;  %v2817_v40 = vshrl.u32 %v657_v39, 7  ;;  %v2819_v41 = vand.u32 127, %v657_v39 }
 0x13c   : > { %v486_v46 = vpop.xlane.xlu1 %485 }
 0x13d   : > { %2520 = vrsqrt.f32 %v492_v44  ;;  %v490_v47 = vmul.f32 0.015625, %v486_v46  ;;  %v2822_v42 = vadd.s32 16, %v2817_v40  ;;  %v2825_v43 = vadd.s32 8, %v2817_v40 }
 0x13e   : > { %2522 = vrsqrt.f32 %v493_v45  ;;  %vm664_vm5 = vcmp.eq.s32.totalorder %v2817_v40, %v2819_v41  ;;  %v2832_v46 = vadd.s32 24, %v2817_v40 }
 0x13f   : > { %v494_v48 = vadd.f32 1e-06, %v490_v47  ;;  %vm666_vm7 = vcmp.eq.s32.totalorder %v2822_v42, %v2819_v41  ;;  %vm665_vm8 = vcmp.eq.s32.totalorder %v2825_v43, %v2819_v41 }
 0x140   : > { %vm667_vm9 = vcmp.eq.s32.totalorder %v2832_v46, %v2819_v41 }
 0x141   : > { %2524 = vrsqrt.f32 %v494_v48 }
 0x143   : > { %v2519_v49 = vpop.eup %2518 }
 0x144   : > { %v499_v50 = vmul.f32 %v2519_v49, %v467_v12 }
 0x146   : > { %v509_v54 = vmul.f32 %v2202_v51, %v499_v50 }
 0x147   : > { %v2521_v52 = vpop.eup %2520 }
 0x148   : > { %v500_v53 = vmul.f32 %v2521_v52, %v468_v20  ;;  %v2523_v55 = vpop.eup %2522  ;;  %v519_v61 = vadd.f32 %v2203_v56, %v509_v54 }
 0x149   : > { %v501_v59 = vmul.f32 %v2523_v55, %v2731_v13 }
 0x14a   : > { %v510_v57 = vmul.f32 %v2202_v51, %v500_v53 }
 0x14b   : > { %v2525_v58 = vpop.eup %2524  ;;  %v511_v1 = vmul.f32 %v2202_v51, %v501_v59 }
 0x14c   : > { %v502_v60 = vmul.f32 %v2525_v58, %v470_v21  ;;  %v520_v62 = vadd.f32 %v2203_v56, %v510_v57 }
 0x14d   : > { %v521_v3 = vadd.f32 %v2203_v56, %v511_v1 }
 0x14e   : > { %v523_v63 = vpack.c.bf16 %v520_v62, %v519_v61  ;;  %v512_v0 = vmul.f32 %v2202_v51, %v502_v60 }
 0x150   : > { %2212 = vmatmul.mubr.msk.bf16.vlgmr.msra.gmra.mrb[0].mxu1 %vm448_vm0, %v523_v63  ;;  %v522_v2 = vadd.f32 %v2203_v56, %v512_v0 }
 0x151   : > { %621 = vmatprep.mubr.bf16.mxu1 %v2626_v36 }
 0x152   : > { %v524_v4 = vpack.c.bf16 %v522_v2, %v521_v3 }
 0x158   : > { %2213 = vmatmul.mubr.msk.bf16.gmra.mrb[4].mxu1 %vm448_vm0, %v524_v4 }
 0x223   : > { %v613_v5 = vpop.f32.mrb[0].mxu1 }
 0x224   : > { %v615_v7 = vpop.f32.mrb[1].mxu1  ;;  %v639_v9 = vmul.f32 %v2214_v6, %v613_v5 }
 0x225   : > { %v617_v8 = vpop.f32.mrb[2].mxu1 }
 0x226   : > { %v640_v10 = vmul.f32 %v2214_v6, %v617_v8  ;;  %v2777_v11 = vpack.c.bf16 %v617_v8, %v613_v5  ;;  %v619_v12 = vpop.f32.mrb[3].mxu1 }
 0x227   : > { %v2779_v13 = vpack.c.bf16 %v619_v12, %v615_v7 }
 0x228   : > { %v2781_v14 = vpack.c.bf16 %v640_v10, %v639_v9  ;;  %670 = vrot.lane.b32.xlu0 %v2777_v11, %s2627_s23 }
 0x22a   : > { %2353 = vmatprep.mubr.msk.bf16.mxu1 %vm674_vm2, %v2781_v14 }
 0x22b   : > { %v623_v15 = vpop.f32.mrb[4].mxu1 }
 0x22c   : > { %854 = vrot.lane.b32.xlu0 %v2781_v14, %s2628_s24  ;;  %v625_v16 = vpop.f32.mrb[5].mxu1  ;;  %v641_v18 = vmul.f32 %v2214_v6, %v623_v15 }
 0x22d   : > { %v627_v17 = vpop.f32.mrb[6].mxu1 }
 0x22e   : > { %v642_v19 = vmul.f32 %v2214_v6, %v627_v17  ;;  %v2788_v20 = vpack.c.bf16 %v627_v17, %v623_v15  ;;  %v629_v21 = vpop.f32.mrb[7].mxu1 }
 0x22f   : > { %v2790_v22 = vpack.c.bf16 %v629_v21, %v625_v16 }
 0x230   : > { %v2792_v23 = vpack.c.bf16 %v642_v19, %v641_v18  ;;  %672 = vrot.lane.b32.xlu1 %v2788_v20, %s2627_s23 }
 0x231   : > { %v799_v35 = vand.u32 %v2807_v33, %v2790_v22 }
 0x234   : > { %858 = vrot.lane.b32.xlu1 %v2777_v11, %s2629_s28 }
 0x238   : > { %860 = vrot.lane.b32.xlu1 %v2788_v20, %s2629_s28 }
 0x23c   : > { %856 = vrot.lane.b32.xlu1 %v2792_v23, %s2628_s24 }
 0x29a   : > { %v671_v24 = vpop.permute.xlu0 %670 }
 0x29b   : > { %v682_v25 = vsel %vm674_vm2, %v671_v24, 0  ;;  %2449 = vmatprep.subr.msk.bf16.mxu1 %vm674_vm2, %v671_v24 }
 0x29c   : > { %2350 = vmatpush3.bf16.xpose.msra.mxu1 %v682_v25 }
 0x29e   : > { %v855_v26 = vpop.permute.xlu0 %854 }
 0x29f   : > { %2369 = vmatprep.mubr.msk.bf16.mxu0 %vm674_vm2, %v855_v26 }
 0x2a2   : > { %v673_v27 = vpop.permute.xlu1 %672 }
 0x2a3   : > { %v685_v28 = vsel %vm674_vm2, %v673_v27, 0  ;;  %2450 = vmatprep.subr.msk.bf16.mxu1 %vm674_vm2, %v673_v27 }
 0x2a4   : > { %2352 = vmatpush3.bf16.xpose.msra.mxu1 %v685_v28 }
 0x2a5   : > { %2357 = vmatprep.subr.bf16.mxu1 %v2779_v13 }
 0x2a6   : > { %v859_v31 = vpop.permute.xlu1 %858 }
 0x2a7   : > { %2451 = vmatprep.subr.msk.bf16.mxu0 %vm674_vm2, %v859_v31  ;;  %v869_v32 = vsel %vm674_vm2, %v859_v31, 0 }
 0x2a8   : > { %2366 = vmatpush3.bf16.xpose.msra.mxu0 %v869_v32 }
 0x2aa   : > { %v861_v34 = vpop.permute.xlu1 %860 }
 0x2ab   : > { %2354 = vmatmul.mubr.msk.bf16.vlgmr.msra.gmra.mrb[8].mxu1 %vm674_vm2, %v2792_v23  ;;  %2452 = vmatprep.subr.msk.bf16.mxu0 %vm674_vm2, %v861_v34  ;;  %v872_v37 = vsel %vm674_vm2, %v861_v34, 0 }
 0x2ac   : > { %2358 = vmatpush3.bf16.msra.mxu1 %v2779_v13 }
 0x2ad   : > { %2359 = vmatprep.subr.bf16.mxu1 %v799_v35 }
 0x2ae   : > { %v857_v38 = vpop.permute.xlu1 %856 }
 0x2b0   : > { %2360 = vmatpush3.bf16.msra.mxu1 %v799_v35  ;;  %2368 = vmatpush3.bf16.xpose.msra.mxu0 %v872_v37 }
 0x2b7   : > { %2370 = vmatmul.mubr.msk.bf16.vlgmr.msra.gmra.mrb[0].mxu0 %vm674_vm2, %v857_v38 }
 0x37e   : > { %v2355_v44 = vpop.f32.mrb[8].mxu1 }
 0x37f   : > { %v721_v45 = vpop.f32.mrb[9].mxu1  ;;  %v738_v51 = vsel %vm666_vm7, -9.8765434e+08, %v2355_v44 }
 0x380   : > { %v736_v47 = vsel %vm664_vm5, -9.8765434e+08, %v721_v45  ;;  %v2356_v48 = vpop.f32.mrb[10].mxu1  ;;  %v747_v54 = vsel %vm740_vm6, %v738_v51, -inf }
 0x381   : > { %v724_v49 = vpop.f32.mrb[11].mxu1  ;;  %v741_v50 = vsel %vm740_vm6, %v736_v47, -inf  ;;  %v739_v55 = vsel %vm667_vm9, -9.8765434e+08, %v2356_v48 }
 0x382   : > { %v737_v52 = vsel %vm665_vm8, -9.8765434e+08, %v724_v49  ;;  %742 = vmax.xlane.f32.xlu0 %v741_v50  ;;  %v751_v56 = vsel %vm750_vm10, %v739_v55, -inf }
 0x383   : > { %v744_v53 = vsel %vm740_vm6, %v737_v52, -inf }
 0x384   : > { %745 = vmax.xlane.f32.xlu1 %v744_v53 }
 0x386   : > { %748 = vmax.xlane.f32.xlu0 %v747_v54 }
 0x38a   : > { %752 = vmax.xlane.f32.xlu0 %v751_v56  ;;  %v2371_v57 = vpop.f32.mrb[0].mxu0 }
 0x38b   : > { %v908_v58 = vpop.f32.mrb[1].mxu0  ;;  %v925_v63 = vsel %vm666_vm7, -9.8765434e+08, %v2371_v57 }
 0x38c   : > { %v923_v59 = vsel %vm664_vm5, -9.8765434e+08, %v908_v58  ;;  %v2372_v60 = vpop.f32.mrb[2].mxu0  ;;  %v933_v3 = vsel %vm740_vm6, %v925_v63, -inf }
 0x38d   : > { %v911_v61 = vpop.f32.mrb[3].mxu0  ;;  %v927_v62 = vsel %vm740_vm6, %v923_v59, -inf  ;;  %v926_v2 = vsel %vm667_vm9, -9.8765434e+08, %v2372_v60 }
 0x38e   : > { %v2864_v0 = vsel %vm665_vm8, -9.8765434e+08, %v911_v61  ;;  %928 = vmax.xlane.f32.xlu0 %v927_v62  ;;  %v936_v4 = vsel %vm750_vm10, %v926_v2, -inf }
 0x38f   : > { %v930_v1 = vsel %vm740_vm6, %v2864_v0, -inf }
 0x390   : > { %931 = vmax.xlane.f32.xlu1 %v930_v1 }
 0x392   : > { %934 = vmax.xlane.f32.xlu0 %v933_v3 }
 0x394   : > { %937 = vmax.xlane.f32.xlu1 %v936_v4 }
 0x40f   : > { %v743_v5 = vpop.xlane.xlu0 %742 }
 0x410   : > { %v754_v17 = vsub.f32 %v736_v47, %v743_v5 }
 0x411   : > { %v746_v12 = vpop.xlane.xlu1 %745 }
 0x412   : > { %v755_v21 = vsub.f32 %v737_v52, %v746_v12  ;;  %v758_v25 = vmul.f32 1.442695, %v754_v17 }
 0x413   : > { %v749_v6 = vpop.xlane.xlu0 %748 }
 0x414   : > { %v756_v7 = vsub.f32 %v738_v51, %v749_v6  ;;  %v760_v32 = vmul.f32 1.442695, %v755_v21 }
 0x416   : > { %v762_v8 = vmul.f32 1.442695, %v756_v7 }
 0x417   : > { %v753_v9 = vpop.xlane.xlu0 %752 }
 0x418   : > { %2526 = vpow2.f32 %v762_v8  ;;  %v757_v10 = vsub.f32 %v739_v55, %v753_v9 }
 0x41a   : > { %v764_v15 = vmul.f32 1.442695, %v757_v10 }
 0x41b   : > { %v929_v16 = vpop.xlane.xlu0 %928 }
 0x41c   : > { %2528 = vpow2.f32 %v764_v15  ;;  %v939_v28 = vsub.f32 %v923_v59, %v929_v16 }
 0x41d   : > { %v932_v18 = vpop.xlane.xlu1 %931 }
 0x41e   : > { %v943_v37 = vmul.f32 1.442695, %v939_v28  ;;  %v940_v54 = vsub.f32 %v2864_v0, %v932_v18 }
 0x41f   : > { %v935_v19 = vpop.xlane.xlu0 %934 }
 0x420   : > { %v941_v24 = vsub.f32 %v925_v63, %v935_v19  ;;  %v945_v55 = vmul.f32 1.442695, %v940_v54 }
 0x421   : > { %v938_v26 = vpop.xlane.xlu1 %937 }
 0x422   : > { %v2873_v27 = vpop.eup %2526  ;;  %v947_v29 = vmul.f32 1.442695, %v941_v24  ;;  %v942_v30 = vsub.f32 %v926_v2, %v938_v26 }
 0x423   : > { %v772_v31 = vsel %vm740_vm6, %v2873_v27, 0.0 }
 0x424   : > { %2530 = vpow2.f32 %v947_v29  ;;  %v949_v34 = vmul.f32 1.442695, %v942_v30  ;;  %773 = vadd.xlane.f32.xlu0 %v772_v31 }
 0x425   : > { %2532 = vpow2.f32 %v758_v25 }
 0x426   : > { %v2529_v35 = vpop.eup %2528  ;;  %2534 = vpow2.f32 %v949_v34 }
 0x427   : > { %v775_v38 = vsel %vm750_vm10, %v2529_v35, 0.0  ;;  %2536 = vpow2.f32 %v760_v32 }
 0x428   : > { %776 = vadd.xlane.f32.xlu1 %v775_v38  ;;  %2538 = vpow2.f32 %v943_v37 }
 0x429   : > { %2540 = vpow2.f32 %v945_v55 }
 0x42e   : > { %v2878_v39 = vpop.eup %2530 }
 0x42f   : > { %v2533_v44 = vpop.eup %2532  ;;  %v957_v45 = vsel %vm740_vm6, %v2878_v39, 0.0 }
 0x430   : > { %v2882_v47 = vpop.eup %2534  ;;  %958 = vadd.xlane.f32.xlu0 %v957_v45  ;;  %v766_v50 = vsel %vm740_vm6, %v2533_v44, 0.0  ;;  %v2486_v45 = vld [vmem:[%s3187_s3 + $0x8] sm:$0xff]  }
 0x431   : > { %v960_v48 = vsel %vm750_vm10, %v2882_v47, 0.0  ;;  %v2537_v49 = vpop.eup %2536  ;;  %2381 = vmatprep.subr.bf16.mxu0 %v2486_v45 }
 0x432   : > { %961 = vadd.xlane.f32.xlu1 %v960_v48  ;;  %v2887_v51 = vpop.eup %2538  ;;  %v769_v52 = vsel %vm740_vm6, %v2537_v49, 0.0  ;;  %2382 = vmatpush3.bf16.msra.mxu0 %v2486_v45 }
 0x433   : > { %v951_v53 = vsel %vm740_vm6, %v2887_v51, 0.0  ;;  %v2541_v56 = vpop.eup %2540 }
 0x434   : > { %767 = vadd.xlane.f32.xlu0 %v766_v50  ;;  %v954_v57 = vsel %vm740_vm6, %v2541_v56, 0.0 }
 0x436   : > { %770 = vadd.xlane.f32.xlu1 %v769_v52 }
 0x438   : > { %952 = vadd.xlane.f32.xlu0 %v951_v53 }
 0x447   : > { %977 = vrot.lane.b32.xlu1 %v2790_v22, %s2628_s24 }
 0x44e   : > { %975 = vrot.lane.b32.xlu0 %v2779_v13, %s2628_s24 }
 0x452   : > { %1162 = vrot.lane.b32.xlu0 %v2781_v14, %s2631_s29 }
 0x456   : > { %1415 = vrot.lane.b32.xlu0 %v2777_v11, %s2632_s14 }
 0x45a   : > { %1411 = vrot.lane.b32.xlu0 %v2781_v14, %s2633_s15 }
 0x46b   : > { %955 = vadd.xlane.f32.xlu1 %v954_v57 }
 0x47c   : > { %1166 = vrot.lane.b32.xlu1 %v2777_v11, %s2634_s16 }
 0x480   : > { %1168 = vrot.lane.b32.xlu1 %v2788_v20, %s2634_s16 }
 0x484   : > { %1164 = vrot.lane.b32.xlu1 %v2792_v23, %s2631_s29 }
 0x488   : > { %1417 = vrot.lane.b32.xlu1 %v2788_v20, %s2632_s14 }
 0x48c   : > { %1413 = vrot.lane.b32.xlu1 %v2792_v23, %s2633_s15 }
 0x4b1   : > { %v774_v58 = vpop.xlane.xlu0 %773 }
 0x4b5   : > { %v777_v14 = vpop.xlane.xlu1 %776 }
 0x4b6   : > { %2542 = vrcp.f32 %v777_v14 }
 0x4bd   : > { %v959_v59 = vpop.xlane.xlu0 %958 }
 0x4bf   : > { %v962_v60 = vpop.xlane.xlu1 %961 }
 0x4c0   : > { %v2543_v0 = vpop.eup %2542 }
 0x4c1   : > { %v768_v61 = vpop.xlane.xlu0 %767  ;;  %v785_v3 = vmul.f32 %v2543_v0, %v2529_v35 }
 0x4c2   : > { %2544 = vrcp.f32 %v768_v61 }
 0x4c3   : > { %2546 = vrcp.f32 %v774_v58  ;;  %v771_v62 = vpop.xlane.xlu1 %770 }
 0x4c4   : > { %2548 = vrcp.f32 %v771_v62 }
 0x4c5   : > { %v953_v11 = vpop.xlane.xlu0 %952  ;;  %2550 = vrcp.f32 %v962_v60 }
 0x4c6   : > { %2552 = vrcp.f32 %v953_v11 }
 0x4c7   : > { %v978_v6 = vpop.permute.xlu1 %977  ;;  %2554 = vrcp.f32 %v959_v59 }
 0x4c8   : > { %v987_v9 = vand.u32 %v978_v6, %v2807_v33 }
 0x4c9   : > { %v976_v63 = vpop.permute.xlu0 %975 }
 0x4ca   : > { %2373 = vmatprep.subr.bf16.mxu1 %v976_v63 }
 0x4cc   : > { %v2545_v1 = vpop.eup %2544 }
 0x4cd   : > { %v2547_v2 = vpop.eup %2546  ;;  %v782_v4 = vmul.f32 %v2545_v1, %v2533_v44  ;;  %v1163_v28 = vpop.permute.xlu0 %1162 }
 0x4ce   : > { %v2549_v20 = vpop.eup %2548  ;;  %v784_v5 = vmul.f32 %v2547_v2, %v2873_v27 }
 0x4cf   : > { %v783_v23 = vmul.f32 %v2549_v20, %v2537_v49  ;;  %v2551_v15 = vpop.eup %2550 }
 0x4d0   : > { %v787_v8 = vpack.c.bf16 %v785_v3, %v784_v5  ;;  %v2553_v16 = vpop.eup %2552  ;;  %v970_v19 = vmul.f32 %v2551_v15, %v2882_v47  ;;  %v2487_v47 = vld [vmem:[%s3187_s3] sm:$0xff]  }
 0x4d1   : > { %v786_v7 = vpack.c.bf16 %v783_v23, %v782_v4  ;;  %v2555_v17 = vpop.eup %2554  ;;  %v967_v21 = vmul.f32 %v2553_v16, %v2887_v51  ;;  %v1416_v32 = vpop.permute.xlu0 %1415  ;;  %2387 = vmatprep.subr.bf16.mxu0 %v2487_v47 }
 0x4d2   : > { %v969_v25 = vmul.f32 %v2555_v17, %v2878_v39  ;;  %v1426_v35 = vsel %vm674_vm2, %v1416_v32, 0 }
 0x4d3   : > { %2361 = vmatprep.mubr.msk.bf16.mxu1 %vm740_vm6, %v786_v7 }
 0x4d4   : > { %2362 = vmatmul.mubr.msk.bf16.vlgmr.msra.gmra.mrb[12].mxu1 %vm740_vm6, %v787_v8  ;;  %v972_v27 = vpack.c.bf16 %v970_v19, %v969_v25 }
 0x4d5   : > { %2374 = vmatpush3.bf16.msra.mxu1 %v976_v63  ;;  %v1412_v37 = vpop.permute.xlu0 %1411 }
 0x4d6   : > { %2375 = vmatprep.subr.bf16.mxu1 %v987_v9 }
 0x4d9   : > { %2376 = vmatpush3.bf16.msra.mxu1 %v987_v9 }
 0x4f8   : > { %v956_v10 = vpop.xlane.xlu1 %955 }
 0x4f9   : > { %2556 = vrcp.f32 %v956_v10 }
 0x4fc   : > { %v1167_v12 = vpop.permute.xlu1 %1166 }
 0x4fd   : > { %2453 = vmatprep.subr.msk.bf16.mxu1 %vm674_vm2, %v1167_v12  ;;  %v1177_v29 = vsel %vm674_vm2, %v1167_v12, 0 }
 0x500   : > { %v1169_v30 = vpop.permute.xlu1 %1168 }
 0x501   : > { %v1180_v31 = vsel %vm674_vm2, %v1169_v30, 0 }
 0x503   : > { %v2557_v18 = vpop.eup %2556 }
 0x504   : > { %v968_v24 = vmul.f32 %v2557_v18, %v2541_v56  ;;  %v1165_v34 = vpop.permute.xlu1 %1164 }
 0x506   : > { %v971_v26 = vpack.c.bf16 %v968_v24, %v967_v21 }
 0x508   : > { %2377 = vmatprep.mubr.msk.bf16.mxu1 %vm740_vm6, %v971_v26  ;;  %v1418_v38 = vpop.permute.xlu1 %1417 }
 0x509   : > { %2378 = vmatmul.mubr.msk.bf16.vlgmr.msra.gmra.mrb[16].mxu1 %vm740_vm6, %v972_v27  ;;  %v1429_v39 = vsel %vm674_vm2, %v1418_v38, 0 }
 0x50a   : > { %2394 = vmatpush3.bf16.xpose.msra.mxu1 %v1177_v29  ;;  %2397 = vmatprep.mubr.msk.bf16.mxu1 %vm674_vm2, %v1163_v28 }
 0x50b   : > { %2454 = vmatprep.subr.msk.bf16.mxu1 %vm674_vm2, %v1169_v30 }
 0x50c   : > { %v1414_v44 = vpop.permute.xlu1 %1413 }
 0x512   : > { %2396 = vmatpush3.bf16.xpose.msra.mxu1 %v1180_v31 }
 0x513   : > { %2455 = vmatprep.subr.msk.bf16.mxu1 %vm674_vm2, %v1416_v32 }
 0x519   : > { %2398 = vmatmul.mubr.msk.bf16.vlgmr.msra.gmra.mrb[20].mxu1 %vm674_vm2, %v1165_v34 }
 0x51a   : > { %2416 = vmatpush3.bf16.xpose.msra.mxu1 %v1426_v35  ;;  %2419 = vmatprep.mubr.msk.bf16.mxu1 %vm674_vm2, %v1412_v37 }
 0x51b   : > { %2456 = vmatprep.subr.msk.bf16.mxu1 %vm674_vm2, %v1418_v38 }
 0x522   : > { %2418 = vmatpush3.bf16.xpose.msra.mxu1 %v1429_v39 }
 0x529   : > { %2420 = vmatmul.mubr.msk.bf16.vlgmr.msra.gmra.mrb[24].mxu1 %vm674_vm2, %v1414_v44 }
 0x52a   : > { %1849 = vmatprep.mubr.bf16.mxu1 %v2626_v36 }
 0x5a7   : > { %v2363_v48 = vpop.f32.mrb[12].mxu1 }
 0x5a8   : > { %v835_v49 = vpop.f32.mrb[13].mxu1 }
 0x5a9   : > { %v2364_v50 = vpop.f32.mrb[14].mxu1 }
 0x5aa   : > { %v851_v51 = vpack.c.bf16 %v2364_v50, %v2363_v48  ;;  %v838_v52 = vpop.f32.mrb[15].mxu1 }
 0x5ab   : > { %v850_v53 = vpack.c.bf16 %v838_v52, %v835_v49 }
 0x5dc   : > { %v2379_v54 = vpop.f32.mrb[16].mxu1 }
 0x5dd   : > { %v1023_v55 = vpop.f32.mrb[17].mxu1 }
 0x5de   : > { %v2380_v56 = vpop.f32.mrb[18].mxu1 }
 0x5df   : > { %v1039_v57 = vpack.c.bf16 %v2380_v56, %v2379_v54  ;;  %v1026_v58 = vpop.f32.mrb[19].mxu1 }
 0x5e0   : > { %v1038_v14 = vpack.c.bf16 %v1026_v58, %v1023_v55 }
 0x5e2   : > { %2383 = vmatprep.mubr.msk.bf16.mxu0 %vm674_vm2, %v1038_v14 }
 0x5e3   : > { %2384 = vmatmul.mubr.msk.bf16.vlgmr.msra.gmra.mrb[4].mxu0 %vm674_vm2, %v1039_v57 }
 0x5e4   : > { %2389 = vmatprep.mubr.msk.bf16.mxu0 %vm674_vm2, %v850_v53  ;;  %2388 = vmatpush3.bf16.msra.mxu0 %v2487_v47 }
 0x5ec   : > { %v2399_v59 = vpop.f32.mrb[20].mxu1 }
 0x5ed   : > { %v1216_v60 = vpop.f32.mrb[21].mxu1  ;;  %v1233_v0 = vsel %vm666_vm7, -9.8765434e+08, %v2399_v59 }
 0x5ee   : > { %v1231_v61 = vsel %vm664_vm5, -9.8765434e+08, %v1216_v60  ;;  %v2400_v62 = vpop.f32.mrb[22].mxu1  ;;  %v1241_v20 = vsel %vm740_vm6, %v1233_v0, -inf }
 0x5ef   : > { %v1219_v11 = vpop.f32.mrb[23].mxu1  ;;  %2390 = vmatmul.mubr.msk.bf16.vlgmr.msra.gmra.mrb[4].mxu0 %vm674_vm2, %v851_v51  ;;  %v1235_v63 = vsel %vm740_vm6, %v1231_v61, -inf  ;;  %v1234_v3 = vsel %vm667_vm9, -9.8765434e+08, %v2400_v62 }
 0x5f0   : > { %v1232_v1 = vsel %vm665_vm8, -9.8765434e+08, %v1219_v11  ;;  %1236 = vmax.xlane.f32.xlu0 %v1235_v63  ;;  %v1244_v4 = vsel %vm750_vm10, %v1234_v3, -inf }
 0x5f1   : > { %v1238_v2 = vsel %vm740_vm6, %v1232_v1, -inf }
 0x5f2   : > { %1239 = vmax.xlane.f32.xlu1 %v1238_v2 }
 0x5f4   : > { %1242 = vmax.xlane.f32.xlu0 %v1241_v20 }
 0x5f8   : > { %1245 = vmax.xlane.f32.xlu0 %v1244_v4 }
 0x5fc   : > { %v2421_v23 = vpop.f32.mrb[24].mxu1 }
 0x5fd   : > { %v1465_v5 = vpop.f32.mrb[25].mxu1  ;;  %v1482_v38 = vsel %vm666_vm7, -9.8765434e+08, %v2421_v23 }
 0x5fe   : > { %v2422_v6 = vpop.f32.mrb[26].mxu1  ;;  %v1480_v39 = vsel %vm664_vm5, -9.8765434e+08, %v1465_v5  ;;  %v1490_v44 = vsel %vm740_vm6, %v1482_v38, -inf }
 0x5ff   : > { %v1468_v7 = vpop.f32.mrb[27].mxu1  ;;  %v1484_v45 = vsel %vm740_vm6, %v1480_v39, -inf  ;;  %v1483_v43 = vsel %vm667_vm9, -9.8765434e+08, %v2422_v6 }
 0x600   : > { %v1481_v35 = vsel %vm665_vm8, -9.8765434e+08, %v1468_v7  ;;  %v1493_v47 = vsel %vm750_vm10, %v1483_v43, -inf }
 0x601   : > { %v1487_v37 = vsel %vm740_vm6, %v1481_v35, -inf }
 0x67d   : > { %v1237_v8 = vpop.xlane.xlu0 %1236 }
 0x67e   : > { %v1247_v9 = vsub.f32 %v1231_v61, %v1237_v8 }
 0x67f   : > { %v1240_v10 = vpop.xlane.xlu1 %1239 }
 0x680   : > { %v1251_v16 = vmul.f32 1.442695, %v1247_v9  ;;  %v1248_v17 = vsub.f32 %v1232_v1, %v1240_v10 }
 0x681   : > { %v1243_v12 = vpop.xlane.xlu0 %1242 }
 0x682   : > { %v1249_v15 = vsub.f32 %v1233_v0, %v1243_v12  ;;  %v1253_v24 = vmul.f32 1.442695, %v1248_v17  ;;  %v2488_v17 = vld [vmem:[%s3187_s3 + $0x10] sm:$0xff]  }
 0x684   : > { %v1255_v18 = vmul.f32 1.442695, %v1249_v15 }
 0x685   : > { %v1246_v19 = vpop.xlane.xlu0 %1245 }
 0x686   : > { %2558 = vpow2.f32 %v1255_v18  ;;  %v1250_v21 = vsub.f32 %v1234_v3, %v1246_v19 }
 0x687   : > { %2560 = vpow2.f32 %v1251_v16 }
 0x688   : > { %v1257_v25 = vmul.f32 1.442695, %v1250_v21 }
 0x68a   : > { %2562 = vpow2.f32 %v1257_v25 }
 0x68b   : > { %2564 = vpow2.f32 %v1253_v24 }
 0x690   : > { %v2559_v26 = vpop.eup %2558 }
 0x691   : > { %v1265_v27 = vsel %vm740_vm6, %v2559_v26, 0.0  ;;  %v2561_v28 = vpop.eup %2560 }
 0x692   : > { %1266 = vadd.xlane.f32.xlu0 %v1265_v27  ;;  %v1259_v30 = vsel %vm740_vm6, %v2561_v28, 0.0 }
 0x694   : > { %v2563_v29 = vpop.eup %2562 }
 0x695   : > { %v1268_v31 = vsel %vm750_vm10, %v2563_v29, 0.0  ;;  %v2565_v32 = vpop.eup %2564 }
 0x696   : > { %1260 = vadd.xlane.f32.xlu0 %v1259_v30  ;;  %1269 = vadd.xlane.f32.xlu1 %v1268_v31  ;;  %v1262_v34 = vsel %vm740_vm6, %v2565_v32, 0.0 }
 0x69a   : > { %1263 = vadd.xlane.f32.xlu1 %v1262_v34 }
 0x6ab   : > { %1283 = vrot.lane.b32.xlu1 %v2790_v22, %s2631_s29 }
 0x6ac   : > { %1281 = vrot.lane.b32.xlu0 %v2779_v13, %s2631_s29 }
 0x6cb   : > { %1488 = vmax.xlane.f32.xlu0 %v1487_v37 }
 0x6cf   : > { %1491 = vmax.xlane.f32.xlu0 %v1490_v44  ;;  %1485 = vmax.xlane.f32.xlu1 %v1484_v45 }
 0x6d3   : > { %1494 = vmax.xlane.f32.xlu1 %v1493_v47 }
 0x71f   : > { %v1267_v42 = vpop.xlane.xlu0 %1266 }
 0x723   : > { %v1270_v48 = vpop.xlane.xlu1 %1269  ;;  %v1261_v49 = vpop.xlane.xlu0 %1260 }
 0x724   : > { %2566 = vrcp.f32 %v1270_v48 }
 0x725   : > { %2568 = vrcp.f32 %v1261_v49 }
 0x726   : > { %2570 = vrcp.f32 %v1267_v42 }
 0x727   : > { %v1264_v50 = vpop.xlane.xlu1 %1263  ;;  %v1282_v51 = vpop.permute.xlu0 %1281 }
 0x728   : > { %2572 = vrcp.f32 %v1264_v50  ;;  %2401 = vmatprep.subr.bf16.mxu0 %v1282_v51 }
 0x729   : > { %2402 = vmatpush3.bf16.msra.mxu0 %v1282_v51 }
 0x72b   : > { %v1284_v52 = vpop.permute.xlu1 %1283 }
 0x72c   : > { %v1293_v41 = vand.u32 %v1284_v52, %v2807_v33 }
 0x72e   : > { %2403 = vmatprep.subr.bf16.mxu0 %v1293_v41  ;;  %v2567_v46 = vpop.eup %2566 }
 0x72f   : > { %2404 = vmatpush3.bf16.msra.mxu0 %v1293_v41  ;;  %v2569_v53 = vpop.eup %2568  ;;  %v1278_v56 = vmul.f32 %v2567_v46, %v2563_v29  ;;  %v2243_v46 = vld [vmem:[%s3188_s4] ss:$0 sm:$0xff] }
 0x730   : > { %v2571_v54 = vpop.eup %2570  ;;  %v1275_v57 = vmul.f32 %v2569_v53, %v2561_v28  ;;  %2409 = vmatprep.subr.bf16.mxu0 %v2488_v17 }
 0x731   : > { %v1277_v14 = vmul.f32 %v2571_v54, %v2559_v26  ;;  %v2614_v54 = vld [vmem:[%s2721_s30] sm:$0xff] }
 0x732   : > { %v2573_v55 = vpop.eup %2572 }
 0x733   : > { %v1276_v58 = vmul.f32 %v2573_v55, %v2565_v32  ;;  %v1280_v60 = vpack.c.bf16 %v1278_v56, %v1277_v14 }
 0x735   : > { %v1279_v59 = vpack.c.bf16 %v1276_v58, %v1275_v57  ;;  %v2615_v57 = vld [vmem:[%s2721_s30 + $0x18] sm:$0x7f] }
 0x737   : > { %2405 = vmatprep.mubr.msk.bf16.mxu0 %vm740_vm6, %v1279_v59  ;;  %v2616_v59 = vld [vmem:[%s2721_s30 + $0x10] sm:$0xff] }
 0x738   : > { %2406 = vmatmul.mubr.msk.bf16.vlgmr.msra.gmra.mrb[8].mxu0 %vm740_vm6, %v1280_v60 }
 0x739   : > { %2410 = vmatpush3.bf16.msra.mxu0 %v2488_v17 }
 0x758   : > { %v1489_v61 = vpop.xlane.xlu0 %1488 }
 0x759   : > { %v1497_v1 = vsub.f32 %v1481_v35, %v1489_v61 }
 0x75b   : > { %v1502_v23 = vmul.f32 1.442695, %v1497_v1 }
 0x75c   : > { %v1486_v62 = vpop.xlane.xlu1 %1485  ;;  %v1492_v11 = vpop.xlane.xlu0 %1491 }
 0x75d   : > { %v1496_v63 = vsub.f32 %v1480_v39, %v1486_v62  ;;  %v1498_v0 = vsub.f32 %v1482_v38, %v1492_v11  ;;  %v2617_v62 = vld [vmem:[%s2721_s30 + $0x8] sm:$0xff] }
 0x75f   : > { %v1504_v2 = vmul.f32 1.442695, %v1498_v0  ;;  %v1500_v20 = vmul.f32 1.442695, %v1496_v63 }
 0x760   : > { %v1495_v3 = vpop.xlane.xlu1 %1494 }
 0x761   : > { %v1499_v4 = vsub.f32 %v1483_v43, %v1495_v3  ;;  %2574 = vpow2.f32 %v1504_v2  ;;  %v2489_v43 = vld [vmem:[%s3187_s3 + $0x18] sm:$0xff]  }
 0x762   : > { %2576 = vpow2.f32 %v1500_v20 }
 0x763   : > { %v1506_v5 = vmul.f32 1.442695, %v1499_v4 }
 0x765   : > { %2578 = vpow2.f32 %v1506_v5 }
 0x766   : > { %2580 = vpow2.f32 %v1502_v23 }
 0x76b   : > { %v2575_v6 = vpop.eup %2574 }
 0x76c   : > { %v1514_v7 = vsel %vm740_vm6, %v2575_v6, 0.0  ;;  %v2577_v8 = vpop.eup %2576 }
 0x76d   : > { %1515 = vadd.xlane.f32.xlu0 %v1514_v7  ;;  %v1508_v15 = vsel %vm740_vm6, %v2577_v8, 0.0 }
 0x76f   : > { %v2579_v9 = vpop.eup %2578 }
 0x770   : > { %v1517_v10 = vsel %vm750_vm10, %v2579_v9, 0.0  ;;  %v2581_v12 = vpop.eup %2580 }
 0x771   : > { %1518 = vadd.xlane.f32.xlu1 %v1517_v10  ;;  %1509 = vadd.xlane.f32.xlu0 %v1508_v15  ;;  %v1511_v16 = vsel %vm740_vm6, %v2581_v12, 0.0 }
 0x775   : > { %1512 = vadd.xlane.f32.xlu1 %v1511_v16 }
 0x786   : > { %1532 = vrot.lane.b32.xlu1 %v2790_v22, %s2633_s15 }
 0x787   : > { %1530 = vrot.lane.b32.xlu0 %v2779_v13, %s2633_s15  ;;  %s440_s15 = scalar_lea.vmem %s3197_s13, %s2275_s27 }
 0x7fa   : > { %v1516_v18 = vpop.xlane.xlu0 %1515 }
 0x7fe   : > { %v1519_v19 = vpop.xlane.xlu1 %1518  ;;  %v1510_v21 = vpop.xlane.xlu0 %1509 }
 0x7ff   : > { %2582 = vrcp.f32 %v1510_v21 }
 0x802   : > { %v1513_v24 = vpop.xlane.xlu1 %1512  ;;  %v1531_v25 = vpop.permute.xlu0 %1530 }
 0x803   : > { %2584 = vrcp.f32 %v1513_v24  ;;  %2423 = vmatprep.subr.bf16.mxu0 %v1531_v25 }
 0x804   : > { %2586 = vrcp.f32 %v1519_v19 }
 0x805   : > { %2588 = vrcp.f32 %v1516_v18 }
 0x806   : > { %v1533_v13 = vpop.permute.xlu1 %1532 }
 0x807   : > { %v1542_v39 = vand.u32 %v1533_v13, %v2807_v33  ;;  %v2496_v13 = vld [vmem:[%s3193_s9 + $0x20] ss:$8 sps:$4 sm:$0xff]  }
 0x809   : > { %v2583_v26 = vpop.eup %2582 }
 0x80a   : > { %v1524_v32 = vmul.f32 %v2583_v26, %v2577_v8 }
 0x80b   : > { %v2407_v27 = vpop.f32.mrb[8].mxu0 }
 0x80c   : > { %v1329_v28 = vpop.f32.mrb[9].mxu0 }
 0x80d   : > { %v2585_v29 = vpop.eup %2584  ;;  %v2408_v30 = vpop.f32.mrb[10].mxu0 }
 0x80e   : > { %v1345_v31 = vpack.c.bf16 %v2408_v30, %v2407_v27  ;;  %v1332_v22 = vpop.f32.mrb[11].mxu0  ;;  %v1525_v34 = vmul.f32 %v2585_v29, %v2581_v12  ;;  %v2587_v38 = vpop.eup %2586  ;;  %v2492_v30 = vld [vmem:[%s3193_s9 + $0x4] ss:$8 sps:$4 sm:$0xff]  }
 0x80f   : > { %v1344_v35 = vpack.c.bf16 %v1332_v22, %v1329_v28  ;;  %v2589_v44 = vpop.eup %2588  ;;  %v1527_v45 = vmul.f32 %v2587_v38, %v2579_v9  ;;  %1817 = vmatprep.subr.bf16.mxu1 %v2492_v30  ;;  %v2495_v22 = vld [vmem:[%s3193_s9 + $0x14] ss:$8 sps:$4 sm:$0xff]  }
 0x810   : > { %v1528_v37 = vpack.c.bf16 %v1525_v34, %v1524_v32  ;;  %v1526_v47 = vmul.f32 %v2589_v44, %v2575_v6  ;;  %v2493_v32 = vld [vmem:[%s3193_s9 + $0x10] ss:$8 sps:$4 sm:$0xff]   ;;  %v2498_v34 = vld [vmem:[%s3193_s9 + $0x24] ss:$8 sps:$4 sm:$0xff]  }
 0x811   : > { %2411 = vmatprep.mubr.msk.bf16.mxu0 %vm674_vm2, %v1344_v35  ;;  %v2501_v35 = vld [vmem:[%s3193_s9 + $0x34] ss:$8 sps:$4 sm:$0xff]  }
 0x812   : > { %2412 = vmatmul.mubr.msk.bf16.vlgmr.msra.gmra.mrb[4].mxu0 %vm674_vm2, %v1345_v31  ;;  %v1529_v42 = vpack.c.bf16 %v1527_v45, %v1526_v47  ;;  %v2490_v31 = vld [vmem:[%s3193_s9] ss:$8 sps:$4 sm:$0xff]  }
 0x813   : > { %2424 = vmatpush3.bf16.msra.mxu0 %v1531_v25  ;;  %2427 = vmatprep.mubr.msk.bf16.mxu0 %vm740_vm6, %v1528_v37  ;;  %v2499_v37 = vld [vmem:[%s3193_s9 + $0x30] ss:$8 sps:$4 sm:$0xff]  }
 0x814   : > { %2425 = vmatprep.subr.bf16.mxu0 %v1542_v39  ;;  %1818 = vmatpush1.bf16.msra.mxu1 %v2490_v31 }
 0x815   : > { %1819 = vmatprep.subr.bf16.mxu1 %v2495_v22 }
 0x817   : > { %2426 = vmatpush3.bf16.msra.mxu0 %v1542_v39 }
 0x818   : > { %2431 = vmatprep.subr.bf16.mxu0 %v2489_v43  ;;  %1820 = vmatpush1.bf16.msra.mxu1 %v2493_v32 }
 0x819   : > { %1821 = vmatprep.subr.bf16.mxu1 %v2498_v34 }
 0x81a   : > { %2428 = vmatmul.mubr.msk.bf16.vlgmr.msra.gmra.mrb[12].mxu0 %vm740_vm6, %v1529_v42 }
 0x81b   : > { %2432 = vmatpush3.bf16.msra.mxu0 %v2489_v43 }
 0x81c   : > { %1822 = vmatpush1.bf16.msra.mxu1 %v2496_v13 }
 0x81d   : > { %1823 = vmatprep.subr.bf16.mxu1 %v2501_v35 }
 0x820   : > { %1824 = vmatpush1.bf16.msra.mxu1 %v2499_v37 }
 0x8ed   : > { %v2429_v33 = vpop.f32.mrb[12].mxu0 }
 0x8ee   : > { %v1578_v48 = vpop.f32.mrb[13].mxu0 }
 0x8ef   : > { %v2430_v49 = vpop.f32.mrb[14].mxu0 }
 0x8f0   : > { %v1594_v50 = vpack.c.bf16 %v2430_v49, %v2429_v33  ;;  %v1581_v51 = vpop.f32.mrb[15].mxu0 }
 0x8f1   : > { %v1593_v52 = vpack.c.bf16 %v1581_v51, %v1578_v48 }
 0x8f3   : > { %2433 = vmatprep.mubr.msk.bf16.mxu0 %vm674_vm2, %v1593_v52 }
 0x8f4   : > { %2434 = vmatmul.mubr.msk.bf16.vlgmr.msra.gmra.mrb[4].mxu0 %vm674_vm2, %v1594_v50 }
 0x9c7   : > { %v2435_v41 = vpop.f32.mrb[4].mxu0 }
 0x9c8   : > { %v1641_v53 = vpop.f32.mrb[5].mxu0  ;;  %v1662_v60 = vadd.f32 %v2616_v59, %v2435_v41  ;;  %v2244_v41 = vld [vmem:[%s3191_s7] ss:$0 sm:$0xff] }
 0x9c9   : > { %v1660_v55 = vadd.f32 %v2614_v54, %v1641_v53  ;;  %v2436_v56 = vpop.f32.mrb[6].mxu0 }
 0x9ca   : > { %v1663_v58 = vadd.f32 %v2615_v57, %v2436_v56  ;;  %v1644_v14 = vpop.f32.mrb[7].mxu0  ;;  %v3021_v2 = vadd.f32 %v2243_v46, %v1662_v60  ;;  %v2245_v56 = vld [vmem:[%s3192_s8] ss:$0 sm:$0xff] }
 0x9cb   : > { %v3012_v61 = vadd.f32 %v2243_v46, %v1660_v55  ;;  %v1661_v11 = vadd.f32 %v2617_v62, %v1644_v14 }
 0x9cc   : > { %v3015_v63 = vadd.f32 %v2243_v46, %v1663_v58  ;;  %v1683_v4 = vsel %vm448_vm0, %v3021_v2, 0.0 }
 0x9cd   : > { %v3017_v0 = vadd.f32 %v2243_v46, %v1661_v11  ;;  %v1677_v1 = vsel %vm448_vm0, %v3012_v61, 0.0 }
 0x9ce   : > { %1678 = vadd.xlane.f32.xlu1 %v1677_v1  ;;  %v1686_v3 = vsel %vm458_vm1, %v3015_v63, 0.0 }
 0x9cf   : > { %v1680_v20 = vsel %vm448_vm0, %v3017_v0, 0.0 }
 0x9d0   : > { %1681 = vadd.xlane.f32.xlu0 %v1680_v20 }
 0x9d2   : > { %1687 = vadd.xlane.f32.xlu1 %v1686_v3 }
 0x9d4   : > { %1684 = vadd.xlane.f32.xlu0 %v1683_v4 }
 0xa5b   : > { %v1679_v23 = vpop.xlane.xlu1 %1678 }
 0xa5c   : > { %v1689_v5 = vmul.f32 0.015625, %v1679_v23 }
 0xa5d   : > { %v1682_v6 = vpop.xlane.xlu0 %1681 }
 0xa5e   : > { %v1693_v7 = vsub.f32 %v3012_v61, %v1689_v5  ;;  %v1690_v8 = vmul.f32 0.015625, %v1682_v6  ;;  %v2502_v6 = vld [vmem:[%s3195_s11 + $0x40] sm:$0xff]  }
 0xa5f   : > { %v1688_v9 = vpop.xlane.xlu1 %1687  ;;  %2321 = vmatprep.subr.bf16.mxu0 %v2502_v6 }
 0xa60   : > { %v1694_v10 = vsub.f32 %v3017_v0, %v1690_v8  ;;  %v1692_v12 = vmul.f32 0.015625, %v1688_v9  ;;  %v1697_v15 = vmul.f32 %v1693_v7, %v1693_v7  ;;  %v2504_v8 = vld [vmem:[%s3195_s11 + $0x48] sm:$0xff]   ;;  %v2506_v9 = vld [vmem:[%s3195_s11 + $0x50] sm:$0xff]  }
 0xa61   : > { %v1685_v16 = vpop.xlane.xlu0 %1684 }
 0xa62   : > { %v1696_v17 = vsub.f32 %v3015_v63, %v1692_v12  ;;  %v1691_v18 = vmul.f32 0.015625, %v1685_v16  ;;  %v1701_v19 = vsel %vm448_vm0, %v1697_v15, 0.0  ;;  %v1698_v21 = vmul.f32 %v1694_v10, %v1694_v10  ;;  %v2508_v12 = vld [vmem:[%s3195_s11 + $0x58] sm:$0xff]   ;;  %v2510_v16 = vld [vmem:[%s3195_s11 + $0x60] sm:$0xff]  }
 0xa63   : > { %1702 = vadd.xlane.f32.xlu0 %v1701_v19  ;;  %v2509_v15 = vld [vmem:[%s3195_s11 + $0x18] sm:$0xff]   ;;  %v2513_v19 = vld [vmem:[%s3195_s11 + $0x28] sm:$0xff]  }
 0xa64   : > { %v1695_v24 = vsub.f32 %v3021_v2, %v1691_v18  ;;  %v1704_v25 = vsel %vm448_vm0, %v1698_v21, 0.0  ;;  %v1700_v26 = vmul.f32 %v1696_v17, %v1696_v17  ;;  %v2512_v18 = vld [vmem:[%s3195_s11 + $0x68] sm:$0xff]   ;;  %v2514_v21 = vld [vmem:[%s3195_s11 + $0x70] sm:$0xff]  }
 0xa65   : > { %1705 = vadd.xlane.f32.xlu1 %v1704_v25  ;;  %v2516_v25 = vld [vmem:[%s3195_s11 + $0x78] sm:$0xff]  }
 0xa66   : > { %v1699_v27 = vmul.f32 %v1695_v24, %v1695_v24  ;;  %v1710_v28 = vsel %vm458_vm1, %v1700_v26, 0.0  ;;  %v2517_v26 = vld [vmem:[%s3195_s11 + $0x38] sm:$0xff]  }
 0xa68   : > { %v1707_v29 = vsel %vm448_vm0, %v1699_v27, 0.0  ;;  %v1763_v27 = vsub.s32 0, %v2817_v40 }
 0xa69   : > { %1711 = vadd.xlane.f32.xlu1 %v1710_v28  ;;  %1708 = vadd.xlane.f32.xlu0 %v1707_v29  ;;  %v1759_v28 = vld [vmem:[%s3194_s10] sm:$0x3]  ;;  %v1767_v29 = vsub.s32 1, %v2817_v40 }
 0xa6a   : > { %v1764_v30 = vrot.slane %v1759_v28, %v1763_v27 }
 0xa6b   : > { %v1768_v31 = vrot.slane %v1759_v28, %v1767_v29 }
 0xaf0   : > { %v1703_v38 = vpop.xlane.xlu0 %1702 }
 0xaf1   : > { %v1713_v39 = vmul.f32 0.015625, %v1703_v38 }
 0xaf2   : > { %v1706_v44 = vpop.xlane.xlu1 %1705 }
 0xaf3   : > { %v1717_v45 = vadd.f32 1e-06, %v1713_v39  ;;  %v1714_v43 = vmul.f32 0.015625, %v1706_v44 }
 0xaf5   : > { %2590 = vrsqrt.f32 %v1717_v45  ;;  %v1718_v47 = vadd.f32 1e-06, %v1714_v43 }
 0xaf6   : > { %v1712_v42 = vpop.xlane.xlu1 %1711  ;;  %v1709_v33 = vpop.xlane.xlu0 %1708 }
 0xaf7   : > { %2592 = vrsqrt.f32 %v1718_v47  ;;  %v1716_v48 = vmul.f32 0.015625, %v1712_v42  ;;  %v1715_v49 = vmul.f32 0.015625, %v1709_v33 }
 0xaf9   : > { %v1720_v50 = vadd.f32 1e-06, %v1716_v48  ;;  %v1719_v51 = vadd.f32 1e-06, %v1715_v49 }
 0xafb   : > { %2594 = vrsqrt.f32 %v1720_v50 }
 0xafc   : > { %2596 = vrsqrt.f32 %v1719_v51 }
 0xaff   : > { %v2591_v52 = vpop.eup %2590 }
 0xb00   : > { %v1725_v46 = vmul.f32 %v2591_v52, %v1693_v7  ;;  %v2503_v7 = vld [vmem:[%s3195_s11] sm:$0xff]  }
 0xb01   : > { %v2593_v53 = vpop.eup %2592  ;;  %2322 = vmatpush3.bf16.msra.mxu0 %v2503_v7 }
 0xb02   : > { %v1735_v54 = vmul.f32 %v2244_v41, %v1725_v46  ;;  %v1726_v55 = vmul.f32 %v2593_v53, %v1694_v10  ;;  %2323 = vmatprep.subr.bf16.mxu0 %v2504_v8  ;;  %v2507_v10 = vld [vmem:[%s3195_s11 + $0x10] sm:$0xff]  }
 0xb04   : > { %v1736_v57 = vmul.f32 %v2244_v41, %v1726_v55  ;;  %v1745_v60 = vadd.f32 %v2245_v56, %v1735_v54 }
 0xb05   : > { %v2595_v58 = vpop.eup %2594 }
 0xb06   : > { %v2597_v14 = vpop.eup %2596  ;;  %v1728_v59 = vmul.f32 %v2595_v58, %v1696_v17  ;;  %v1746_v62 = vadd.f32 %v2245_v56, %v1736_v57  ;;  %v2511_v17 = vld [vmem:[%s3195_s11 + $0x20] sm:$0xff]  }
 0xb07   : > { %v1727_v11 = vmul.f32 %v2597_v14, %v1695_v24  ;;  %v2515_v24 = vld [vmem:[%s3195_s11 + $0x30] sm:$0xff]  }
 0xb08   : > { %v1749_v1 = vpack.c.bf16 %v1746_v62, %v1745_v60  ;;  %v1738_v20 = vmul.f32 %v2244_v41, %v1728_v59 }
 0xb09   : > { %v1737_v3 = vmul.f32 %v2244_v41, %v1727_v11 }
 0xb0a   : > { %2254 = vmatmul.mubr.msk.bf16.vlgmr.msra.gmra.mrb[28].mxu1 %vm448_vm0, %v1749_v1  ;;  %v1748_v23 = vadd.f32 %v2245_v56, %v1738_v20 }
 0xb0b   : > { %1859 = vmatprep.mubr.bf16.mxu1 %v2626_v36  ;;  %v1747_v4 = vadd.f32 %v2245_v56, %v1737_v3  ;;  %v2505_v36 = vld [vmem:[%s3195_s11 + $0x8] sm:$0xff]  }
 0xb0c   : > { %2324 = vmatpush3.bf16.msra.mxu0 %v2505_v36 }
 0xb0d   : > { %v1750_v5 = vpack.c.bf16 %v1748_v23, %v1747_v4  ;;  %2325 = vmatprep.subr.bf16.mxu0 %v2506_v9 }
 0xb10   : > { %2326 = vmatpush3.bf16.msra.mxu0 %v2507_v10 }
 0xb11   : > { %2327 = vmatprep.subr.bf16.mxu0 %v2508_v12 }
 0xb12   : > { %2255 = vmatmul.mubr.msk.bf16.gmra.mrb[32].mxu1 %vm448_vm0, %v1750_v5 }
 0xb14   : > { %2328 = vmatpush3.bf16.msra.mxu0 %v2509_v15 }
 0xb15   : > { %2329 = vmatprep.subr.bf16.mxu0 %v2510_v16 }
 0xb18   : > { %2330 = vmatpush3.bf16.msra.mxu0 %v2511_v17 }
 0xb19   : > { %2331 = vmatprep.subr.bf16.mxu0 %v2512_v18 }
 0xb1c   : > { %2332 = vmatpush3.bf16.msra.mxu0 %v2513_v19 }
 0xb1d   : > { %2333 = vmatprep.subr.bf16.mxu0 %v2514_v21 }
 0xb20   : > { %2334 = vmatpush3.bf16.msra.mxu0 %v2515_v24 }
 0xb21   : > { %2335 = vmatprep.subr.bf16.mxu0 %v2516_v25 }
 0xb24   : > { %2336 = vmatpush3.bf16.msra.mxu0 %v2517_v26 }
 0xbdd   : > { %v1851_v22 = vpop.f32.mrb[28].mxu1 }
 0xbde   : > { %v3123_v32 = vadd.f32 %v1851_v22, %v1764_v30  ;;  %v1853_v34 = vpop.f32.mrb[29].mxu1 }
 0xbdf   : > { %v3125_v13 = vadd.f32 %v1853_v34, %v1768_v31  ;;  %v1855_v35 = vpop.f32.mrb[30].mxu1 }
 0xbe0   : > { %v1878_v37 = vmul.f32 0.044715, %v3123_v32  ;;  %v3128_v38 = vadd.f32 %v1855_v35, %v1764_v30  ;;  %v1857_v39 = vpop.f32.mrb[31].mxu1  ;;  %v1870_v35 = vmul.f32 0.5, %v3123_v32 }
 0xbe1   : > { %v1879_v44 = vmul.f32 0.044715, %v3125_v13  ;;  %v3131_v45 = vadd.f32 %v1857_v39, %v1768_v31 }
 0xbe2   : > { %v1886_v40 = vmul.f32 %v1878_v37, %v3123_v32  ;;  %v1880_v43 = vmul.f32 0.044715, %v3128_v38  ;;  %v1872_v37 = vmul.f32 0.5, %v3128_v38 }
 0xbe3   : > { %v1887_v47 = vmul.f32 %v1879_v44, %v3125_v13  ;;  %v1881_v42 = vmul.f32 0.044715, %v3131_v45  ;;  %v1871_v44 = vmul.f32 0.5, %v3125_v13 }
 0xbe4   : > { %v1894_v33 = vmul.f32 %v1886_v40, %v3123_v32  ;;  %v1888_v48 = vmul.f32 %v1880_v43, %v3128_v38  ;;  %v1873_v40 = vmul.f32 0.5, %v3131_v45 }
 0xbe5   : > { %v1895_v49 = vmul.f32 %v1887_v47, %v3125_v13  ;;  %v1889_v50 = vmul.f32 %v1881_v42, %v3131_v45  ;;  %v1861_v51 = vpop.f32.mrb[32].mxu1 }
 0xbe6   : > { %v1902_v52 = vadd.f32 %v1894_v33, %v3123_v32  ;;  %v1896_v41 = vmul.f32 %v1888_v48, %v3128_v38  ;;  %v3143_v46 = vadd.f32 %v1861_v51, %v1764_v30  ;;  %v1863_v53 = vpop.f32.mrb[33].mxu1 }
 0xbe7   : > { %v1897_v54 = vmul.f32 %v1889_v50, %v3131_v45  ;;  %v3146_v55 = vadd.f32 %v1863_v53, %v1768_v31  ;;  %v1865_v56 = vpop.f32.mrb[34].mxu1  ;;  %v1903_v57 = vadd.f32 %v1895_v49, %v3125_v13 }
 0xbe8   : > { %v1910_v58 = vmul.f32 0.7978846, %v1902_v52  ;;  %v1904_v14 = vadd.f32 %v1896_v41, %v3128_v38  ;;  %v1882_v59 = vmul.f32 0.044715, %v3143_v46  ;;  %v1866_v60 = vadd.f32 %v1865_v56, %v1764_v30  ;;  %v1867_v62 = vpop.f32.mrb[35].mxu1 }
 0xbe9   : > { %v1883_v11 = vmul.f32 0.044715, %v3146_v55  ;;  %v1868_v1 = vadd.f32 %v1867_v62, %v1768_v31  ;;  %v1905_v20 = vadd.f32 %v1897_v54, %v3131_v45  ;;  %v1911_v3 = vmul.f32 0.7978846, %v1903_v57 }
 0xbea   : > { %2598 = vtanh.f32 %v1910_v58  ;;  %v1912_v4 = vmul.f32 0.7978846, %v1904_v14  ;;  %v1890_v23 = vmul.f32 %v1882_v59, %v3143_v46  ;;  %v1884_v5 = vmul.f32 0.044715, %v1866_v60 }
 0xbeb   : > { %v1891_v6 = vmul.f32 %v1883_v11, %v3146_v55  ;;  %v1885_v7 = vmul.f32 0.044715, %v1868_v1  ;;  %v1913_v8 = vmul.f32 0.7978846, %v1905_v20  ;;  %2600 = vtanh.f32 %v1911_v3 }
 0xbec   : > { %2602 = vtanh.f32 %v1912_v4  ;;  %v1898_v36 = vmul.f32 %v1890_v23, %v3143_v46  ;;  %v1892_v9 = vmul.f32 %v1884_v5, %v1866_v60  ;;  %v1874_v38 = vmul.f32 0.5, %v3143_v46 }
 0xbed   : > { %v1899_v10 = vmul.f32 %v1891_v6, %v3146_v55  ;;  %v1893_v12 = vmul.f32 %v1885_v7, %v1868_v1  ;;  %2604 = vtanh.f32 %v1913_v8  ;;  %v1876_v13 = vmul.f32 0.5, %v1866_v60 }
 0xbee   : > { %v1900_v15 = vmul.f32 %v1892_v9, %v1866_v60  ;;  %v1906_v16 = vadd.f32 %v1898_v36, %v3143_v46  ;;  %v1875_v45 = vmul.f32 0.5, %v3146_v55  ;;  %v1877_v57 = vmul.f32 0.5, %v1868_v1  ;;  %v2256_v46 = vld [vmem:[%s3196_s12] ss:$0 sm:$0xff] }
 0xbef   : > { %v1901_v17 = vmul.f32 %v1893_v12, %v1868_v1  ;;  %v1907_v18 = vadd.f32 %v1899_v10, %v3146_v55 }
 0xbf0   : > { %v1908_v19 = vadd.f32 %v1900_v15, %v1866_v60  ;;  %v1914_v21 = vmul.f32 0.7978846, %v1906_v16 }
 0xbf1   : > { %v1909_v24 = vadd.f32 %v1901_v17, %v1868_v1  ;;  %v1915_v25 = vmul.f32 0.7978846, %v1907_v18 }
 0xbf2   : > { %v1916_v26 = vmul.f32 0.7978846, %v1908_v19  ;;  %2606 = vtanh.f32 %v1914_v21 }
 0xbf3   : > { %v1917_v27 = vmul.f32 0.7978846, %v1909_v24  ;;  %2608 = vtanh.f32 %v1915_v25 }
 0xbf4   : > { %v2599_v28 = vpop.eup %2598  ;;  %2610 = vtanh.f32 %v1916_v26 }
 0xbf5   : > { %v2601_v29 = vpop.eup %2600  ;;  %v1926_v30 = vadd.f32 1.0, %v2599_v28  ;;  %2612 = vtanh.f32 %v1917_v27 }
 0xbf6   : > { %v2603_v31 = vpop.eup %2602  ;;  %v1927_v22 = vadd.f32 1.0, %v2601_v29 }
 0xbf7   : > { %v2605_v34 = vpop.eup %2604  ;;  %v1928_v39 = vadd.f32 1.0, %v2603_v31  ;;  %v1934_v47 = vmul.f32 %v1926_v30, %v1870_v35 }
 0xbf8   : > { %v1929_v43 = vadd.f32 1.0, %v2605_v34  ;;  %v1935_v33 = vmul.f32 %v1927_v22, %v1871_v44 }
 0xbf9   : > { %v1936_v42 = vmul.f32 %v1928_v39, %v1872_v37 }
 0xbfa   : > { %v1937_v48 = vmul.f32 %v1929_v43, %v1873_v40 }
 0xbfb   : > { %v1942_v49 = vpack.c.bf16 %v1936_v42, %v1934_v47 }
 0xbfc   : > { %v2607_v50 = vpop.eup %2606  ;;  %v1943_v51 = vpack.c.bf16 %v1937_v48, %v1935_v33 }
 0xbfd   : > { %v2609_v52 = vpop.eup %2608  ;;  %v1930_v41 = vadd.f32 1.0, %v2607_v50 }
 0xbfe   : > { %v2611_v53 = vpop.eup %2610  ;;  %2113 = vmatprep.mubr.bf16.mxu0 %v1943_v51  ;;  %v1931_v32 = vadd.f32 1.0, %v2609_v52 }
 0xbff   : > { %v2613_v54 = vpop.eup %2612  ;;  %2114 = vmatmul.mubr.bf16.vlgmr.msra.gmra.mrb[16].mxu0 %v1942_v49  ;;  %v1932_v56 = vadd.f32 1.0, %v2611_v53  ;;  %v1938_v14 = vmul.f32 %v1930_v41, %v1874_v38 }
 0xc00   : > { %v1933_v58 = vadd.f32 1.0, %v2613_v54  ;;  %v1939_v62 = vmul.f32 %v1931_v32, %v1875_v45 }
 0xc01   : > { %v1940_v59 = vmul.f32 %v1932_v56, %v1876_v13 }
 0xc02   : > { %v1941_v11 = vmul.f32 %v1933_v58, %v1877_v57 }
 0xc03   : > { %v1944_v20 = vpack.c.bf16 %v1940_v59, %v1938_v14 }
 0xc04   : > { %v1945_v3 = vpack.c.bf16 %v1941_v11, %v1939_v62 }
 0xc06   : > { %2121 = vmatprep.mubr.bf16.mxu0 %v1945_v3 }
 0xc07   : > { %2122 = vmatmul.mubr.bf16.gmra.mrb[20].mxu0 %v1944_v20 }
 0xcd2   : > { %v2337_v4 = vpop.f32.mrb[16].mxu0 }
 0xcd3   : > { %v2338_v60 = vpop.f32.mrb[17].mxu0 }
 0xcd4   : > { %v2339_v23 = vadd.f32 %v2338_v60, %v2337_v4  ;;  %v2340_v5 = vpop.f32.mrb[18].mxu0 }
 0xcd5   : > { %v2341_v55 = vpop.f32.mrb[19].mxu0 }
 0xcd6   : > { %v2116_v1 = vadd.f32 %v2339_v23, %v2256_v46  ;;  %v2342_v6 = vadd.f32 %v2341_v55, %v2340_v5 }
 0xcd8   : > { %v2130_v7 = vadd.f32 %v2116_v1, %v3012_v61  ;;  %v2119_v8 = vadd.f32 %v2342_v6, %v2256_v46 }
 0xcda   : > { %2134 = vst.msk [vmem:[%s440_s15] sm:$0xff] %vm448_vm0, %v2130_v7  ;;  %v2131_v36 = vadd.f32 %v2119_v8, %v3017_v0  ;;  %v2343_v9 = vpop.f32.mrb[20].mxu0 }
 0xcdb   : > { %v2344_v10 = vpop.f32.mrb[21].mxu0 }
 0xcdc   : > { %2135 = vst.msk [vmem:[%s440_s15 + $0x8] sm:$0xff] %vm448_vm0, %v2131_v36  ;;  %v2345_v12 = vadd.f32 %v2344_v10, %v2343_v9  ;;  %v2346_v15 = vpop.f32.mrb[22].mxu0 }
 0xcdd   : > { %v2347_v16 = vpop.f32.mrb[23].mxu0 }
 0xcde   : > { %v2124_v17 = vadd.f32 %v2345_v12, %v2256_v46  ;;  %v2348_v18 = vadd.f32 %v2347_v16, %v2346_v15 }
 0xce0   : > { %v2132_v19 = vadd.f32 %v2124_v17, %v3021_v2  ;;  %v2127_v21 = vadd.f32 %v2348_v18, %v2256_v46 }
 0xce2   : > { %2136 = vst.msk [vmem:[%s440_s15 + $0x10] sm:$0xff] %vm448_vm0, %v2132_v19  ;;  %v2133_v61 = vadd.f32 %v2127_v21, %v3015_v63 }
 0xce4   : > { %2137 = vst.msk [vmem:[%s440_s15 + $0x18] sm:$0x7f] %vm458_vm1, %v2133_v61 }
 0xce5 PF: > { %s23_s25 = sadd.s32 1, %s2624_s25  }
 0xce6   : > { %p20_p4 = scmp.ge.s32.totalorder %s23_s25, 4  }
 0xce8   :  { %22 = sbr.rel (!%p20_p4) target bundleno = 1 (0x1), region = 102 }

// kernel: vit_forward.13
= control target key start
LH: loop header
LB: loop body
LE: loop exit
PB: predicated region body
PF: predicated region fallthrough
CT: control target
= control target key end

     0   :  { %vm42_vm0 = vcmask 517120   ;;  %v625_v4 = vmov 0.0|0.0   ;;  %vm626_vm1 = vmmov 0   ;;  %v627_v8 = vmov 0.0   ;;  %s839_s0 = inlined_call_operand.vmem [shape: f32[2,64], index: 0, kind: input, shape index: {}]   ;;  %s840_s1 = inlined_call_operand.vmem [shape: f32[1,64], index: 1, kind: input, shape index: {}]   ;;  %s841_s2 = inlined_call_operand.vmem [shape: f32[1,64], index: 2, kind: input, shape index: {}]   ;;  %s842_s3 = inlined_call_operand.vmem [shape: f32[2,96], index: 3, kind: input, shape index: {}]   ;;  %s843_s4 = inlined_call_operand.vmem [shape: f32[96,16], index: 4, kind: input, shape index: {}]   ;;  %s844_s5 = inlined_call_operand.vmem [shape: f32[1,16], index: 5, kind: input, shape index: {}]   ;;  %s845_s6 = inlined_call_operand.vmem [shape: f32[64,64], index: 6, kind: input, shape index: {}]   ;;  %s846_s7 = inlined_call_operand.vmem [shape: f32[16,64], index: 7, kind: input, shape index: {}]   ;;  %s847_s8 = inlined_call_operand.vmem [shape: f32[1,64], index: 8, kind: input, shape index: {}]   ;;  %s848_s9 = inlined_call_operand.vmem [shape: f32[64,10], index: 9, kind: input, shape index: {}]   ;;  %s849_s10 = inlined_call_operand.vmem [shape: f32[1,10], index: 10, kind: input, shape index: {}]   ;;  %s850_s11 = inlined_call_operand.hbm [shape: f32[2,10], index: 11, kind: output, shape index: {}]  }
   0x1   :  { %v39_v0 = vld [vmem:[%s839_s0] sm:$0x3]  ;;  %v73_v2 = vld [vmem:[%s843_s4 + $0x8] sm:$0xff]  ;;  %550 = vmatprep.subr.bf16.mxu0 %v625_v4  ;;  %v74_v6 = vld [vmem:[%s843_s4 + $0x10] sm:$0xff]  ;;  %571 = vmatprep.subr.bf16.mxu1 %v625_v4 }
   0x2   :  { %v72_v1 = vld [vmem:[%s843_s4] sm:$0xff]  ;;  %v43_v3 = vsel %vm42_vm0, %v39_v0, 0.0  ;;  %v75_v7 = vld [vmem:[%s843_s4 + $0x18] sm:$0xff]  ;;  %502 = vmatprep.mubr.msk.f32.mxu0 %vm626_vm1, %v627_v8  ;;  %528 = vmatprep.mubr.msk.f32.mxu1 %vm626_vm1, %v627_v8  ;;  %v77_v11 = vld [vmem:[%s843_s4 + $0x28] sm:$0xff] }
   0x3   :  { %v551_v5 = vpack.c.bf16 %v73_v2, %v72_v1  ;;  %44 = vadd.xlane.f32.xlu0 %v43_v3  ;;  %v554_v9 = vpack.c.bf16 %v75_v7, %v74_v6  ;;  %v76_v10 = vld [vmem:[%s843_s4 + $0x20] sm:$0xff] }
   0x5   :  { %552 = vmatpush3.bf16.msra.mxu0 %v551_v5 }
   0x6   :  { %553 = vmatprep.subr.bf16.mxu0 %v625_v4 }
   0x7   :  { %16 = vsyncpa [#allocation3], 0  ;;  %v557_v12 = vpack.c.bf16 %v77_v11, %v76_v10  ;;  %v78_v13 = vld [vmem:[%s843_s4 + $0x30] sm:$0xff]  ;;  %v79_v14 = vld [vmem:[%s843_s4 + $0x38] sm:$0xff]  ;;  %vm91_vm2 = vcmask 785408   ;;  %vm175_vm3 = vcmask 130048  }
   0x8   :  { %v560_v15 = vpack.c.bf16 %v79_v14, %v78_v13  ;;  %v80_v16 = vld [vmem:[%s843_s4 + $0x40] sm:$0xff]  ;;  %v81_v17 = vld [vmem:[%s843_s4 + $0x48] sm:$0xff]  ;;  %v82_v19 = vld [vmem:[%s843_s4 + $0x50] sm:$0xff]  ;;  %vm249_vm4 = vcmask 523264   ;;  %s628_s21 = smov [#allocation2]   ;;  %vm419_vm5 = vcmask 74752  }
   0x9   :  { %555 = vmatpush3.bf16.msra.mxu0 %v554_v9  ;;  %v563_v18 = vpack.c.bf16 %v81_v17, %v80_v16  ;;  %v83_v20 = vld [vmem:[%s843_s4 + $0x58] sm:$0xff]  ;;  %v71_v22 = vld [vmem:[%s842_s3] sm:$0x3]  ;;  %v166_v29 = vld [vmem:[%s845_s6 + $0x8] sm:$0xff] }
   0xa   :  { %556 = vmatprep.subr.bf16.mxu0 %v625_v4  ;;  %v566_v21 = vpack.c.bf16 %v83_v20, %v82_v19  ;;  %v165_v28 = vld [vmem:[%s845_s6] sm:$0xff]  ;;  %v167_v31 = vld [vmem:[%s845_s6 + $0x10] sm:$0xff]  ;;  %v168_v32 = vld [vmem:[%s845_s6 + $0x18] sm:$0xff] }
   0xb   :  { %v572_v30 = vpack.c.bf16 %v166_v29, %v165_v28  ;;  %v173_v33 = vld [vmem:[%s846_s7] sm:$0xff]  ;;  %v575_v34 = vpack.c.bf16 %v168_v32, %v167_v31  ;;  %v174_v35 = vld [vmem:[%s846_s7 + $0x8] sm:$0xff]  ;;  %v171_v40 = vld [vmem:[%s845_s6 + $0x30] sm:$0xff] }
   0xc   :  { %v169_v36 = vld [vmem:[%s845_s6 + $0x20] sm:$0xff]  ;;  %v170_v37 = vld [vmem:[%s845_s6 + $0x28] sm:$0xff]  ;;  %v569_v38 = vpack.c.bf16 %v174_v35, %v173_v33  ;;  %v172_v41 = vld [vmem:[%s845_s6 + $0x38] sm:$0xff] }
   0xd   :  { %558 = vmatpush3.bf16.msra.mxu0 %v557_v12  ;;  %573 = vmatpush3.bf16.msra.mxu1 %v572_v30  ;;  %v578_v39 = vpack.c.bf16 %v170_v37, %v169_v36  ;;  %v581_v42 = vpack.c.bf16 %v172_v41, %v171_v40  ;;  %v437_v43 = vld [vmem:[%s844_s5] ss:$0 sm:$0xff]  ;;  %v332_v54 = vld [vmem:[%s848_s9 + $0x8] sm:$0xff]  ;;  %v333_v59 = vld [vmem:[%s848_s9 + $0x10] sm:$0xff] }
   0xe   :  { %559 = vmatprep.subr.bf16.mxu0 %v625_v4  ;;  %574 = vmatprep.subr.bf16.mxu1 %v625_v4  ;;  %v435_v51 = vld [vmem:[%s840_s1] ss:$0 sm:$0xff]  ;;  %v334_v60 = vld [vmem:[%s848_s9 + $0x18] sm:$0xff]  ;;  %v336_v63 = vld [vmem:[%s848_s9 + $0x28] sm:$0xff] }
   0xf   :  { %v331_v53 = vld [vmem:[%s848_s9] sm:$0xff]  ;;  %v587_v61 = vpack.c.bf16 %v334_v60, %v333_v59  ;;  %v337_v1 = vld [vmem:[%s848_s9 + $0x30] sm:$0xff]  ;;  %v338_v2 = vld [vmem:[%s848_s9 + $0x38] sm:$0xff] }
  0x10   :  { %v436_v55 = vld [vmem:[%s841_s2] ss:$0 sm:$0xff]  ;;  %v584_v57 = vpack.c.bf16 %v332_v54, %v331_v53  ;;  %v593_v3 = vpack.c.bf16 %v338_v2, %v337_v1 }
  0x11   :  { %561 = vmatpush3.bf16.msra.mxu0 %v560_v15  ;;  %576 = vmatpush3.bf16.msra.mxu1 %v575_v34  ;;  %v335_v62 = vld [vmem:[%s848_s9 + $0x20] sm:$0xff]  ;;  %s427_s9 = sshll.u32 %s628_s21, 4  ;;  %s428_s9 = int_to_ptr.vmem [resolvable:$true] %s427_s9 }
  0x12   :  { %562 = vmatprep.subr.bf16.mxu0 %v625_v4  ;;  %577 = vmatprep.subr.bf16.mxu1 %v625_v4  ;;  %v442_v11 = vld [vmem:[%s849_s10] ss:$0 sm:$0xff]  ;;  %s601_s22 = scalar_lea.vmem %s428_s9, 32  ;;  %p606_p1 = scmp.lt.s32.totalorder %s428_s9, %s428_s9 }
  0x13   :  { %p602_p0 = scmp.ne.s32.totalorder %s428_s9, %s601_s22  ;;  %p607_p2 = scmp.lt.s32.totalorder %s601_s22, %s601_s22 }
  0x15   :  { %564 = vmatpush3.bf16.msra.mxu0 %v563_v18  ;;  %579 = vmatpush3.bf16.msra.mxu1 %v578_v39  ;;  %p608_p3 = por %p607_p2, %p606_p1 }
  0x16   :  { %565 = vmatprep.subr.bf16.mxu0 %v625_v4  ;;  %580 = vmatprep.subr.bf16.mxu1 %v625_v4 }
  0x17   :  { %p609_p4 = pnand %p608_p3, %p602_p0 }
  0x19   :  { %567 = vmatpush3.bf16.msra.mxu0 %v566_v21  ;;  %582 = vmatpush3.bf16.msra.mxu1 %v581_v42 }
  0x1a   :  { %568 = vmatprep.subr.bf16.mxu0 %v625_v4  ;;  %583 = vmatprep.subr.bf16.mxu1 %v625_v4 }
  0x1c   :  { %503 = vmatmul.mubr.msk.f32.vlgmr.msra.gmra.mrb[0].mxu0 %vm91_vm2, %v71_v22 }
  0x1d   :  { %509 = vmatprep.mubr.msk.f32.mxu0 %vm626_vm1, %v627_v8  ;;  %570 = vmatpush3.bf16.msra.mxu0 %v569_v38 }
  0x90   :  { %v45_v23 = vpop.xlane.xlu0 %44 }
  0x91   :  { %v47_v24 = vmul.f32 0.015625, %v45_v23 }
  0x93   :  { %v48_v25 = vsub.f32 %v39_v0, %v47_v24  ;;  %v590_v0 = vpack.c.bf16 %v336_v63, %v335_v62 }
  0x95   :  { %v49_v26 = vmul.f32 %v48_v25, %v48_v25 }
  0x97   :  { %v50_v27 = vsel %vm42_vm0, %v49_v26, 0.0 }
  0x98   :  { %51 = vadd.xlane.f32.xlu0 %v50_v27 }
  0xef   :  { %v161_v44 = vpop.f32.mrb[0].mxu0 }
  0xf0   :  { %v162_v45 = vadd.f32 %v437_v43, %v161_v44  ;;  %v504_v46 = vpop.f32.mrb[1].mxu0 }
  0xf2   :  { %510 = vmatmul.mubr.msk.f32.vlgmr.msra.gmra.mrb[2].mxu0 %vm175_vm3, %v162_v45 }
 0x125   :  { %v52_v47 = vpop.xlane.xlu0 %51 }
 0x126   :  { %v53_v48 = vmul.f32 0.015625, %v52_v47 }
 0x128   :  { %v54_v49 = vadd.f32 1e-06, %v53_v48 }
 0x12a   :  { %599 = vrsqrt.f32 %v54_v49 }
 0x134   :  { %v600_v50 = vpop.eup %599 }
 0x135   :  { %v56_v52 = vmul.f32 %v600_v50, %v48_v25 }
 0x137   :  { %v63_v56 = vmul.f32 %v435_v51, %v56_v52 }
 0x139   :  { %v70_v58 = vadd.f32 %v436_v55, %v63_v56 }
 0x13b   :  { %529 = vmatmul.mubr.msk.f32.vlgmr.msra.gmra.mrb[0].mxu1 %vm249_vm4, %v70_v58 }
 0x13c   :  { %585 = vmatpush3.bf16.msra.mxu1 %v584_v57  ;;  %547 = vmatprep.mubr.msk.f32.mxu1 %vm626_vm1, %v627_v8  ;;  %v441_v8 = vld [vmem:[%s847_s8] ss:$0 sm:$0xff] }
 0x13d   :  { %586 = vmatprep.subr.bf16.mxu1 %v625_v4 }
 0x140   :  { %588 = vmatpush3.bf16.msra.mxu1 %v587_v61 }
 0x141   :  { %589 = vmatprep.subr.bf16.mxu1 %v625_v4 }
 0x144   :  { %591 = vmatpush3.bf16.msra.mxu1 %v590_v0 }
 0x145   :  { %592 = vmatprep.subr.bf16.mxu1 %v625_v4 }
 0x148   :  { %594 = vmatpush3.bf16.msra.mxu1 %v593_v3 }
 0x1c5   :  { %v245_v5 = vpop.f32.mrb[2].mxu0 }
 0x1c6   :  { %v511_v6 = vpop.f32.mrb[3].mxu0 }
 0x20e   :  { %v319_v7 = vpop.f32.mrb[0].mxu1 }
 0x20f   :  { %v320_v9 = vadd.f32 %v319_v7, %v245_v5  ;;  %v530_v10 = vpop.f32.mrb[1].mxu1 }
 0x211   :  { %v330_v4 = vadd.f32 %v441_v8, %v320_v9 }
 0x213   :  { %548 = vmatmul.mubr.msk.f32.vlgmr.msra.gmra.mrb[2].mxu1 %vm249_vm4, %v330_v4 }
 0x2e6   :  { %v415_v12 = vpop.f32.mrb[2].mxu1 }
 0x2e7   :  { %v416_v13 = vadd.f32 %v442_v11, %v415_v12  ;;  %v549_v14 = vpop.f32.mrb[3].mxu1 }
 0x2e9   :  { %420 = vst.msk [vmem:[#allocation2] sm:$0x3] %vm419_vm5, %v416_v13 }
 0x2ea   :  { %612 = shalt.err (!%p609_p4)
}
 0x2eb   :  { %s613_s6 = scalar_lea.hbm %s850_s11, 32 }
 0x2ec   :  { %p614_p5 = scmp.ne.s32.totalorder %s850_s11, %s613_s6  ;;  %p617_p6 = scmp.lt.u32.totalorder %s613_s6, %s850_s11 }
 0x2ee   :  { %p619_p7 = pnand %p617_p6, %p614_p5 }
 0x2f0   :  { %622 = shalt.err (!%p619_p7)
}
 0x2f1   :  { %430 = dma.vmem_to_hbm [thread:$0]  %s428_s9, 32, %s850_s11, [#allocation3]  }
 0x2f2   :  { %623 = dma.done.wait [#allocation3], 32  }
 0x2f3   :  { %624 = vsyncadd [#allocation3], 4294967264 }
 0x2f4   :  { %434 = vsyncpa [#allocation3], 1 }

</bundles_post_ra>
